<compile_context>
chip_gen: v7x
topology: tpu7x:2x2x1
jax: 0.10.0
libtpu: 0.0.40
codegen_flags: <defaults>
</compile_context>

<pallas_src>
import jax
import jax.numpy as jnp
import numpy as np
from jax import lax
from jax.experimental import pallas as pl
from jax.experimental.pallas import tpu as pltpu

DIM_IMG = 32
K = 5                        # conv kernel size
C0, C1C, C2C = 3, 6, 16      # channels: input, conv1, conv2
H1 = DIM_IMG - K + 1         # 28  conv1 output spatial
P1 = H1 // 2                 # 14  pool1 output spatial
H2 = P1 - K + 1              # 10  conv2 output spatial
P2 = H2 // 2                 # 5   pool2 output spatial

B_TILE = 8                   # images per grid step (batch stacked on the MXU M dim)
XLANE = 128                  # padded input lanes per kh tap (C0*32 = 96 real)
L1 = 256                     # c1 lanes (C1C*H1 = 168 real, zero-padded)
L2 = 128                     # s2 lanes (C1C*P1 = 84 real) -- also conv2 tap width
L3 = 256                     # c3 lanes (C2C*H2 = 160 real)
L4 = 128                     # s4 lanes (C2C*P2 = 80 real)
LFC = 128                    # padded FC lane width (120 / 84 / 10 real)
FC_PACK = 3 * LFC            # packed FC output: [F1 | F2 | F3], 128 lanes each


# ---------------------------------------------------------------------------
# Fused kernel: conv1+ReLU+pool -> conv2+ReLU+pool -> fc1+ReLU -> VD -> fc2+ReLU -> fc3
# ---------------------------------------------------------------------------
def lenet_kernel(x_ref, b1m_ref, b1b_ref, ce1_ref, co1_ref,
                 b2m_ref, b2b_ref, ce2_ref, co2_ref,
                 w1_ref, fb1_ref, wv_ref, fbv_ref, w2_ref, fb2_ref,
                 w3_ref, fb3_ref,
                 c1_ref, s2_ref, c3_ref, s4_ref, fc_ref):
    f32 = jnp.float32
    B = B_TILE

    def mm(a, b):
        return jnp.dot(a, b, preferred_element_type=f32)

    def pool_rows(v, hp, lanes):
        # rows are h-major (h*B + b): spatial-row pairs (2r, 2r+1) are adjacent,
        # sublane-tile-aligned 8-row blocks -> plain elementwise max, no gathers.
        v = v.reshape(hp, 2 * B, lanes)
        return jnp.maximum(v[:, :B, :], v[:, B:, :]).reshape(hp * B, lanes)

    x = x_ref[...]                                                   # (32, B, 128)

    # ---- conv1 (5x5 valid, 3->6) + ReLU: ONE MXU matmul, K = 5 taps * 128 ----
    lhs1 = jnp.concatenate([x[kh:kh + H1] for kh in range(K)], axis=-1)
    lhs1 = lhs1.reshape(H1 * B, K * XLANE)                           # (224, 640)
    c1 = jnp.maximum(mm(lhs1, b1m_ref[...]) + b1b_ref[...], 0.0)     # (224, 256)
    c1_ref[...] = c1                                                 # lane-dense store

    # ---- 2x2 max-pool #1: aligned row-block max + 0/1 column-selector matmuls ----
    rmax1 = pool_rows(c1, P1, L1)                                    # (112, 256)
    s2 = jnp.maximum(mm(rmax1, ce1_ref[...]), mm(rmax1, co1_ref[...]))   # (112, 128)
    s2_ref[...] = s2

    # ---- conv2 (5x5 valid, 6->16) + ReLU: ONE MXU matmul, K = 5 taps * 128 ----
    s2_3 = s2.reshape(P1, B, L2)
    lhs2 = jnp.concatenate([s2_3[kh:kh + H2] for kh in range(K)], axis=-1)
    lhs2 = lhs2.reshape(H2 * B, K * L2)                              # (80, 640)
    c3 = jnp.maximum(mm(lhs2, b2m_ref[...]) + b2b_ref[...], 0.0)     # (80, 256)
    c3_ref[...] = c3

    # ---- 2x2 max-pool #2 ----
    rmax2 = pool_rows(c3, P2, L3)                                    # (40, 256)
    s4 = jnp.maximum(mm(rmax2, ce2_ref[...]), mm(rmax2, co2_ref[...]))   # (40, 128)
    s4_ref[...] = s4

    # ---- FC stack, batch on M; weights pre-permuted / pre-padded to 128 lanes ----
    # s4 is h-major, so each fc1 tap reads one aligned (B, 128) row block.
    f1 = fb1_ref[...] + mm(s4[0:B, :], w1_ref[0:LFC, :])
    for h in range(1, P2):
        f1 = f1 + mm(s4[h * B:(h + 1) * B, :], w1_ref[h * LFC:(h + 1) * LFC, :])
    f1 = jnp.maximum(f1, 0.0)                                        # (B, 128)
    # TODO(synk): VariationalDropout is not defined in the reference file; only its
    # eval-mode deterministic linear mean (120->120) is implemented; train-mode
    # multiplicative noise and the KL term are omitted.
    vd = mm(f1, wv_ref[...]) + fbv_ref[...]                          # (B, 128)
    f2 = jnp.maximum(mm(vd, w2_ref[...]) + fb2_ref[...], 0.0)        # (B, 128)
    f3 = mm(f2, w3_ref[...]) + fb3_ref[...]                          # (B, 128)

    # single lane-dense packed store: [F1 | F2 | F3] on 3*128 lanes
    fc_ref[...] = jnp.concatenate([f1, f2, f3], axis=1)


# ---------------------------------------------------------------------------
# One-time parameter repacking (done outside jit)
# ---------------------------------------------------------------------------
def _banded_conv_matrix(w, w_in, in_pad, out_pad):
    """(cout,cin,k,k) conv weights -> kh-major banded matrix (k*in_pad, out_pad).

    Row block kh, row (ic*w_in + wi), column (oc*wo + wout) holds
    w[oc, ic, kh, wi - wout]; all padding rows/columns are zero, so the kernel's
    concatenated-tap matmul computes the valid KxK convolution exactly."""
    w = np.asarray(w, np.float32)
    cout, cin, k, _ = w.shape
    wo = w_in - k + 1
    kw = np.arange(w_in)[:, None] - np.arange(wo)[None, :]           # wi - wout
    valid = ((kw >= 0) & (kw < k)).astype(np.float32)
    kwc = np.clip(kw, 0, k - 1)
    band = w[:, :, :, kwc] * valid[None, None, None]                 # (cout,cin,k,w_in,wo)
    band = band.transpose(2, 1, 3, 0, 4).reshape(k, cin * w_in, cout * wo)
    out = np.zeros((k, in_pad, out_pad), np.float32)
    out[:, :cin * w_in, :cout * wo] = band
    return jnp.asarray(out.reshape(k * in_pad, out_pad))


def _pool_col_selectors(cout, wp, in_pad, out_pad):
    """0/1 matrices picking even/odd columns within each channel's lane group."""
    wo = 2 * wp
    even = np.zeros((in_pad, out_pad), np.float32)
    odd = np.zeros((in_pad, out_pad), np.float32)
    j = np.arange(wp)
    for oc in range(cout):
        even[oc * wo + 2 * j, oc * wp + j] = 1.0
        odd[oc * wo + 2 * j + 1, oc * wp + j] = 1.0
    return jnp.asarray(even), jnp.asarray(odd)


def _padded_fc(w, b, n_in, n_out):
    wm = np.zeros((LFC, LFC), np.float32)
    wm[:n_in, :n_out] = np.asarray(w, np.float32).T
    bm = np.zeros((1, LFC), np.float32)
    bm[0, :n_out] = np.asarray(b, np.float32)
    return jnp.asarray(wm), jnp.asarray(bm)


def preprocess_params(p):
    b1b = np.zeros((1, L1), np.float32)
    b1b[0, :C1C * H1] = np.repeat(np.asarray(p["conv1_b"], np.float32), H1)
    b2b = np.zeros((1, L3), np.float32)
    b2b[0, :C2C * H2] = np.repeat(np.asarray(p["conv2_b"], np.float32), H2)

    ce1, co1 = _pool_col_selectors(C1C, P1, L1, L2)
    ce2, co2 = _pool_col_selectors(C2C, P2, L3, L4)

    # fc1 weight: reorder input dim from PyTorch flatten (oc*25 + h*5 + w) to the
    # packed h-major S4 lane order (oc*5 + w), one 128-row block per spatial row h.
    fw = np.asarray(p["fc1_w"], np.float32).reshape(120, C2C, P2, P2)   # [out, oc, h, w]
    w1 = np.zeros((P2, LFC, LFC), np.float32)
    for h in range(P2):
        w1[h, :C2C * P2, :120] = fw[:, :, h, :].transpose(1, 2, 0).reshape(C2C * P2, 120)
    fb1 = np.zeros((1, LFC), np.float32)
    fb1[0, :120] = np.asarray(p["fc1_b"], np.float32)

    wv, fbv = _padded_fc(p["vd_w"], p["vd_b"], 120, 120)
    w2, fb2 = _padded_fc(p["fc2_w"], p["fc2_b"], 120, 84)
    w3, fb3 = _padded_fc(p["fc3_w"], p["fc3_b"], 84, 10)

    return {
        "b1m": _banded_conv_matrix(p["conv1_w"], DIM_IMG, XLANE, L1),
        "b1b": jnp.asarray(b1b),
        "ce1": ce1, "co1": co1,
        "b2m": _banded_conv_matrix(p["conv2_w"], P1, L2, L3),
        "b2b": jnp.asarray(b2b),
        "ce2": ce2, "co2": co2,
        "w1": jnp.asarray(w1.reshape(P2 * LFC, LFC)), "fb1": jnp.asarray(fb1),
        "wv": wv, "fbv": fbv, "w2": w2, "fb2": fb2, "w3": w3, "fb3": fb3,
    }


# ---------------------------------------------------------------------------
# Wrapper
# ---------------------------------------------------------------------------
CONST_NAMES = ("b1m", "b1b", "ce1", "co1", "b2m", "b2b", "ce2", "co2",
               "w1", "fb1", "wv", "fbv", "w2", "fb2", "w3", "fb3")


def _const_spec(arr):
    nd = arr.ndim
    return pl.BlockSpec(arr.shape, lambda i, _nd=nd: (0,) * _nd)


def lenet_forward(x, prep):
    n = x.shape[0]
    f32 = jnp.float32
    g = (n + B_TILE - 1) // B_TILE
    n_pad = g * B_TILE

    # pack input: h-major, batch-minor rows; channel-on-lanes, zero-padded to 128 lanes
    xp = x.transpose(0, 2, 1, 3).reshape(n, DIM_IMG, C0 * DIM_IMG)   # [n, h, c*32 + w]
    xp = jnp.pad(xp, ((0, n_pad - n), (0, 0), (0, XLANE - C0 * DIM_IMG)))
    xq = (xp.reshape(g, B_TILE, DIM_IMG, XLANE)
            .transpose(0, 2, 1, 3)
            .reshape(g * DIM_IMG, B_TILE, XLANE))                    # [(g,h), b, lane]

    consts = [prep[k] for k in CONST_NAMES]

    c1p, s2p, c3p, s4p, fcp = pl.pallas_call(
        lenet_kernel,
        grid=(g,),
        in_specs=[pl.BlockSpec((DIM_IMG, B_TILE, XLANE), lambda i: (i, 0, 0))]
                 + [_const_spec(a) for a in consts],
        out_specs=(
            pl.BlockSpec((H1 * B_TILE, L1), lambda i: (i, 0)),
            pl.BlockSpec((P1 * B_TILE, L2), lambda i: (i, 0)),
            pl.BlockSpec((H2 * B_TILE, L3), lambda i: (i, 0)),
            pl.BlockSpec((P2 * B_TILE, L4), lambda i: (i, 0)),
            pl.BlockSpec((B_TILE, FC_PACK), lambda i: (i, 0)),
        ),
        out_shape=(
            jax.ShapeDtypeStruct((g * H1 * B_TILE, L1), f32),
            jax.ShapeDtypeStruct((g * P1 * B_TILE, L2), f32),
            jax.ShapeDtypeStruct((g * H2 * B_TILE, L3), f32),
            jax.ShapeDtypeStruct((g * P2 * B_TILE, L4), f32),
            jax.ShapeDtypeStruct((g * B_TILE, FC_PACK), f32),
        ),
        compiler_params=pltpu.CompilerParams(
            dimension_semantics=("parallel",)),
    )(xq, *consts)

    # unpack the channel-packed, zero-padded lane layouts back to PyTorch NCHW / (N, F)
    def unpack(a, hsp, ch):
        a = a.reshape(g, hsp, B_TILE, a.shape[-1]).transpose(0, 2, 1, 3)
        a = a.reshape(n_pad, hsp, a.shape[-1])[:n, :, :ch * hsp]
        return a.reshape(n, hsp, ch, hsp).transpose(0, 2, 1, 3)

    c1 = unpack(c1p, H1, C1C)
    s2 = unpack(s2p, P1, C1C)
    c3 = unpack(c3p, H2, C2C)
    s4 = unpack(s4p, P2, C2C)
    fc = fcp[:n]
    f1 = fc[:, 0:120]
    f2 = fc[:, LFC:LFC + 84]
    f3 = fc[:, 2 * LFC:2 * LFC + 10]
    return x, c1, s2, c3, s4, f1, f2, f3


# ---------------------------------------------------------------------------
# Deterministic synthetic parameters (PyTorch-style U(-1/sqrt(fan_in), 1/sqrt(fan_in)))
# ---------------------------------------------------------------------------
def init_params(key):
    def uniform(k, shape, fan_in):
        bound = 1.0 / np.sqrt(fan_in)
        return jax.random.uniform(k, shape, jnp.float32, -bound, bound)

    ks = jax.random.split(key, 12)
    return {
        "conv1_w": uniform(ks[0], (6, 3, 5, 5), 3 * 5 * 5),
        "conv1_b": uniform(ks[1], (6,), 3 * 5 * 5),
        "conv2_w": uniform(ks[2], (16, 6, 5, 5), 6 * 5 * 5),
        "conv2_b": uniform(ks[3], (16,), 6 * 5 * 5),
        "fc1_w": uniform(ks[4], (120, 400), 400),
        "fc1_b": uniform(ks[5], (120,), 400),
        "vd_w": uniform(ks[6], (120, 120), 120),
        "vd_b": uniform(ks[7], (120,), 120),
        "fc2_w": uniform(ks[8], (84, 120), 120),
        "fc2_b": uniform(ks[9], (84,), 120),
        "fc3_w": uniform(ks[10], (10, 84), 84),
        "fc3_b": uniform(ks[11], (10,), 84),
    }


# ---------------------------------------------------------------------------
# Pure-JAX reference (for correctness check only)
# ---------------------------------------------------------------------------
def lenet_reference(x, p):
    def conv(inp, w, b):
        out = lax.conv_general_dilated(
            inp, w, (1, 1), "VALID", dimension_numbers=("NCHW", "OIHW", "NCHW"))
        return out + b.reshape(1, -1, 1, 1)

    def maxpool2(t):
        return lax.reduce_window(t, -jnp.inf, lax.max, (1, 1, 2, 2), (1, 1, 2, 2), "VALID")

    c1 = jax.nn.relu(conv(x, p["conv1_w"], p["conv1_b"]))
    s2 = maxpool2(c1)
    c3 = jax.nn.relu(conv(s2, p["conv2_w"], p["conv2_b"]))
    s4 = maxpool2(c3)
    flat = s4.reshape(x.shape[0], -1)
    f1 = jax.nn.relu(flat @ p["fc1_w"].T + p["fc1_b"])
    vd = f1 @ p["vd_w"].T + p["vd_b"]
    f2 = jax.nn.relu(vd @ p["fc2_w"].T + p["fc2_b"])
    f3 = f2 @ p["fc3_w"].T + p["fc3_b"]
    return x, c1, s2, c3, s4, f1, f2, f3


if __name__ == "__main__":
    key = jax.random.PRNGKey(0)
    pkey, xkey = jax.random.split(key)
    params = init_params(pkey)
    # batch 16 -> grid = 2 steps of 8 images (keeps both v7x TensorCores busy)
    x = jax.random.normal(xkey, (16, C0, DIM_IMG, DIM_IMG), dtype=jnp.float32)

    prep = preprocess_params(params)            # one-time weight repack (outside jit)
    fwd = jax.jit(lenet_forward)
    outs = jax.block_until_ready(fwd(x, prep))

    refs = lenet_reference(x, params)
    names = ["x", "C1", "S2", "C3", "S4", "F1", "F2", "F3"]
    for name, got, ref in zip(names, outs, refs):
        np.testing.assert_allclose(np.asarray(got), np.asarray(ref),
                                   rtol=1e-3, atol=1e-3, err_msg=name)

    print("KERNEL_OK")
</pallas_src>

<mosaic_0001>
module attributes {stable_mosaic.version = 11 : i64} {
  func.func @lenet_kernel(%arg0: i32, %arg1: memref<32x8x128xf32, #tpu.memory_space<vmem>>, %arg2: memref<640x256xf32, #tpu.memory_space<vmem>>, %arg3: memref<1x256xf32, #tpu.memory_space<vmem>>, %arg4: memref<256x128xf32, #tpu.memory_space<vmem>>, %arg5: memref<256x128xf32, #tpu.memory_space<vmem>>, %arg6: memref<640x256xf32, #tpu.memory_space<vmem>>, %arg7: memref<1x256xf32, #tpu.memory_space<vmem>>, %arg8: memref<256x128xf32, #tpu.memory_space<vmem>>, %arg9: memref<256x128xf32, #tpu.memory_space<vmem>>, %arg10: memref<640x128xf32, #tpu.memory_space<vmem>>, %arg11: memref<1x128xf32, #tpu.memory_space<vmem>>, %arg12: memref<128x128xf32, #tpu.memory_space<vmem>>, %arg13: memref<1x128xf32, #tpu.memory_space<vmem>>, %arg14: memref<128x128xf32, #tpu.memory_space<vmem>>, %arg15: memref<1x128xf32, #tpu.memory_space<vmem>>, %arg16: memref<128x128xf32, #tpu.memory_space<vmem>>, %arg17: memref<1x128xf32, #tpu.memory_space<vmem>>, %arg18: memref<224x256xf32, #tpu.memory_space<vmem>>, %arg19: memref<112x128xf32, #tpu.memory_space<vmem>>, %arg20: memref<80x256xf32, #tpu.memory_space<vmem>>, %arg21: memref<40x128xf32, #tpu.memory_space<vmem>>, %arg22: memref<8x384xf32, #tpu.memory_space<vmem>>) attributes {dimension_semantics = [#tpu.dimension_semantics<parallel>], iteration_bounds = array<i64: 2>, scalar_prefetch = 0 : i64, scratch_operands = 0 : i64, tpu.core_type = #tpu.core_type<tc>, window_params = [{transform_indices = @transform_0, window_bounds = array<i64: 32, 8, 128>}, {pipeline_mode = #tpu.pipeline_mode<synchronous>, transform_indices = @transform_1, window_bounds = array<i64: 640, 256>}, {pipeline_mode = #tpu.pipeline_mode<synchronous>, transform_indices = @transform_2, window_bounds = array<i64: 1, 256>}, {pipeline_mode = #tpu.pipeline_mode<synchronous>, transform_indices = @transform_3, window_bounds = array<i64: 256, 128>}, {pipeline_mode = #tpu.pipeline_mode<synchronous>, transform_indices = @transform_4, window_bounds = array<i64: 256, 128>}, {pipeline_mode = #tpu.pipeline_mode<synchronous>, transform_indices = @transform_5, window_bounds = array<i64: 640, 256>}, {pipeline_mode = #tpu.pipeline_mode<synchronous>, transform_indices = @transform_6, window_bounds = array<i64: 1, 256>}, {pipeline_mode = #tpu.pipeline_mode<synchronous>, transform_indices = @transform_7, window_bounds = array<i64: 256, 128>}, {pipeline_mode = #tpu.pipeline_mode<synchronous>, transform_indices = @transform_8, window_bounds = array<i64: 256, 128>}, {pipeline_mode = #tpu.pipeline_mode<synchronous>, transform_indices = @transform_9, window_bounds = array<i64: 640, 128>}, {pipeline_mode = #tpu.pipeline_mode<synchronous>, transform_indices = @transform_10, window_bounds = array<i64: 1, 128>}, {pipeline_mode = #tpu.pipeline_mode<synchronous>, transform_indices = @transform_11, window_bounds = array<i64: 128, 128>}, {pipeline_mode = #tpu.pipeline_mode<synchronous>, transform_indices = @transform_12, window_bounds = array<i64: 1, 128>}, {pipeline_mode = #tpu.pipeline_mode<synchronous>, transform_indices = @transform_13, window_bounds = array<i64: 128, 128>}, {pipeline_mode = #tpu.pipeline_mode<synchronous>, transform_indices = @transform_14, window_bounds = array<i64: 1, 128>}, {pipeline_mode = #tpu.pipeline_mode<synchronous>, transform_indices = @transform_15, window_bounds = array<i64: 128, 128>}, {pipeline_mode = #tpu.pipeline_mode<synchronous>, transform_indices = @transform_16, window_bounds = array<i64: 1, 128>}, {transform_indices = @transform_17, window_bounds = array<i64: 224, 256>}, {transform_indices = @transform_18, window_bounds = array<i64: 112, 128>}, {transform_indices = @transform_19, window_bounds = array<i64: 80, 256>}, {transform_indices = @transform_20, window_bounds = array<i64: 40, 128>}, {transform_indices = @transform_21, window_bounds = array<i64: 8, 384>}]} {
    %c0 = arith.constant 0 : index
    %c0_0 = arith.constant 0 : index
    %c0_1 = arith.constant 0 : index
    %0 = vector.load %arg1[%c0, %c0_0, %c0_1] : memref<32x8x128xf32, #tpu.memory_space<vmem>>, vector<32x8x128xf32>
    %1 = vector.extract_strided_slice %0 {offsets = [0, 0, 0], sizes = [28, 8, 128], strides = [1, 1, 1]} : vector<32x8x128xf32> to vector<28x8x128xf32>
    %2 = vector.extract_strided_slice %0 {offsets = [1, 0, 0], sizes = [28, 8, 128], strides = [1, 1, 1]} : vector<32x8x128xf32> to vector<28x8x128xf32>
    %3 = vector.extract_strided_slice %0 {offsets = [2, 0, 0], sizes = [28, 8, 128], strides = [1, 1, 1]} : vector<32x8x128xf32> to vector<28x8x128xf32>
    %4 = vector.extract_strided_slice %0 {offsets = [3, 0, 0], sizes = [28, 8, 128], strides = [1, 1, 1]} : vector<32x8x128xf32> to vector<28x8x128xf32>
    %5 = vector.extract_strided_slice %0 {offsets = [4, 0, 0], sizes = [28, 8, 128], strides = [1, 1, 1]} : vector<32x8x128xf32> to vector<28x8x128xf32>
    %6 = tpu.concatenate %1, %2, %3, %4, %5 in 2 : vector<28x8x128xf32>, vector<28x8x128xf32>, vector<28x8x128xf32>, vector<28x8x128xf32>, vector<28x8x128xf32> -> vector<28x8x640xf32>
    %7 = vector.shape_cast %6 : vector<28x8x640xf32> to vector<224x640xf32>
    %c0_2 = arith.constant 0 : index
    %c0_3 = arith.constant 0 : index
    %8 = vector.load %arg2[%c0_2, %c0_3] : memref<640x256xf32, #tpu.memory_space<vmem>>, vector<640x256xf32>
    %cst = arith.constant dense<0.000000e+00> : vector<224x256xf32>
    %9 = tpu.matmul %7, %8, %cst {dimension_numbers = #tpu.dot_dimension_numbers<[1], [0], [0], [1], [0, 0, 1, 1], [], []>} : vector<224x640xf32>, vector<640x256xf32>, vector<224x256xf32> -> vector<224x256xf32>
    %c0_4 = arith.constant 0 : index
    %c0_5 = arith.constant 0 : index
    %10 = vector.load %arg3[%c0_4, %c0_5] : memref<1x256xf32, #tpu.memory_space<vmem>>, vector<1x256xf32>
    %11 = vector.broadcast %10 : vector<1x256xf32> to vector<224x256xf32>
    %12 = arith.addf %9, %11 : vector<224x256xf32>
    %cst_6 = arith.constant 0.000000e+00 : f32
    %13 = vector.broadcast %cst_6 : f32 to vector<224x256xf32>
    %14 = arith.maximumf %12, %13 : vector<224x256xf32>
    %c0_7 = arith.constant 0 : index
    %c0_8 = arith.constant 0 : index
    %15 = vector.load %arg18[%c0_7, %c0_8] : memref<224x256xf32, #tpu.memory_space<vmem>>, vector<224x256xf32>
    tpu.vector_store %arg18[%c0_7, %c0_8], %14 {strides = array<i32>} : memref<224x256xf32, #tpu.memory_space<vmem>>, vector<224x256xf32>,
    %16 = vector.shape_cast %14 : vector<224x256xf32> to vector<14x16x256xf32>
    %17 = vector.extract_strided_slice %16 {offsets = [0, 0, 0], sizes = [14, 8, 256], strides = [1, 1, 1]} : vector<14x16x256xf32> to vector<14x8x256xf32>
    %18 = vector.extract_strided_slice %16 {offsets = [0, 8, 0], sizes = [14, 8, 256], strides = [1, 1, 1]} : vector<14x16x256xf32> to vector<14x8x256xf32>
    %19 = arith.maximumf %17, %18 : vector<14x8x256xf32>
    %20 = vector.shape_cast %19 : vector<14x8x256xf32> to vector<112x256xf32>
    %c0_9 = arith.constant 0 : index
    %c0_10 = arith.constant 0 : index
    %21 = vector.load %arg4[%c0_9, %c0_10] : memref<256x128xf32, #tpu.memory_space<vmem>>, vector<256x128xf32>
    %cst_11 = arith.constant dense<0.000000e+00> : vector<112x128xf32>
    %22 = tpu.matmul %20, %21, %cst_11 {dimension_numbers = #tpu.dot_dimension_numbers<[1], [0], [0], [1], [0, 0, 1, 1], [], []>} : vector<112x256xf32>, vector<256x128xf32>, vector<112x128xf32> -> vector<112x128xf32>
    %c0_12 = arith.constant 0 : index
    %c0_13 = arith.constant 0 : index
    %23 = vector.load %arg5[%c0_12, %c0_13] : memref<256x128xf32, #tpu.memory_space<vmem>>, vector<256x128xf32>
    %cst_14 = arith.constant dense<0.000000e+00> : vector<112x128xf32>
    %24 = tpu.matmul %20, %23, %cst_14 {dimension_numbers = #tpu.dot_dimension_numbers<[1], [0], [0], [1], [0, 0, 1, 1], [], []>} : vector<112x256xf32>, vector<256x128xf32>, vector<112x128xf32> -> vector<112x128xf32>
    %25 = arith.maximumf %22, %24 : vector<112x128xf32>
    %c0_15 = arith.constant 0 : index
    %c0_16 = arith.constant 0 : index
    %26 = vector.load %arg19[%c0_15, %c0_16] : memref<112x128xf32, #tpu.memory_space<vmem>>, vector<112x128xf32>
    tpu.vector_store %arg19[%c0_15, %c0_16], %25 {strides = array<i32>} : memref<112x128xf32, #tpu.memory_space<vmem>>, vector<112x128xf32>,
    %27 = vector.shape_cast %25 : vector<112x128xf32> to vector<14x8x128xf32>
    %28 = vector.extract_strided_slice %27 {offsets = [0, 0, 0], sizes = [10, 8, 128], strides = [1, 1, 1]} : vector<14x8x128xf32> to vector<10x8x128xf32>
    %29 = vector.extract_strided_slice %27 {offsets = [1, 0, 0], sizes = [10, 8, 128], strides = [1, 1, 1]} : vector<14x8x128xf32> to vector<10x8x128xf32>
    %30 = vector.extract_strided_slice %27 {offsets = [2, 0, 0], sizes = [10, 8, 128], strides = [1, 1, 1]} : vector<14x8x128xf32> to vector<10x8x128xf32>
    %31 = vector.extract_strided_slice %27 {offsets = [3, 0, 0], sizes = [10, 8, 128], strides = [1, 1, 1]} : vector<14x8x128xf32> to vector<10x8x128xf32>
    %32 = vector.extract_strided_slice %27 {offsets = [4, 0, 0], sizes = [10, 8, 128], strides = [1, 1, 1]} : vector<14x8x128xf32> to vector<10x8x128xf32>
    %33 = tpu.concatenate %28, %29, %30, %31, %32 in 2 : vector<10x8x128xf32>, vector<10x8x128xf32>, vector<10x8x128xf32>, vector<10x8x128xf32>, vector<10x8x128xf32> -> vector<10x8x640xf32>
    %34 = vector.shape_cast %33 : vector<10x8x640xf32> to vector<80x640xf32>
    %c0_17 = arith.constant 0 : index
    %c0_18 = arith.constant 0 : index
    %35 = vector.load %arg6[%c0_17, %c0_18] : memref<640x256xf32, #tpu.memory_space<vmem>>, vector<640x256xf32>
    %cst_19 = arith.constant dense<0.000000e+00> : vector<80x256xf32>
    %36 = tpu.matmul %34, %35, %cst_19 {dimension_numbers = #tpu.dot_dimension_numbers<[1], [0], [0], [1], [0, 0, 1, 1], [], []>} : vector<80x640xf32>, vector<640x256xf32>, vector<80x256xf32> -> vector<80x256xf32>
    %c0_20 = arith.constant 0 : index
    %c0_21 = arith.constant 0 : index
    %37 = vector.load %arg7[%c0_20, %c0_21] : memref<1x256xf32, #tpu.memory_space<vmem>>, vector<1x256xf32>
    %38 = vector.broadcast %37 : vector<1x256xf32> to vector<80x256xf32>
    %39 = arith.addf %36, %38 : vector<80x256xf32>
    %cst_22 = arith.constant 0.000000e+00 : f32
    %40 = vector.broadcast %cst_22 : f32 to vector<80x256xf32>
    %41 = arith.maximumf %39, %40 : vector<80x256xf32>
    %c0_23 = arith.constant 0 : index
    %c0_24 = arith.constant 0 : index
    %42 = vector.load %arg20[%c0_23, %c0_24] : memref<80x256xf32, #tpu.memory_space<vmem>>, vector<80x256xf32>
    tpu.vector_store %arg20[%c0_23, %c0_24], %41 {strides = array<i32>} : memref<80x256xf32, #tpu.memory_space<vmem>>, vector<80x256xf32>,
    %43 = vector.shape_cast %41 : vector<80x256xf32> to vector<5x16x256xf32>
    %44 = vector.extract_strided_slice %43 {offsets = [0, 0, 0], sizes = [5, 8, 256], strides = [1, 1, 1]} : vector<5x16x256xf32> to vector<5x8x256xf32>
    %45 = vector.extract_strided_slice %43 {offsets = [0, 8, 0], sizes = [5, 8, 256], strides = [1, 1, 1]} : vector<5x16x256xf32> to vector<5x8x256xf32>
    %46 = arith.maximumf %44, %45 : vector<5x8x256xf32>
    %47 = vector.shape_cast %46 : vector<5x8x256xf32> to vector<40x256xf32>
    %c0_25 = arith.constant 0 : index
    %c0_26 = arith.constant 0 : index
    %48 = vector.load %arg8[%c0_25, %c0_26] : memref<256x128xf32, #tpu.memory_space<vmem>>, vector<256x128xf32>
    %cst_27 = arith.constant dense<0.000000e+00> : vector<40x128xf32>
    %49 = tpu.matmul %47, %48, %cst_27 {dimension_numbers = #tpu.dot_dimension_numbers<[1], [0], [0], [1], [0, 0, 1, 1], [], []>} : vector<40x256xf32>, vector<256x128xf32>, vector<40x128xf32> -> vector<40x128xf32>
    %c0_28 = arith.constant 0 : index
    %c0_29 = arith.constant 0 : index
    %50 = vector.load %arg9[%c0_28, %c0_29] : memref<256x128xf32, #tpu.memory_space<vmem>>, vector<256x128xf32>
    %cst_30 = arith.constant dense<0.000000e+00> : vector<40x128xf32>
    %51 = tpu.matmul %47, %50, %cst_30 {dimension_numbers = #tpu.dot_dimension_numbers<[1], [0], [0], [1], [0, 0, 1, 1], [], []>} : vector<40x256xf32>, vector<256x128xf32>, vector<40x128xf32> -> vector<40x128xf32>
    %52 = arith.maximumf %49, %51 : vector<40x128xf32>
    %c0_31 = arith.constant 0 : index
    %c0_32 = arith.constant 0 : index
    %53 = vector.load %arg21[%c0_31, %c0_32] : memref<40x128xf32, #tpu.memory_space<vmem>>, vector<40x128xf32>
    tpu.vector_store %arg21[%c0_31, %c0_32], %52 {strides = array<i32>} : memref<40x128xf32, #tpu.memory_space<vmem>>, vector<40x128xf32>,
    %c0_33 = arith.constant 0 : index
    %c0_34 = arith.constant 0 : index
    %54 = vector.load %arg11[%c0_33, %c0_34] : memref<1x128xf32, #tpu.memory_space<vmem>>, vector<1x128xf32>
    %55 = vector.extract_strided_slice %52 {offsets = [0, 0], sizes = [8, 128], strides = [1, 1]} : vector<40x128xf32> to vector<8x128xf32>
    %c0_35 = arith.constant 0 : index
    %c0_36 = arith.constant 0 : index
    %56 = vector.load %arg10[%c0_35, %c0_36] : memref<640x128xf32, #tpu.memory_space<vmem>>, vector<128x128xf32>
    %cst_37 = arith.constant dense<0.000000e+00> : vector<8x128xf32>
    %57 = tpu.matmul %55, %56, %cst_37 {dimension_numbers = #tpu.dot_dimension_numbers<[1], [0], [0], [1], [0, 0, 1, 1], [], []>} : vector<8x128xf32>, vector<128x128xf32>, vector<8x128xf32> -> vector<8x128xf32>
    %58 = vector.broadcast %54 : vector<1x128xf32> to vector<8x128xf32>
    %59 = arith.addf %58, %57 : vector<8x128xf32>
    %60 = vector.extract_strided_slice %52 {offsets = [8, 0], sizes = [8, 128], strides = [1, 1]} : vector<40x128xf32> to vector<8x128xf32>
    %c128 = arith.constant 128 : index
    %c0_38 = arith.constant 0 : index
    %61 = vector.load %arg10[%c128, %c0_38] : memref<640x128xf32, #tpu.memory_space<vmem>>, vector<128x128xf32>
    %cst_39 = arith.constant dense<0.000000e+00> : vector<8x128xf32>
    %62 = tpu.matmul %60, %61, %cst_39 {dimension_numbers = #tpu.dot_dimension_numbers<[1], [0], [0], [1], [0, 0, 1, 1], [], []>} : vector<8x128xf32>, vector<128x128xf32>, vector<8x128xf32> -> vector<8x128xf32>
    %63 = arith.addf %59, %62 : vector<8x128xf32>
    %64 = vector.extract_strided_slice %52 {offsets = [16, 0], sizes = [8, 128], strides = [1, 1]} : vector<40x128xf32> to vector<8x128xf32>
    %c256 = arith.constant 256 : index
    %c0_40 = arith.constant 0 : index
    %65 = vector.load %arg10[%c256, %c0_40] : memref<640x128xf32, #tpu.memory_space<vmem>>, vector<128x128xf32>
    %cst_41 = arith.constant dense<0.000000e+00> : vector<8x128xf32>
    %66 = tpu.matmul %64, %65, %cst_41 {dimension_numbers = #tpu.dot_dimension_numbers<[1], [0], [0], [1], [0, 0, 1, 1], [], []>} : vector<8x128xf32>, vector<128x128xf32>, vector<8x128xf32> -> vector<8x128xf32>
    %67 = arith.addf %63, %66 : vector<8x128xf32>
    %68 = vector.extract_strided_slice %52 {offsets = [24, 0], sizes = [8, 128], strides = [1, 1]} : vector<40x128xf32> to vector<8x128xf32>
    %c384 = arith.constant 384 : index
    %c0_42 = arith.constant 0 : index
    %69 = vector.load %arg10[%c384, %c0_42] : memref<640x128xf32, #tpu.memory_space<vmem>>, vector<128x128xf32>
    %cst_43 = arith.constant dense<0.000000e+00> : vector<8x128xf32>
    %70 = tpu.matmul %68, %69, %cst_43 {dimension_numbers = #tpu.dot_dimension_numbers<[1], [0], [0], [1], [0, 0, 1, 1], [], []>} : vector<8x128xf32>, vector<128x128xf32>, vector<8x128xf32> -> vector<8x128xf32>
    %71 = arith.addf %67, %70 : vector<8x128xf32>
    %72 = vector.extract_strided_slice %52 {offsets = [32, 0], sizes = [8, 128], strides = [1, 1]} : vector<40x128xf32> to vector<8x128xf32>
    %c512 = arith.constant 512 : index
    %c0_44 = arith.constant 0 : index
    %73 = vector.load %arg10[%c512, %c0_44] : memref<640x128xf32, #tpu.memory_space<vmem>>, vector<128x128xf32>
    %cst_45 = arith.constant dense<0.000000e+00> : vector<8x128xf32>
    %74 = tpu.matmul %72, %73, %cst_45 {dimension_numbers = #tpu.dot_dimension_numbers<[1], [0], [0], [1], [0, 0, 1, 1], [], []>} : vector<8x128xf32>, vector<128x128xf32>, vector<8x128xf32> -> vector<8x128xf32>
    %75 = arith.addf %71, %74 : vector<8x128xf32>
    %cst_46 = arith.constant 0.000000e+00 : f32
    %76 = vector.broadcast %cst_46 : f32 to vector<8x128xf32>
    %77 = arith.maximumf %75, %76 : vector<8x128xf32>
    %c0_47 = arith.constant 0 : index
    %c0_48 = arith.constant 0 : index
    %78 = vector.load %arg12[%c0_47, %c0_48] : memref<128x128xf32, #tpu.memory_space<vmem>>, vector<128x128xf32>
    %cst_49 = arith.constant dense<0.000000e+00> : vector<8x128xf32>
    %79 = tpu.matmul %77, %78, %cst_49 {dimension_numbers = #tpu.dot_dimension_numbers<[1], [0], [0], [1], [0, 0, 1, 1], [], []>} : vector<8x128xf32>, vector<128x128xf32>, vector<8x128xf32> -> vector<8x128xf32>
    %c0_50 = arith.constant 0 : index
    %c0_51 = arith.constant 0 : index
    %80 = vector.load %arg13[%c0_50, %c0_51] : memref<1x128xf32, #tpu.memory_space<vmem>>, vector<1x128xf32>
    %81 = vector.broadcast %80 : vector<1x128xf32> to vector<8x128xf32>
    %82 = arith.addf %79, %81 : vector<8x128xf32>
    %c0_52 = arith.constant 0 : index
    %c0_53 = arith.constant 0 : index
    %83 = vector.load %arg14[%c0_52, %c0_53] : memref<128x128xf32, #tpu.memory_space<vmem>>, vector<128x128xf32>
    %cst_54 = arith.constant dense<0.000000e+00> : vector<8x128xf32>
    %84 = tpu.matmul %82, %83, %cst_54 {dimension_numbers = #tpu.dot_dimension_numbers<[1], [0], [0], [1], [0, 0, 1, 1], [], []>} : vector<8x128xf32>, vector<128x128xf32>, vector<8x128xf32> -> vector<8x128xf32>
    %c0_55 = arith.constant 0 : index
    %c0_56 = arith.constant 0 : index
    %85 = vector.load %arg15[%c0_55, %c0_56] : memref<1x128xf32, #tpu.memory_space<vmem>>, vector<1x128xf32>
    %86 = vector.broadcast %85 : vector<1x128xf32> to vector<8x128xf32>
    %87 = arith.addf %84, %86 : vector<8x128xf32>
    %cst_57 = arith.constant 0.000000e+00 : f32
    %88 = vector.broadcast %cst_57 : f32 to vector<8x128xf32>
    %89 = arith.maximumf %87, %88 : vector<8x128xf32>
    %c0_58 = arith.constant 0 : index
    %c0_59 = arith.constant 0 : index
    %90 = vector.load %arg16[%c0_58, %c0_59] : memref<128x128xf32, #tpu.memory_space<vmem>>, vector<128x128xf32>
    %cst_60 = arith.constant dense<0.000000e+00> : vector<8x128xf32>
    %91 = tpu.matmul %89, %90, %cst_60 {dimension_numbers = #tpu.dot_dimension_numbers<[1], [0], [0], [1], [0, 0, 1, 1], [], []>} : vector<8x128xf32>, vector<128x128xf32>, vector<8x128xf32> -> vector<8x128xf32>
    %c0_61 = arith.constant 0 : index
    %c0_62 = arith.constant 0 : index
    %92 = vector.load %arg17[%c0_61, %c0_62] : memref<1x128xf32, #tpu.memory_space<vmem>>, vector<1x128xf32>
    %93 = vector.broadcast %92 : vector<1x128xf32> to vector<8x128xf32>
    %94 = arith.addf %91, %93 : vector<8x128xf32>
    %95 = tpu.concatenate %77, %89, %94 in 1 : vector<8x128xf32>, vector<8x128xf32>, vector<8x128xf32> -> vector<8x384xf32>
    %c0_63 = arith.constant 0 : index
    %c0_64 = arith.constant 0 : index
    %96 = vector.load %arg22[%c0_63, %c0_64] : memref<8x384xf32, #tpu.memory_space<vmem>>, vector<8x384xf32>
    tpu.vector_store %arg22[%c0_63, %c0_64], %95 {strides = array<i32>} : memref<8x384xf32, #tpu.memory_space<vmem>>, vector<8x384xf32>,
    return
  }
  func.func @transform_0(%arg0: i32) -> (i32, i32, i32) {
    %c0_i32 = arith.constant 0 : i32
    %c0_i32_0 = arith.constant 0 : i32
    %c0_i32_1 = arith.constant 0 : i32
    return %arg0, %c0_i32, %c0_i32_0 : i32, i32, i32
  }
  func.func @transform_1(%arg0: i32) -> (i32, i32) {
    %c0_i32 = arith.constant 0 : i32
    %c0_i32_0 = arith.constant 0 : i32
    %c0_i32_1 = arith.constant 0 : i32
    return %c0_i32, %c0_i32_0 : i32, i32
  }
  func.func @transform_2(%arg0: i32) -> (i32, i32) {
    %c0_i32 = arith.constant 0 : i32
    %c0_i32_0 = arith.constant 0 : i32
    %c0_i32_1 = arith.constant 0 : i32
    return %c0_i32, %c0_i32_0 : i32, i32
  }
  func.func @transform_3(%arg0: i32) -> (i32, i32) {
    %c0_i32 = arith.constant 0 : i32
    %c0_i32_0 = arith.constant 0 : i32
    %c0_i32_1 = arith.constant 0 : i32
    return %c0_i32, %c0_i32_0 : i32, i32
  }
  func.func @transform_4(%arg0: i32) -> (i32, i32) {
    %c0_i32 = arith.constant 0 : i32
    %c0_i32_0 = arith.constant 0 : i32
    %c0_i32_1 = arith.constant 0 : i32
    return %c0_i32, %c0_i32_0 : i32, i32
  }
  func.func @transform_5(%arg0: i32) -> (i32, i32) {
    %c0_i32 = arith.constant 0 : i32
    %c0_i32_0 = arith.constant 0 : i32
    %c0_i32_1 = arith.constant 0 : i32
    return %c0_i32, %c0_i32_0 : i32, i32
  }
  func.func @transform_6(%arg0: i32) -> (i32, i32) {
    %c0_i32 = arith.constant 0 : i32
    %c0_i32_0 = arith.constant 0 : i32
    %c0_i32_1 = arith.constant 0 : i32
    return %c0_i32, %c0_i32_0 : i32, i32
  }
  func.func @transform_7(%arg0: i32) -> (i32, i32) {
    %c0_i32 = arith.constant 0 : i32
    %c0_i32_0 = arith.constant 0 : i32
    %c0_i32_1 = arith.constant 0 : i32
    return %c0_i32, %c0_i32_0 : i32, i32
  }
  func.func @transform_8(%arg0: i32) -> (i32, i32) {
    %c0_i32 = arith.constant 0 : i32
    %c0_i32_0 = arith.constant 0 : i32
    %c0_i32_1 = arith.constant 0 : i32
    return %c0_i32, %c0_i32_0 : i32, i32
  }
  func.func @transform_9(%arg0: i32) -> (i32, i32) {
    %c0_i32 = arith.constant 0 : i32
    %c0_i32_0 = arith.constant 0 : i32
    %c0_i32_1 = arith.constant 0 : i32
    return %c0_i32, %c0_i32_0 : i32, i32
  }
  func.func @transform_10(%arg0: i32) -> (i32, i32) {
    %c0_i32 = arith.constant 0 : i32
    %c0_i32_0 = arith.constant 0 : i32
    %c0_i32_1 = arith.constant 0 : i32
    return %c0_i32, %c0_i32_0 : i32, i32
  }
  func.func @transform_11(%arg0: i32) -> (i32, i32) {
    %c0_i32 = arith.constant 0 : i32
    %c0_i32_0 = arith.constant 0 : i32
    %c0_i32_1 = arith.constant 0 : i32
    return %c0_i32, %c0_i32_0 : i32, i32
  }
  func.func @transform_12(%arg0: i32) -> (i32, i32) {
    %c0_i32 = arith.constant 0 : i32
    %c0_i32_0 = arith.constant 0 : i32
    %c0_i32_1 = arith.constant 0 : i32
    return %c0_i32, %c0_i32_0 : i32, i32
  }
  func.func @transform_13(%arg0: i32) -> (i32, i32) {
    %c0_i32 = arith.constant 0 : i32
    %c0_i32_0 = arith.constant 0 : i32
    %c0_i32_1 = arith.constant 0 : i32
    return %c0_i32, %c0_i32_0 : i32, i32
  }
  func.func @transform_14(%arg0: i32) -> (i32, i32) {
    %c0_i32 = arith.constant 0 : i32
    %c0_i32_0 = arith.constant 0 : i32
    %c0_i32_1 = arith.constant 0 : i32
    return %c0_i32, %c0_i32_0 : i32, i32
  }
  func.func @transform_15(%arg0: i32) -> (i32, i32) {
    %c0_i32 = arith.constant 0 : i32
    %c0_i32_0 = arith.constant 0 : i32
    %c0_i32_1 = arith.constant 0 : i32
    return %c0_i32, %c0_i32_0 : i32, i32
  }
  func.func @transform_16(%arg0: i32) -> (i32, i32) {
    %c0_i32 = arith.constant 0 : i32
    %c0_i32_0 = arith.constant 0 : i32
    %c0_i32_1 = arith.constant 0 : i32
    return %c0_i32, %c0_i32_0 : i32, i32
  }
  func.func @transform_17(%arg0: i32) -> (i32, i32) {
    %c0_i32 = arith.constant 0 : i32
    %c0_i32_0 = arith.constant 0 : i32
    return %arg0, %c0_i32 : i32, i32
  }
  func.func @transform_18(%arg0: i32) -> (i32, i32) {
    %c0_i32 = arith.constant 0 : i32
    %c0_i32_0 = arith.constant 0 : i32
    return %arg0, %c0_i32 : i32, i32
  }
  func.func @transform_19(%arg0: i32) -> (i32, i32) {
    %c0_i32 = arith.constant 0 : i32
    %c0_i32_0 = arith.constant 0 : i32
    return %arg0, %c0_i32 : i32, i32
  }
  func.func @transform_20(%arg0: i32) -> (i32, i32) {
    %c0_i32 = arith.constant 0 : i32
    %c0_i32_0 = arith.constant 0 : i32
    return %arg0, %c0_i32 : i32, i32
  }
  func.func @transform_21(%arg0: i32) -> (i32, i32) {
    %c0_i32 = arith.constant 0 : i32
    %c0_i32_0 = arith.constant 0 : i32
    return %arg0, %c0_i32 : i32, i32
  }
}

</mosaic_0001>

<bundles_post_ra>
// kernel: lenet_forward.1
= control target key start
LH: loop header
LB: loop body
LE: loop exit
PB: predicated region body
PF: predicated region fallthrough
CT: control target
= control target key end

     0   :  { %s8195_s0 = inlined_call_operand.vmem [shape: f32[64,8,128], index: 0, kind: input, shape index: {}]   ;;  %s8196_s1 = inlined_call_operand.vmem [shape: f32[640,256], index: 1, kind: input, shape index: {}]   ;;  %s8197_s2 = inlined_call_operand.vmem [shape: f32[1,256], index: 2, kind: input, shape index: {}]   ;;  %s8198_s3 = inlined_call_operand.vmem [shape: f32[256,128], index: 3, kind: input, shape index: {}]   ;;  %s8199_s4 = inlined_call_operand.vmem [shape: f32[256,128], index: 4, kind: input, shape index: {}]   ;;  %s8200_s5 = inlined_call_operand.vmem [shape: f32[640,256], index: 5, kind: input, shape index: {}]   ;;  %s8201_s6 = inlined_call_operand.vmem [shape: f32[1,256], index: 6, kind: input, shape index: {}]   ;;  %s8202_s7 = inlined_call_operand.vmem [shape: f32[256,128], index: 7, kind: input, shape index: {}]   ;;  %s8203_s8 = inlined_call_operand.vmem [shape: f32[256,128], index: 8, kind: input, shape index: {}]   ;;  %s8204_s9 = inlined_call_operand.vmem [shape: f32[640,128], index: 9, kind: input, shape index: {}]   ;;  %s8205_s10 = inlined_call_operand.vmem [shape: f32[1,128], index: 10, kind: input, shape index: {}]   ;;  %s8206_s11 = inlined_call_operand.vmem [shape: f32[128,128], index: 11, kind: input, shape index: {}]   ;;  %s8207_s12 = inlined_call_operand.vmem [shape: f32[1,128], index: 12, kind: input, shape index: {}]   ;;  %s8208_s13 = inlined_call_operand.vmem [shape: f32[128,128], index: 13, kind: input, shape index: {}]   ;;  %s8209_s14 = inlined_call_operand.vmem [shape: f32[1,128], index: 14, kind: input, shape index: {}]   ;;  %s8210_s15 = inlined_call_operand.vmem [shape: f32[128,128], index: 15, kind: input, shape index: {}]   ;;  %s8211_s16 = inlined_call_operand.vmem [shape: f32[1,128], index: 16, kind: input, shape index: {}]   ;;  %s8212_s17 = inlined_call_operand.vmem [shape: f32[448,256], index: 17, kind: output, shape index: {0}]   ;;  %s8213_s18 = inlined_call_operand.vmem [shape: f32[224,128], index: 18, kind: output, shape index: {1}]   ;;  %s8214_s19 = inlined_call_operand.vmem [shape: f32[160,256], index: 19, kind: output, shape index: {2}]   ;;  %s8215_s20 = inlined_call_operand.vmem [shape: f32[80,128], index: 20, kind: output, shape index: {3}]   ;;  %s8216_s21 = inlined_call_operand.vmem [shape: f32[16,384], index: 21, kind: output, shape index: {4}]  }
   0x1   :  { %8222 = sst [smem:[#allocation3_spill]] %s8195_s0 }
   0x2   :  { %8223 = sst [smem:[#allocation4_spill]] %s8196_s1 }
   0x3   :  { %8224 = sst [smem:[#allocation5_spill]] %s8197_s2  ;;  %s5583_s2 = smov 0  }
   0x4   :  { %8225 = sst [smem:[#allocation6_spill]] %s8198_s3 }
   0x5   :  { %8226 = sst [smem:[#allocation7_spill]] %s8199_s4 }
   0x6   :  { %8227 = sst [smem:[#allocation8_spill]] %s8200_s5 }
   0x7 LB: > { %8228 = sst [smem:[#allocation2_spill]] %s5468_s2  ;;  %s5589_s25 = sadd.s32 4294967295, %s5468_s2   ;;  %s5468_s2 = sphi %s5583_s2, %s32_s2  }
   0x8   : > { %p3897_p0 = scmp.ge.s32.totalorder %s5468_s2, 1  ;;  %p597_p1 = scmp.lt.s32.totalorder %s5468_s2, 3 }
   0xa   : > { %p598_p2 = pnand %p3897_p0, %p597_p1 }
   0xb   : > { %s8229_s3 = sld [smem:[#allocation4_spill]] (!%p598_p2)  ;;  %s3898_s22 = sshll.u32 (!%p598_p2), %s5589_s25, 5  ;;  %vm5472_vm0 = vmmov (!%p598_p2), 0  }
   0xc   : > { %601 = sbr.rel (%p598_p2) target bundleno = 2432 (0x980), region = 88  ;;  %p680_p3 = scmp.lt.s32.totalorder (!%p598_p2), %s3898_s22, 63 }
   0xd   : > { %s8230_s1 = sld [smem:[#allocation3_spill]] (!%p598_p2)  ;;  %s8232_s0 = sld [smem:[#allocation7_spill]] (!%p598_p2) }
   0xe   : > { %s685_s5 = smul.u32 (!%p598_p2), 28, %s5589_s25  ;;  %s8233_s23 = sld [smem:[#allocation5_spill]] (!%p598_p2) }
   0xf   : > { %s8234_s4 = sld [smem:[#allocation8_spill]] (!%p598_p2)  ;;  %s692_s30 = smul.u32 (!%p598_p2), 14, %s5589_s25 }
  0x10   : > { %p686_p4 = scmp.lt.s32.totalorder (!%p598_p2), %s685_s5, 55  ;;  %s705_s27 = smul.u32 (!%p598_p2), 5, %s5589_s25 }
  0x11   : > { %v749_v0 = vld [vmem:[%s8229_s3 + $0x8] sm:$0xff] (!%p598_p2)  ;;  %v751_v1 = vld [vmem:[%s8229_s3 + $0x18] sm:$0xff] (!%p598_p2)  ;;  %v748_v2 = vld [vmem:[%s8229_s3] sm:$0xff] (!%p598_p2)  ;;  %p693_p5 = scmp.lt.s32.totalorder (!%p598_p2), %s692_s30, 27  ;;  %p711_p8 = scmp.lt.s32.totalorder (!%p598_p2), %s5589_s25, 1 }
  0x12   : > { %v4573_v3 = vpack.c.bf16 (!%p598_p2), %v751_v1, %v749_v0  ;;  %v750_v4 = vld [vmem:[%s8229_s3 + $0x10] sm:$0xff] (!%p598_p2)  ;;  %v753_v5 = vld [vmem:[%s8229_s3 + $0x28] sm:$0xff] (!%p598_p2)  ;;  %v755_v6 = vld [vmem:[%s8229_s3 + $0x38] sm:$0xff] (!%p598_p2)  ;;  %p706_p7 = scmp.lt.s32.totalorder (!%p598_p2), %s705_s27, 9 }
  0x13   : > { %v4575_v7 = vpack.c.bf16 %v750_v4, %v748_v2  ;;  %v4577_v8 = vpack.c.bf16 %v755_v6, %v753_v5  ;;  %v752_v9 = vld [vmem:[%s8229_s3 + $0x20] sm:$0xff]  ;;  %v754_v10 = vld [vmem:[%s8229_s3 + $0x30] sm:$0xff]  ;;  %v757_v11 = vld [vmem:[%s8229_s3 + $0x48] sm:$0xff]  ;;  %s8237_s22 = smov (!%p680_p3, %s3898_s22), 63  ;;  %s8239_s5 = smov (!%p686_p4, %s685_s5), 55 }
  0x14   : > { %4574 = vmatprep.subr.bf16.mxu0 %v4573_v3  ;;  %v759_v12 = vld [vmem:[%s8229_s3 + $0x58] sm:$0xff]  ;;  %v4579_v13 = vpack.c.bf16 %v754_v10, %v752_v9  ;;  %v756_v15 = vld [vmem:[%s8229_s3 + $0x40] sm:$0xff]  ;;  %v758_v16 = vld [vmem:[%s8229_s3 + $0x50] sm:$0xff]  ;;  %s3899_s24 = sshll.u32 %s8237_s22, 3  ;;  %s8241_s30 = smov (!%p693_p5, %s692_s30), 27 }
  0x15   : > { %4576 = vmatpush1.bf16.msra.mxu0 %v4575_v7  ;;  %v4581_v14 = vpack.c.bf16 %v759_v12, %v757_v11  ;;  %v761_v17 = vld [vmem:[%s8229_s3 + $0x68] sm:$0xff]  ;;  %v763_v18 = vld [vmem:[%s8229_s3 + $0x78] sm:$0xff]  ;;  %v4583_v19 = vpack.c.bf16 %v758_v16, %v756_v15  ;;  %v760_v21 = vld [vmem:[%s8229_s3 + $0x60] sm:$0xff]  ;;  %s5675_s2 = scalar_lea.vmem %s8230_s1, %s3899_s24  ;;  %s8231_s24 = sld [smem:[#allocation6_spill]] }
  0x16   : > { %4578 = vmatprep.subr.bf16.mxu0 %v4577_v8  ;;  %v4585_v20 = vpack.c.bf16 %v763_v18, %v761_v17  ;;  %v762_v22 = vld [vmem:[%s8229_s3 + $0x70] sm:$0xff]  ;;  %v765_v23 = vld [vmem:[%s8229_s3 + $0x88] sm:$0xff]  ;;  %v767_v24 = vld [vmem:[%s8229_s3 + $0x98] sm:$0xff]  ;;  %s3913_s1 = sshll.u32 %s8239_s5, 4  ;;  %s3902_s5 = sshll.u32 %s8241_s30, 3 }
  0x17   : > { %v4587_v25 = vpack.c.bf16 %v762_v22, %v760_v21  ;;  %v4589_v26 = vpack.c.bf16 %v767_v24, %v765_v23  ;;  %v764_v27 = vld [vmem:[%s8229_s3 + $0x80] sm:$0xff]  ;;  %v766_v28 = vld [vmem:[%s8229_s3 + $0x90] sm:$0xff]  ;;  %v769_v29 = vld [vmem:[%s8229_s3 + $0xa8] sm:$0xff]  ;;  %s6459_s28 = scalar_lea.vmem %s8212_s17, %s3913_s1  ;;  %s8245_s27 = smov (!%p706_p7, %s705_s27), 9 }
  0x18   : > { %v771_v30 = vld [vmem:[%s8229_s3 + $0xb8] sm:$0xff]  ;;  %v4591_v31 = vpack.c.bf16 %v766_v28, %v764_v27  ;;  %v768_v33 = vld [vmem:[%s8229_s3 + $0xa0] sm:$0xff]  ;;  %v770_v34 = vld [vmem:[%s8229_s3 + $0xb0] sm:$0xff] }
  0x19   : > { %4580 = vmatpush1.bf16.msra.mxu0 %v4579_v13  ;;  %v4593_v32 = vpack.c.bf16 %v771_v30, %v769_v29  ;;  %v773_v35 = vld [vmem:[%s8229_s3 + $0xc8] sm:$0xff]  ;;  %v775_v36 = vld [vmem:[%s8229_s3 + $0xd8] sm:$0xff]  ;;  %v4595_v37 = vpack.c.bf16 %v770_v34, %v768_v33  ;;  %v772_v39 = vld [vmem:[%s8229_s3 + $0xc0] sm:$0xff] }
  0x1a   : > { %4582 = vmatprep.subr.bf16.mxu0 %v4581_v14  ;;  %v4597_v38 = vpack.c.bf16 %v775_v36, %v773_v35  ;;  %v774_v40 = vld [vmem:[%s8229_s3 + $0xd0] sm:$0xff]  ;;  %v5684_v41 = vld [vmem:[%s5675_s2 + $0x8] sm:$0xff]  ;;  %v779_v43 = vld [vmem:[%s8229_s3 + $0xf8] sm:$0xff] }
  0x1b   : > { %v777_v42 = vld [vmem:[%s8229_s3 + $0xe8] sm:$0xff]  ;;  %984 = vmatprep.mubr.f32.mxu0 %v5684_v41  ;;  %v4599_v44 = vpack.c.bf16 %v774_v40, %v772_v39  ;;  %v776_v46 = vld [vmem:[%s8229_s3 + $0xe0] sm:$0xff]  ;;  %v778_v47 = vld [vmem:[%s8229_s3 + $0xf0] sm:$0xff] }
  0x1c   : > { %v4601_v45 = vpack.c.bf16 %v779_v43, %v777_v42  ;;  %v781_v48 = vld [vmem:[%s8229_s3 + $0x108] sm:$0xff]  ;;  %v783_v49 = vld [vmem:[%s8229_s3 + $0x118] sm:$0xff]  ;;  %v4603_v50 = vpack.c.bf16 %v778_v47, %v776_v46  ;;  %v780_v52 = vld [vmem:[%s8229_s3 + $0x100] sm:$0xff] }
  0x1d   : > { %4584 = vmatpush1.bf16.msra.mxu0 %v4583_v19  ;;  %v4605_v51 = vpack.c.bf16 %v783_v49, %v781_v48  ;;  %v782_v53 = vld [vmem:[%s8229_s3 + $0x110] sm:$0xff]  ;;  %v785_v54 = vld [vmem:[%s8229_s3 + $0x128] sm:$0xff]  ;;  %v787_v55 = vld [vmem:[%s8229_s3 + $0x138] sm:$0xff] }
  0x1e   : > { %4586 = vmatprep.subr.bf16.mxu0 %v4585_v20  ;;  %v4607_v56 = vpack.c.bf16 %v782_v53, %v780_v52  ;;  %v4609_v57 = vpack.c.bf16 %v787_v55, %v785_v54  ;;  %v784_v58 = vld [vmem:[%s8229_s3 + $0x120] sm:$0xff]  ;;  %v786_v59 = vld [vmem:[%s8229_s3 + $0x130] sm:$0xff]  ;;  %v789_v60 = vld [vmem:[%s8229_s3 + $0x148] sm:$0xff] }
  0x1f   : > { %v791_v61 = vld [vmem:[%s8229_s3 + $0x158] sm:$0xff]  ;;  %v4611_v62 = vpack.c.bf16 %v786_v59, %v784_v58  ;;  %v788_v0 = vld [vmem:[%s8229_s3 + $0x140] sm:$0xff]  ;;  %v790_v1 = vld [vmem:[%s8229_s3 + $0x150] sm:$0xff] }
  0x20   : > { %v4613_v63 = vpack.c.bf16 %v791_v61, %v789_v60  ;;  %v793_v2 = vld [vmem:[%s8229_s3 + $0x168] sm:$0xff]  ;;  %v795_v3 = vld [vmem:[%s8229_s3 + $0x178] sm:$0xff]  ;;  %v4615_v4 = vpack.c.bf16 %v790_v1, %v788_v0  ;;  %v792_v6 = vld [vmem:[%s8229_s3 + $0x160] sm:$0xff] }
  0x21   : > { %4588 = vmatpush1.bf16.msra.mxu0 %v4587_v25  ;;  %v4617_v5 = vpack.c.bf16 %v795_v3, %v793_v2  ;;  %v794_v7 = vld [vmem:[%s8229_s3 + $0x170] sm:$0xff]  ;;  %v797_v8 = vld [vmem:[%s8229_s3 + $0x188] sm:$0xff]  ;;  %v799_v9 = vld [vmem:[%s8229_s3 + $0x198] sm:$0xff] }
  0x22   : > { %4590 = vmatprep.subr.bf16.mxu0 %v4589_v26  ;;  %v4619_v10 = vpack.c.bf16 %v794_v7, %v792_v6  ;;  %v4621_v11 = vpack.c.bf16 %v799_v9, %v797_v8  ;;  %v796_v12 = vld [vmem:[%s8229_s3 + $0x180] sm:$0xff]  ;;  %v798_v13 = vld [vmem:[%s8229_s3 + $0x190] sm:$0xff]  ;;  %v801_v14 = vld [vmem:[%s8229_s3 + $0x1a8] sm:$0xff] }
  0x23   : > { %v803_v15 = vld [vmem:[%s8229_s3 + $0x1b8] sm:$0xff]  ;;  %v4623_v16 = vpack.c.bf16 %v798_v13, %v796_v12  ;;  %v800_v18 = vld [vmem:[%s8229_s3 + $0x1a0] sm:$0xff]  ;;  %v802_v19 = vld [vmem:[%s8229_s3 + $0x1b0] sm:$0xff] }
  0x24   : > { %v4625_v17 = vpack.c.bf16 %v803_v15, %v801_v14  ;;  %v805_v20 = vld [vmem:[%s8229_s3 + $0x1c8] sm:$0xff]  ;;  %v807_v21 = vld [vmem:[%s8229_s3 + $0x1d8] sm:$0xff]  ;;  %v4627_v22 = vpack.c.bf16 %v802_v19, %v800_v18  ;;  %v804_v24 = vld [vmem:[%s8229_s3 + $0x1c0] sm:$0xff] }
  0x25   : > { %4592 = vmatpush1.bf16.msra.mxu0 %v4591_v31  ;;  %v4629_v23 = vpack.c.bf16 %v807_v21, %v805_v20  ;;  %v806_v25 = vld [vmem:[%s8229_s3 + $0x1d0] sm:$0xff]  ;;  %v809_v26 = vld [vmem:[%s8229_s3 + $0x1e8] sm:$0xff]  ;;  %v811_v27 = vld [vmem:[%s8229_s3 + $0x1f8] sm:$0xff] }
  0x26   : > { %4594 = vmatprep.subr.bf16.mxu0 %v4593_v32  ;;  %v4631_v28 = vpack.c.bf16 %v806_v25, %v804_v24  ;;  %v4633_v29 = vpack.c.bf16 %v811_v27, %v809_v26  ;;  %v808_v30 = vld [vmem:[%s8229_s3 + $0x1e0] sm:$0xff]  ;;  %v810_v31 = vld [vmem:[%s8229_s3 + $0x1f0] sm:$0xff]  ;;  %v813_v32 = vld [vmem:[%s8229_s3 + $0x208] sm:$0xff] }
  0x27   : > { %v815_v33 = vld [vmem:[%s8229_s3 + $0x218] sm:$0xff]  ;;  %v4635_v34 = vpack.c.bf16 %v810_v31, %v808_v30  ;;  %v812_v36 = vld [vmem:[%s8229_s3 + $0x200] sm:$0xff]  ;;  %v5815_v43 = vld [vmem:[%s5675_s2 + $0x10] sm:$0xff] }
  0x28   : > { %v4637_v35 = vpack.c.bf16 %v815_v33, %v813_v32  ;;  %v819_v39 = vld [vmem:[%s8229_s3 + $0x238] sm:$0xff]  ;;  %v716_v40 = vld [vmem:[%s5675_s2] sm:$0xff]  ;;  %v818_v46 = vld [vmem:[%s8229_s3 + $0x230] sm:$0xff] }
  0x29   : > { %4596 = vmatpush1.bf16.msra.mxu0 %v4595_v37  ;;  %v814_v37 = vld [vmem:[%s8229_s3 + $0x210] sm:$0xff]  ;;  %v821_v47 = vld [vmem:[%s8229_s3 + $0x248] sm:$0xff]  ;;  %v823_v48 = vld [vmem:[%s8229_s3 + $0x258] sm:$0xff] }
  0x2a   : > { %4598 = vmatprep.subr.bf16.mxu0 %v4597_v38  ;;  %v817_v38 = vld [vmem:[%s8229_s3 + $0x228] sm:$0xff]  ;;  %v4639_v42 = vpack.c.bf16 %v814_v37, %v812_v36  ;;  %v820_v52 = vld [vmem:[%s8229_s3 + $0x240] sm:$0xff]  ;;  %v822_v53 = vld [vmem:[%s8229_s3 + $0x250] sm:$0xff] }
  0x2b   : > { %v825_v54 = vld [vmem:[%s8229_s3 + $0x268] sm:$0xff]  ;;  %v827_v55 = vld [vmem:[%s8229_s3 + $0x278] sm:$0xff]  ;;  %v824_v59 = vld [vmem:[%s8229_s3 + $0x260] sm:$0xff] }
  0x2c   : > { %v4649_v58 = vpack.c.bf16 %v827_v55, %v825_v54  ;;  %v826_v60 = vld [vmem:[%s8229_s3 + $0x270] sm:$0xff]  ;;  %v831_v61 = vld [vmem:[%s8229_s3 + $0x298] sm:$0xff]  ;;  %v828_v1 = vld [vmem:[%s8229_s3 + $0x280] sm:$0xff] }
  0x2d   : > { %4600 = vmatpush1.bf16.msra.mxu0 %v4599_v44  ;;  %v4641_v44 = vpack.c.bf16 %v819_v39, %v817_v38  ;;  %v830_v2 = vld [vmem:[%s8229_s3 + $0x290] sm:$0xff]  ;;  %v833_v3 = vld [vmem:[%s8229_s3 + $0x2a8] sm:$0xff]  ;;  %v832_v8 = vld [vmem:[%s8229_s3 + $0x2a0] sm:$0xff] }
  0x2e   : > { %4602 = vmatprep.subr.bf16.mxu0 %v4601_v45  ;;  %v816_v45 = vld [vmem:[%s8229_s3 + $0x220] sm:$0xff]  ;;  %v5882_v6 = vld [vmem:[%s5675_s2 + $0x30] sm:$0xff]  ;;  %v5899_v13 = vld [vmem:[%s5675_s2 + $0x38] sm:$0xff] }
  0x2f   : > { %v4643_v49 = vpack.c.bf16 %v818_v46, %v816_v45  ;;  %v834_v9 = vld [vmem:[%s8229_s3 + $0x2b0] sm:$0xff]  ;;  %v836_v15 = vld [vmem:[%s8229_s3 + $0x2c0] sm:$0xff]  ;;  %v843_v18 = vld [vmem:[%s8229_s3 + $0x2f8] sm:$0xff] }
  0x30   : > { %v4659_v12 = vpack.c.bf16 %v834_v9, %v832_v8  ;;  %v5916_v20 = vld [vmem:[%s5675_s2 + $0x40] sm:$0xff]  ;;  %v845_v24 = vld [vmem:[%s8229_s3 + $0x308] sm:$0xff]  ;;  %v847_v25 = vld [vmem:[%s8229_s3 + $0x318] sm:$0xff] }
  0x31   : > { %4604 = vmatpush1.bf16.msra.mxu0 %v4603_v50  ;;  %v5831_v50 = vld [vmem:[%s5675_s2 + $0x18] sm:$0xff]  ;;  %v5933_v27 = vld [vmem:[%s5675_s2 + $0x48] sm:$0xff]  ;;  %v846_v30 = vld [vmem:[%s8229_s3 + $0x310] sm:$0xff] }
  0x32   : > { %4606 = vmatprep.subr.bf16.mxu0 %v4605_v51  ;;  %v4645_v51 = vpack.c.bf16 %v823_v48, %v821_v47  ;;  %v849_v31 = vld [vmem:[%s8229_s3 + $0x328] sm:$0xff]  ;;  %v851_v32 = vld [vmem:[%s8229_s3 + $0x338] sm:$0xff]  ;;  %v848_v36 = vld [vmem:[%s8229_s3 + $0x320] sm:$0xff] }
  0x33   : > { %v850_v37 = vld [vmem:[%s8229_s3 + $0x330] sm:$0xff]  ;;  %v853_v38 = vld [vmem:[%s8229_s3 + $0x348] sm:$0xff]  ;;  %v855_v39 = vld [vmem:[%s8229_s3 + $0x358] sm:$0xff] }
  0x34   : > { %v852_v45 = vld [vmem:[%s8229_s3 + $0x340] sm:$0xff]  ;;  %v854_v46 = vld [vmem:[%s8229_s3 + $0x350] sm:$0xff]  ;;  %v857_v47 = vld [vmem:[%s8229_s3 + $0x368] sm:$0xff] }
  0x35   : > { %4608 = vmatpush1.bf16.msra.mxu0 %v4607_v56  ;;  %v4647_v56 = vpack.c.bf16 %v822_v53, %v820_v52  ;;  %v859_v48 = vld [vmem:[%s8229_s3 + $0x378] sm:$0xff]  ;;  %v856_v53 = vld [vmem:[%s8229_s3 + $0x360] sm:$0xff]  ;;  %v858_v54 = vld [vmem:[%s8229_s3 + $0x370] sm:$0xff] }
  0x36   : > { %4610 = vmatprep.subr.bf16.mxu0 %v4609_v57  ;;  %v5848_v57 = vld [vmem:[%s5675_s2 + $0x20] sm:$0xff]  ;;  %v4681_v52 = vpack.c.bf16 %v859_v48, %v857_v47  ;;  %v861_v55 = vld [vmem:[%s8229_s3 + $0x388] sm:$0xff]  ;;  %v871_v8 = vld [vmem:[%s8229_s3 + $0x3d8] sm:$0xff] }
  0x37   : > { %v883_v47 = vld [vmem:[%s8229_s3 + $0x438] sm:$0xff] }
  0x39   : > { %4612 = vmatpush1.bf16.msra.mxu0 %v4611_v62  ;;  %v4651_v62 = vpack.c.bf16 %v826_v60, %v824_v59  ;;  %v6001_v59 = vld [vmem:[%s5675_s2 + $0x68] sm:$0xff] }
  0x3a   : > { %4614 = vmatprep.subr.bf16.mxu0 %v4613_v63  ;;  %v5865_v63 = vld [vmem:[%s5675_s2 + $0x28] sm:$0xff] }
  0x3d   : > { %4616 = vmatpush1.bf16.msra.mxu0 %v4615_v4  ;;  %v835_v4 = vld [vmem:[%s8229_s3 + $0x2b8] sm:$0xff] }
  0x3e   : > { %4618 = vmatprep.subr.bf16.mxu0 %v4617_v5  ;;  %v4655_v5 = vpack.c.bf16 %v830_v2, %v828_v1  ;;  %v4657_v7 = vpack.c.bf16 %v835_v4, %v833_v3  ;;  %v6018_v2 = vld [vmem:[%s5675_s2 + $0x70] sm:$0xff]  ;;  %v864_v4 = vld [vmem:[%s8229_s3 + $0x3a0] sm:$0xff] }
  0x41   : > { %4620 = vmatpush1.bf16.msra.mxu0 %v4619_v10  ;;  %v837_v10 = vld [vmem:[%s8229_s3 + $0x2c8] sm:$0xff] }
  0x42   : > { %4622 = vmatprep.subr.bf16.mxu0 %v4621_v11  ;;  %v839_v11 = vld [vmem:[%s8229_s3 + $0x2d8] sm:$0xff] }
  0x43   : > { %v4661_v14 = vpack.c.bf16 %v839_v11, %v837_v10  ;;  %v6035_v10 = vld [vmem:[%s5675_s2 + $0x78] sm:$0xff] }
  0x45   : > { %4624 = vmatpush1.bf16.msra.mxu0 %v4623_v16  ;;  %v838_v16 = vld [vmem:[%s8229_s3 + $0x2d0] sm:$0xff] }
  0x46   : > { %4626 = vmatprep.subr.bf16.mxu0 %v4625_v17  ;;  %v841_v17 = vld [vmem:[%s8229_s3 + $0x2e8] sm:$0xff]  ;;  %v4663_v19 = vpack.c.bf16 %v838_v16, %v836_v15  ;;  %v875_v16 = vld [vmem:[%s8229_s3 + $0x3f8] sm:$0xff] }
  0x47   : > { %v4665_v21 = vpack.c.bf16 %v843_v18, %v841_v17  ;;  %v873_v15 = vld [vmem:[%s8229_s3 + $0x3e8] sm:$0xff]  ;;  %v6052_v18 = vld [vmem:[%s5675_s2 + $0x80] sm:$0xff] }
  0x49   : > { %4628 = vmatpush1.bf16.msra.mxu0 %v4627_v22  ;;  %v840_v22 = vld [vmem:[%s8229_s3 + $0x2e0] sm:$0xff] }
  0x4a   : > { %4630 = vmatprep.subr.bf16.mxu0 %v4629_v23  ;;  %v842_v23 = vld [vmem:[%s8229_s3 + $0x2f0] sm:$0xff] }
  0x4b   : > { %v4667_v26 = vpack.c.bf16 %v842_v23, %v840_v22  ;;  %v874_v22 = vld [vmem:[%s8229_s3 + $0x3f0] sm:$0xff]  ;;  %v877_v23 = vld [vmem:[%s8229_s3 + $0x408] sm:$0xff] }
  0x4d   : > { %4632 = vmatpush1.bf16.msra.mxu0 %v4631_v28  ;;  %v4669_v28 = vpack.c.bf16 %v847_v25, %v845_v24  ;;  %v879_v24 = vld [vmem:[%s8229_s3 + $0x418] sm:$0xff] }
  0x4e   : > { %4634 = vmatprep.subr.bf16.mxu0 %v4633_v29  ;;  %v844_v29 = vld [vmem:[%s8229_s3 + $0x300] sm:$0xff] }
  0x4f   : > { %v4671_v33 = vpack.c.bf16 %v846_v30, %v844_v29  ;;  %v6074_v29 = vld [vmem:[%s5675_s2 + $0x90] sm:$0xff]  ;;  %v6079_v30 = vld [vmem:[%s5675_s2 + $0x98] sm:$0xff] }
  0x51   : > { %4636 = vmatpush1.bf16.msra.mxu0 %v4635_v34  ;;  %v5950_v34 = vld [vmem:[%s5675_s2 + $0x50] sm:$0xff] }
  0x52   : > { %4638 = vmatprep.subr.bf16.mxu0 %v4637_v35  ;;  %v4673_v35 = vpack.c.bf16 %v851_v32, %v849_v31  ;;  %v6084_v31 = vld [vmem:[%s5675_s2 + $0xa0] sm:$0xff]  ;;  %v6089_v32 = vld [vmem:[%s5675_s2 + $0xa8] sm:$0xff] }
  0x54   : > { %985 = vmatmul.mubr.f32.vlgmr.msra.gmra.mrb[0].mxu0 %v716_v40  ;;  %v4675_v40 = vpack.c.bf16 %v850_v37, %v848_v36  ;;  %v6104_v36 = vld [vmem:[%s5675_s2 + $0xc0] sm:$0xff]  ;;  %v6109_v37 = vld [vmem:[%s5675_s2 + $0xc8] sm:$0xff] }
  0x55   : > { %4640 = vmatpush1.bf16.msra.mxu0 %v4639_v42  ;;  %990 = vmatprep.mubr.f32.mxu0 %v5815_v43  ;;  %v5967_v42 = vld [vmem:[%s5675_s2 + $0x58] sm:$0xff] }
  0x56   : > { %4642 = vmatprep.subr.bf16.mxu0 %v4641_v44  ;;  %v4677_v44 = vpack.c.bf16 %v855_v39, %v853_v38  ;;  %v6114_v38 = vld [vmem:[%s5675_s2 + $0xd0] sm:$0xff]  ;;  %v6119_v39 = vld [vmem:[%s5675_s2 + $0xd8] sm:$0xff] }
  0x58   : > { %991 = vmatmul.mubr.f32.gmra.mrb[2].mxu0 %v5684_v41  ;;  %v829_v41 = vld [vmem:[%s8229_s3 + $0x288] sm:$0xff] }
  0x59   : > { %996 = vmatprep.mubr.f32.mxu0 %v5831_v50  ;;  %4644 = vmatpush1.bf16.msra.mxu0 %v4643_v49  ;;  %v4653_v0 = vpack.c.bf16 %v831_v61, %v829_v41  ;;  %v4679_v49 = vpack.c.bf16 %v854_v46, %v852_v45  ;;  %v860_v41 = vld [vmem:[%s8229_s3 + $0x380] sm:$0xff]  ;;  %v862_v61 = vld [vmem:[%s8229_s3 + $0x390] sm:$0xff]  ;;  %v881_v46 = vld [vmem:[%s8229_s3 + $0x428] sm:$0xff] }
  0x5a   : > { %4646 = vmatprep.subr.bf16.mxu0 %v4645_v51  ;;  %v5984_v51 = vld [vmem:[%s5675_s2 + $0x60] sm:$0xff]  ;;  %v4687_v1 = vpack.c.bf16 %v862_v61, %v860_v41  ;;  %v878_v45 = vld [vmem:[%s8229_s3 + $0x410] sm:$0xff]  ;;  %v889_v61 = vld [vmem:[%s8229_s3 + $0x468] sm:$0xff] }
  0x5b   : > { %v886_v41 = vld [vmem:[%s8229_s3 + $0x450] sm:$0xff] }
  0x5c   : > { %997 = vmatmul.mubr.f32.gmra.mrb[4].mxu0 %v5815_v43 }
  0x5d   : > { %1002 = vmatprep.mubr.f32.mxu0 %v5848_v57  ;;  %4648 = vmatpush1.bf16.msra.mxu0 %v4647_v56  ;;  %v863_v56 = vld [vmem:[%s8229_s3 + $0x398] sm:$0xff] }
  0x5e   : > { %4650 = vmatprep.subr.bf16.mxu0 %v4649_v58  ;;  %v4683_v58 = vpack.c.bf16 %v858_v54, %v856_v53  ;;  %v4685_v60 = vpack.c.bf16 %v863_v56, %v861_v55  ;;  %v882_v53 = vld [vmem:[%s8229_s3 + $0x430] sm:$0xff]  ;;  %v885_v54 = vld [vmem:[%s8229_s3 + $0x448] sm:$0xff]  ;;  %v887_v55 = vld [vmem:[%s8229_s3 + $0x458] sm:$0xff] }
  0x60   : > { %1003 = vmatmul.mubr.f32.gmra.mrb[6].mxu0 %v5831_v50 }
  0x61   : > { %1008 = vmatprep.mubr.f32.mxu0 %v5865_v63  ;;  %4652 = vmatpush1.bf16.msra.mxu0 %v4651_v62  ;;  %v865_v62 = vld [vmem:[%s8229_s3 + $0x3a8] sm:$0xff] }
  0x62   : > { %4654 = vmatprep.subr.bf16.mxu0 %v4653_v0  ;;  %v867_v0 = vld [vmem:[%s8229_s3 + $0x3b8] sm:$0xff] }
  0x63   : > { %v4689_v3 = vpack.c.bf16 %v867_v0, %v865_v62 }
  0x64   : > { %1009 = vmatmul.mubr.f32.gmra.mrb[8].mxu0 %v5848_v57 }
  0x65   : > { %1014 = vmatprep.mubr.f32.mxu0 %v5882_v6  ;;  %4656 = vmatpush1.bf16.msra.mxu0 %v4655_v5  ;;  %v866_v5 = vld [vmem:[%s8229_s3 + $0x3b0] sm:$0xff] }
  0x66   : > { %4658 = vmatprep.subr.bf16.mxu0 %v4657_v7  ;;  %v869_v7 = vld [vmem:[%s8229_s3 + $0x3c8] sm:$0xff]  ;;  %v4691_v9 = vpack.c.bf16 %v866_v5, %v864_v4 }
  0x67   : > { %v4693_v11 = vpack.c.bf16 %v871_v8, %v869_v7  ;;  %v893_v4 = vld [vmem:[%s8229_s3 + $0x488] sm:$0xff]  ;;  %v892_v8 = vld [vmem:[%s8229_s3 + $0x480] sm:$0xff] }
  0x68   : > { %1015 = vmatmul.mubr.f32.gmra.mrb[10].mxu0 %v5865_v63 }
  0x69   : > { %1020 = vmatprep.mubr.f32.mxu0 %v5899_v13  ;;  %4660 = vmatpush1.bf16.msra.mxu0 %v4659_v12  ;;  %v868_v12 = vld [vmem:[%s8229_s3 + $0x3c0] sm:$0xff] }
  0x6a   : > { %4662 = vmatprep.subr.bf16.mxu0 %v4661_v14  ;;  %v870_v14 = vld [vmem:[%s8229_s3 + $0x3d0] sm:$0xff] }
  0x6b   : > { %v4695_v17 = vpack.c.bf16 %v870_v14, %v868_v12  ;;  %v899_v12 = vld [vmem:[%s8229_s3 + $0x4b8] sm:$0xff] }
  0x6c   : > { %1021 = vmatmul.mubr.f32.gmra.mrb[12].mxu0 %v5882_v6 }
  0x6d   : > { %1026 = vmatprep.mubr.f32.mxu0 %v5916_v20  ;;  %4664 = vmatpush1.bf16.msra.mxu0 %v4663_v19  ;;  %v4697_v19 = vpack.c.bf16 %v875_v16, %v873_v15  ;;  %v896_v16 = vld [vmem:[%s8229_s3 + $0x4a0] sm:$0xff] }
  0x6e   : > { %4666 = vmatprep.subr.bf16.mxu0 %v4665_v21  ;;  %v872_v21 = vld [vmem:[%s8229_s3 + $0x3e0] sm:$0xff] }
  0x6f   : > { %v4699_v25 = vpack.c.bf16 %v874_v22, %v872_v21  ;;  %v903_v21 = vld [vmem:[%s8229_s3 + $0x4d8] sm:$0xff] }
  0x70   : > { %1027 = vmatmul.mubr.f32.gmra.mrb[14].mxu0 %v5899_v13 }
  0x71   : > { %1032 = vmatprep.mubr.f32.mxu0 %v5933_v27  ;;  %4668 = vmatpush1.bf16.msra.mxu0 %v4667_v26  ;;  %v6069_v26 = vld [vmem:[%s5675_s2 + $0x88] sm:$0xff] }
  0x72   : > { %4670 = vmatprep.subr.bf16.mxu0 %v4669_v28  ;;  %v4701_v28 = vpack.c.bf16 %v879_v24, %v877_v23  ;;  %v900_v24 = vld [vmem:[%s8229_s3 + $0x4c0] sm:$0xff] }
  0x74   : > { %1033 = vmatmul.mubr.f32.gmra.mrb[16].mxu0 %v5916_v20 }
  0x75   : > { %1038 = vmatprep.mubr.f32.mxu0 %v5950_v34  ;;  %4672 = vmatpush1.bf16.msra.mxu0 %v4671_v33  ;;  %v6094_v33 = vld [vmem:[%s5675_s2 + $0xb0] sm:$0xff] }
  0x76   : > { %4674 = vmatprep.subr.bf16.mxu0 %v4673_v35  ;;  %v6099_v35 = vld [vmem:[%s5675_s2 + $0xb8] sm:$0xff] }
  0x78   : > { %1039 = vmatmul.mubr.f32.gmra.mrb[18].mxu0 %v5933_v27 }
  0x79   : > { %1044 = vmatprep.mubr.f32.mxu0 %v5967_v42  ;;  %4676 = vmatpush1.bf16.msra.mxu0 %v4675_v40  ;;  %v6124_v40 = vld [vmem:[%s5675_s2 + $0xe0] sm:$0xff] }
  0x7a   : > { %4678 = vmatprep.subr.bf16.mxu0 %v4677_v44  ;;  %v876_v44 = vld [vmem:[%s8229_s3 + $0x400] sm:$0xff] }
  0x7b   : > { %v4703_v48 = vpack.c.bf16 %v878_v45, %v876_v44  ;;  %v907_v44 = vld [vmem:[%s8229_s3 + $0x4f8] sm:$0xff] }
  0x7c   : > { %1045 = vmatmul.mubr.f32.gmra.mrb[20].mxu0 %v5950_v34 }
  0x7d   : > { %1050 = vmatprep.mubr.f32.mxu0 %v5984_v51  ;;  %4680 = vmatpush1.bf16.msra.mxu0 %v4679_v49  ;;  %v4705_v49 = vpack.c.bf16 %v883_v47, %v881_v46  ;;  %v904_v47 = vld [vmem:[%s8229_s3 + $0x4e0] sm:$0xff] }
  0x7e   : > { %4682 = vmatprep.subr.bf16.mxu0 %v4681_v52  ;;  %v880_v52 = vld [vmem:[%s8229_s3 + $0x420] sm:$0xff] }
  0x7f   : > { %v4707_v56 = vpack.c.bf16 %v882_v53, %v880_v52  ;;  %v1775_v52 = vld [vmem:[%s8231_s24 + $0x80] sm:$0xff]  ;;  %v1776_v53 = vld [vmem:[%s8231_s24 + $0x88] sm:$0xff] }
  0x80   : > { %1051 = vmatmul.mubr.f32.gmra.mrb[22].mxu0 %v5967_v42 }
  0x81   : > { %1056 = vmatprep.mubr.f32.mxu0 %v6001_v59  ;;  %4684 = vmatpush1.bf16.msra.mxu0 %v4683_v58  ;;  %v4709_v58 = vpack.c.bf16 %v887_v55, %v885_v54  ;;  %v1759_v54 = vld [vmem:[%s8231_s24] sm:$0xff]  ;;  %v4733_v55 = vpack.c.bf16 %v1776_v53, %v1775_v52 }
  0x82   : > { %4686 = vmatprep.subr.bf16.mxu0 %v4685_v60  ;;  %v884_v60 = vld [vmem:[%s8229_s3 + $0x440] sm:$0xff] }
  0x83   : > { %v4711_v62 = vpack.c.bf16 %v886_v41, %v884_v60  ;;  %v1778_v60 = vld [vmem:[%s8231_s24 + $0x98] sm:$0xff]  ;;  %4734 = vmatprep.subr.bf16.mxu1 %v4733_v55 }
  0x84   : > { %1057 = vmatmul.mubr.f32.gmra.mrb[24].mxu0 %v5984_v51 }
  0x85   : > { %1062 = vmatprep.mubr.f32.mxu0 %v6018_v2  ;;  %4688 = vmatpush1.bf16.msra.mxu0 %v4687_v1  ;;  %v888_v1 = vld [vmem:[%s8229_s3 + $0x460] sm:$0xff] }
  0x86   : > { %4690 = vmatprep.subr.bf16.mxu0 %v4689_v3  ;;  %v890_v3 = vld [vmem:[%s8229_s3 + $0x470] sm:$0xff] }
  0x87   : > { %v4715_v5 = vpack.c.bf16 %v890_v3, %v888_v1  ;;  %v1780_v1 = vld [vmem:[%s8231_s24 + $0xa8] sm:$0xff] }
  0x88   : > { %1063 = vmatmul.mubr.f32.gmra.mrb[26].mxu0 %v6001_v59 }
  0x89   : > { %1068 = vmatprep.mubr.f32.mxu0 %v6035_v10  ;;  %4692 = vmatpush1.bf16.msra.mxu0 %v4691_v9  ;;  %v894_v9 = vld [vmem:[%s8229_s3 + $0x490] sm:$0xff] }
  0x8a   : > { %4694 = vmatprep.subr.bf16.mxu0 %v4693_v11  ;;  %v897_v11 = vld [vmem:[%s8229_s3 + $0x4a8] sm:$0xff]  ;;  %v4719_v14 = vpack.c.bf16 %v894_v9, %v892_v8  ;;  %v1781_v8 = vld [vmem:[%s8231_s24 + $0xb0] sm:$0xff]  ;;  %v1782_v9 = vld [vmem:[%s8231_s24 + $0xb8] sm:$0xff] }
  0x8b   : > { %v4721_v15 = vpack.c.bf16 %v899_v12, %v897_v11  ;;  %v4745_v12 = vpack.c.bf16 %v1782_v9, %v1781_v8 }
  0x8c   : > { %1069 = vmatmul.mubr.f32.gmra.mrb[28].mxu0 %v6018_v2 }
  0x8d   : > { %1074 = vmatprep.mubr.f32.mxu0 %v6052_v18  ;;  %4696 = vmatpush1.bf16.msra.mxu0 %v4695_v17  ;;  %v898_v17 = vld [vmem:[%s8229_s3 + $0x4b0] sm:$0xff] }
  0x8e   : > { %4698 = vmatprep.subr.bf16.mxu0 %v4697_v19  ;;  %v901_v19 = vld [vmem:[%s8229_s3 + $0x4c8] sm:$0xff]  ;;  %v4723_v22 = vpack.c.bf16 %v898_v17, %v896_v16  ;;  %v6324_v16 = vld [vmem:[%s5675_s2 + $0xf0] sm:$0xff]  ;;  %v1783_v17 = vld [vmem:[%s8231_s24 + $0xc0] sm:$0xff] }
  0x8f   : > { %v4725_v23 = vpack.c.bf16 %v903_v21, %v901_v19  ;;  %v1784_v19 = vld [vmem:[%s8231_s24 + $0xc8] sm:$0xff] }
  0x90   : > { %1075 = vmatmul.mubr.f32.gmra.mrb[30].mxu0 %v6035_v10 }
  0x91   : > { %1080 = vmatprep.mubr.f32.mxu0 %v6069_v26  ;;  %4700 = vmatpush1.bf16.msra.mxu0 %v4699_v25  ;;  %v902_v25 = vld [vmem:[%s8229_s3 + $0x4d0] sm:$0xff] }
  0x92   : > { %4702 = vmatprep.subr.bf16.mxu0 %v4701_v28  ;;  %v905_v28 = vld [vmem:[%s8229_s3 + $0x4e8] sm:$0xff]  ;;  %v4727_v45 = vpack.c.bf16 %v902_v25, %v900_v24 }
  0x93   : > { %v4729_v46 = vpack.c.bf16 %v907_v44, %v905_v28  ;;  %v1768_v24 = vld [vmem:[%s8231_s24 + $0x48] sm:$0xff]  ;;  %v5470_v28 = vmov 0.0   ;;  %v908_v44 = vld [vmem:[%s8233_s23] sm:$0x3]  ;;  %s7000_s23 = scalar_lea.vmem %s8213_s18, %s3902_s5 }
  0x94   : > { %1081 = vmatmul.mubr.f32.gmra.mrb[32].mxu0 %v6052_v18 }
  0x95   : > { %1086 = vmatprep.mubr.f32.mxu0 %v6074_v29 }
  0x98   : > { %1087 = vmatmul.mubr.f32.gmra.mrb[34].mxu0 %v6069_v26 }
  0x99   : > { %1092 = vmatprep.mubr.f32.mxu0 %v6079_v30 }
  0x9c   : > { %1093 = vmatmul.mubr.f32.gmra.mrb[36].mxu0 %v6074_v29 }
  0x9d   : > { %1098 = vmatprep.mubr.f32.mxu0 %v6084_v31 }
  0xa0   : > { %1099 = vmatmul.mubr.f32.gmra.mrb[38].mxu0 %v6079_v30 }
  0xa1   : > { %1104 = vmatprep.mubr.f32.mxu0 %v6089_v32 }
  0xa4   : > { %1105 = vmatmul.mubr.f32.gmra.mrb[40].mxu0 %v6084_v31 }
  0xa5   : > { %1110 = vmatprep.mubr.f32.mxu0 %v6094_v33 }
  0xa8   : > { %1111 = vmatmul.mubr.f32.gmra.mrb[42].mxu0 %v6089_v32 }
  0xa9   : > { %1116 = vmatprep.mubr.f32.mxu0 %v6099_v35 }
  0xac   : > { %1117 = vmatmul.mubr.f32.gmra.mrb[44].mxu0 %v6094_v33 }
  0xad   : > { %1122 = vmatprep.mubr.f32.mxu0 %v6104_v36 }
  0xb0   : > { %1123 = vmatmul.mubr.f32.gmra.mrb[46].mxu0 %v6099_v35 }
  0xb1   : > { %1128 = vmatprep.mubr.f32.mxu0 %v6109_v37 }
  0xb4   : > { %1129 = vmatmul.mubr.f32.gmra.mrb[48].mxu0 %v6104_v36 }
  0xb5   : > { %1134 = vmatprep.mubr.f32.mxu0 %v6114_v38 }
  0xb8   : > { %1135 = vmatmul.mubr.f32.gmra.mrb[50].mxu0 %v6109_v37 }
  0xb9   : > { %1140 = vmatprep.mubr.f32.mxu0 %v6119_v39 }
  0xbc   : > { %1141 = vmatmul.mubr.f32.gmra.mrb[52].mxu0 %v6114_v38 }
  0xbd   : > { %1146 = vmatprep.mubr.f32.mxu0 %v6124_v40 }
  0xc0   : > { %1147 = vmatmul.mubr.f32.gmra.mrb[54].mxu0 %v6119_v39 }
  0xc1   : > { %1217 = vmatprep.mubr.f32.mxu0 %v5831_v50 }
  0xc4   : > { %1218 = vmatmul.mubr.f32.vlgmr.msra.gmra.mrb[0].mxu0 %v5815_v43  ;;  %v891_v43 = vld [vmem:[%s8229_s3 + $0x478] sm:$0xff] }
  0xc5   : > { %4704 = vmatpush1.bf16.msra.mxu0 %v4703_v48  ;;  %1223 = vmatprep.mubr.f32.mxu0 %v5848_v57  ;;  %v4713_v0 = vpack.c.bf16 %v891_v43, %v889_v61  ;;  %v906_v48 = vld [vmem:[%s8229_s3 + $0x4f0] sm:$0xff] }
  0xc6   : > { %4706 = vmatprep.subr.bf16.mxu0 %v4705_v49  ;;  %v4731_v49 = vpack.c.bf16 %v906_v48, %v904_v47  ;;  %v1761_v43 = vld [vmem:[%s8231_s24 + $0x10] sm:$0xff] }
  0xc8   : > { %1224 = vmatmul.mubr.f32.gmra.mrb[2].mxu0 %v5831_v50  ;;  %v895_v50 = vld [vmem:[%s8229_s3 + $0x498] sm:$0xff] }
  0xc9   : > { %1229 = vmatprep.mubr.f32.mxu0 %v5865_v63  ;;  %4708 = vmatpush1.bf16.msra.mxu0 %v4707_v56  ;;  %v4717_v7 = vpack.c.bf16 %v895_v50, %v893_v4  ;;  %v1760_v56 = vld [vmem:[%s8231_s24 + $0x8] sm:$0xff]  ;;  %v1763_v50 = vld [vmem:[%s8231_s24 + $0x20] sm:$0xff] }
  0xca   : > { %4710 = vmatprep.subr.bf16.mxu0 %v4709_v58  ;;  %v1777_v58 = vld [vmem:[%s8231_s24 + $0x90] sm:$0xff]  ;;  %v4735_v41 = vpack.c.bf16 %v1760_v56, %v1759_v54 }
  0xcb   : > { %v4737_v61 = vpack.c.bf16 %v1778_v60, %v1777_v58 }
  0xcc   : > { %1230 = vmatmul.mubr.f32.gmra.mrb[4].mxu0 %v5848_v57  ;;  %4736 = vmatpush3.bf16.msra.mxu1 %v4735_v41 }
  0xcd   : > { %1235 = vmatprep.mubr.f32.mxu0 %v5882_v6  ;;  %4712 = vmatpush1.bf16.msra.mxu0 %v4711_v62  ;;  %v1762_v62 = vld [vmem:[%s8231_s24 + $0x18] sm:$0xff] }
  0xce   : > { %4714 = vmatprep.subr.bf16.mxu0 %v4713_v0  ;;  %v1779_v0 = vld [vmem:[%s8231_s24 + $0xa0] sm:$0xff]  ;;  %v4739_v3 = vpack.c.bf16 %v1762_v62, %v1761_v43  ;;  %4738 = vmatprep.subr.bf16.mxu1 %v4737_v61  ;;  %v1927_v62 = vld [vmem:[%s8232_s0 + $0x8] sm:$0xff] }
  0xcf   : > { %v4741_v4 = vpack.c.bf16 %v1780_v1, %v1779_v0  ;;  %v1926_v43 = vld [vmem:[%s8232_s0] sm:$0xff] }
  0xd0   : > { %1236 = vmatmul.mubr.f32.gmra.mrb[6].mxu0 %v5865_v63  ;;  %4740 = vmatpush3.bf16.msra.mxu1 %v4739_v3  ;;  %v1944_v3 = vld [vmem:[%s8232_s0 + $0x90] sm:$0xff] }
  0xd1   : > { %1241 = vmatprep.mubr.f32.mxu0 %v5899_v13  ;;  %4716 = vmatpush1.bf16.msra.mxu0 %v4715_v5  ;;  %v1764_v5 = vld [vmem:[%s8231_s24 + $0x28] sm:$0xff] }
  0xd2   : > { %4718 = vmatprep.subr.bf16.mxu0 %v4717_v7  ;;  %v6307_v7 = vld [vmem:[%s5675_s2 + $0xe8] sm:$0xff]  ;;  %v4743_v11 = vpack.c.bf16 %v1764_v5, %v1763_v50  ;;  %4742 = vmatprep.subr.bf16.mxu1 %v4741_v4  ;;  %v1945_v4 = vld [vmem:[%s8232_s0 + $0x98] sm:$0xff] }
  0xd4   : > { %1242 = vmatmul.mubr.f32.gmra.mrb[8].mxu0 %v5882_v6  ;;  %4744 = vmatpush3.bf16.msra.mxu1 %v4743_v11  ;;  %v4767_v11 = vpack.c.bf16 %v1927_v62, %v1926_v43 }
  0xd5   : > { %1247 = vmatprep.mubr.f32.mxu0 %v5916_v20  ;;  %4720 = vmatpush1.bf16.msra.mxu0 %v4719_v14  ;;  %v1765_v14 = vld [vmem:[%s8231_s24 + $0x30] sm:$0xff] }
  0xd6   : > { %4722 = vmatprep.subr.bf16.mxu0 %v4721_v15  ;;  %v1766_v15 = vld [vmem:[%s8231_s24 + $0x38] sm:$0xff]  ;;  %4746 = vmatprep.subr.bf16.mxu1 %v4745_v12 }
  0xd7   : > { %v4747_v21 = vpack.c.bf16 %v1766_v15, %v1765_v14  ;;  %v4769_v14 = vpack.c.bf16 %v1945_v4, %v1944_v3  ;;  %v1928_v15 = vld [vmem:[%s8232_s0 + $0x10] sm:$0xff] }
  0xd8   : > { %1248 = vmatmul.mubr.f32.gmra.mrb[10].mxu0 %v5899_v13 }
  0xd9   : > { %1253 = vmatprep.mubr.f32.mxu0 %v5933_v27  ;;  %4724 = vmatpush1.bf16.msra.mxu0 %v4723_v22  ;;  %v4749_v22 = vpack.c.bf16 %v1784_v19, %v1783_v17 }
  0xda   : > { %4726 = vmatprep.subr.bf16.mxu0 %v4725_v23  ;;  %v1767_v23 = vld [vmem:[%s8231_s24 + $0x40] sm:$0xff]  ;;  %4748 = vmatpush3.bf16.msra.mxu1 %v4747_v21 }
  0xdb   : > { %v4751_v25 = vpack.c.bf16 %v1768_v24, %v1767_v23  ;;  %4750 = vmatprep.subr.bf16.mxu1 %v4749_v22  ;;  %v1946_v21 = vld [vmem:[%s8232_s0 + $0xa0] sm:$0xff]  ;;  %v1947_v22 = vld [vmem:[%s8232_s0 + $0xa8] sm:$0xff] }
  0xdc   : > { %1254 = vmatmul.mubr.f32.gmra.mrb[12].mxu0 %v5916_v20 }
  0xdd   : > { %1259 = vmatprep.mubr.f32.mxu0 %v5950_v34  ;;  %4728 = vmatpush1.bf16.msra.mxu0 %v4727_v45 }
  0xde   : > { %4730 = vmatprep.subr.bf16.mxu0 %v4729_v46  ;;  %4752 = vmatpush3.bf16.msra.mxu1 %v4751_v25 }
  0xe0   : > { %1260 = vmatmul.mubr.f32.gmra.mrb[14].mxu0 %v5933_v27 }
  0xe1   : > { %1265 = vmatprep.mubr.f32.mxu0 %v5967_v42  ;;  %4732 = vmatpush1.bf16.msra.mxu0 %v4731_v49 }
  0xe4   : > { %1266 = vmatmul.mubr.f32.gmra.mrb[16].mxu0 %v5950_v34 }
  0xe5   : > { %1271 = vmatprep.mubr.f32.mxu0 %v5984_v51 }
  0xe8   : > { %1272 = vmatmul.mubr.f32.gmra.mrb[18].mxu0 %v5967_v42 }
  0xe9   : > { %1277 = vmatprep.mubr.f32.mxu0 %v6001_v59 }
  0xec   : > { %1278 = vmatmul.mubr.f32.gmra.mrb[20].mxu0 %v5984_v51 }
  0xed   : > { %1283 = vmatprep.mubr.f32.mxu0 %v6018_v2 }
  0xf0   : > { %1284 = vmatmul.mubr.f32.gmra.mrb[22].mxu0 %v6001_v59 }
  0xf1   : > { %1289 = vmatprep.mubr.f32.mxu0 %v6035_v10 }
  0xf4   : > { %1290 = vmatmul.mubr.f32.gmra.mrb[24].mxu0 %v6018_v2 }
  0xf5   : > { %1295 = vmatprep.mubr.f32.mxu0 %v6052_v18 }
  0xf8   : > { %1296 = vmatmul.mubr.f32.gmra.mrb[26].mxu0 %v6035_v10 }
  0xf9   : > { %1301 = vmatprep.mubr.f32.mxu0 %v6069_v26 }
  0xfc   : > { %1302 = vmatmul.mubr.f32.gmra.mrb[28].mxu0 %v6052_v18 }
  0xfd   : > { %1307 = vmatprep.mubr.f32.mxu0 %v6074_v29 }
 0x100   : > { %1308 = vmatmul.mubr.f32.gmra.mrb[30].mxu0 %v6069_v26 }
 0x101   : > { %1313 = vmatprep.mubr.f32.mxu0 %v6079_v30 }
 0x104   : > { %1314 = vmatmul.mubr.f32.gmra.mrb[32].mxu0 %v6074_v29 }
 0x105   : > { %1319 = vmatprep.mubr.f32.mxu0 %v6084_v31 }
 0x108   : > { %1320 = vmatmul.mubr.f32.gmra.mrb[34].mxu0 %v6079_v30 }
 0x109   : > { %1325 = vmatprep.mubr.f32.mxu0 %v6089_v32 }
 0x10c   : > { %1326 = vmatmul.mubr.f32.gmra.mrb[36].mxu0 %v6084_v31 }
 0x10d   : > { %1331 = vmatprep.mubr.f32.mxu0 %v6094_v33 }
 0x110   : > { %1332 = vmatmul.mubr.f32.gmra.mrb[38].mxu0 %v6089_v32 }
 0x111   : > { %1337 = vmatprep.mubr.f32.mxu0 %v6099_v35 }
 0x114   : > { %1338 = vmatmul.mubr.f32.gmra.mrb[40].mxu0 %v6094_v33 }
 0x115   : > { %1343 = vmatprep.mubr.f32.mxu0 %v6104_v36 }
 0x118   : > { %1344 = vmatmul.mubr.f32.gmra.mrb[42].mxu0 %v6099_v35 }
 0x119   : > { %1349 = vmatprep.mubr.f32.mxu0 %v6109_v37 }
 0x11c   : > { %1350 = vmatmul.mubr.f32.gmra.mrb[44].mxu0 %v6104_v36 }
 0x11d   : > { %1355 = vmatprep.mubr.f32.mxu0 %v6114_v38 }
 0x120   : > { %1356 = vmatmul.mubr.f32.gmra.mrb[46].mxu0 %v6109_v37 }
 0x121   : > { %1361 = vmatprep.mubr.f32.mxu0 %v6119_v39 }
 0x124   : > { %1362 = vmatmul.mubr.f32.gmra.mrb[48].mxu0 %v6114_v38 }
 0x125   : > { %1367 = vmatprep.mubr.f32.mxu0 %v6124_v40 }
 0x128   : > { %1368 = vmatmul.mubr.f32.gmra.mrb[50].mxu0 %v6119_v39 }
 0x129   : > { %1373 = vmatprep.mubr.f32.mxu0 %v6307_v7 }
 0x12c   : > { %1374 = vmatmul.mubr.f32.gmra.mrb[52].mxu0 %v6124_v40 }
 0x12d   : > { %1379 = vmatprep.mubr.f32.mxu0 %v6324_v16 }
 0x130   : > { %1380 = vmatmul.mubr.f32.gmra.mrb[54].mxu0 %v6307_v7 }
 0x131   : > { %1450 = vmatprep.mubr.f32.mxu0 %v5470_v28 }
 0x134   : > { %1451 = vmatmul.mubr.f32.vlgmr.msra.gmra.mrb[0].mxu0 %v5848_v57  ;;  %v1785_v57 = vld [vmem:[%s8231_s24 + $0xd0] sm:$0xff] }
 0x135   : > { %1456 = vmatprep.mubr.f32.mxu0 %v5470_v28 }
 0x138   : > { %1457 = vmatmul.mubr.f32.gmra.mrb[2].mxu0 %v5865_v63  ;;  %v1786_v63 = vld [vmem:[%s8231_s24 + $0xd8] sm:$0xff] }
 0x139   : > { %1462 = vmatprep.mubr.f32.mxu0 %v5470_v28 }
 0x13c   : > { %1463 = vmatmul.mubr.f32.gmra.mrb[4].mxu0 %v5882_v6  ;;  %v4753_v6 = vpack.c.bf16 %v1786_v63, %v1785_v57 }
 0x13d   : > { %1468 = vmatprep.mubr.f32.mxu0 %v5470_v28 }
 0x13e   : > { %4754 = vmatprep.subr.bf16.mxu1 %v4753_v6  ;;  %v4773_v6 = vpack.c.bf16 %v1947_v22, %v1946_v21 }
 0x140   : > { %1469 = vmatmul.mubr.f32.gmra.mrb[6].mxu0 %v5899_v13  ;;  %v1769_v13 = vld [vmem:[%s8231_s24 + $0x50] sm:$0xff] }
 0x141   : > { %1474 = vmatprep.mubr.f32.mxu0 %v5470_v28 }
 0x144   : > { %1475 = vmatmul.mubr.f32.gmra.mrb[8].mxu0 %v5916_v20  ;;  %v1770_v20 = vld [vmem:[%s8231_s24 + $0x58] sm:$0xff] }
 0x145   : > { %1480 = vmatprep.mubr.f32.mxu0 %v5470_v28 }
 0x148   : > { %1481 = vmatmul.mubr.f32.gmra.mrb[10].mxu0 %v5933_v27  ;;  %v4755_v27 = vpack.c.bf16 %v1770_v20, %v1769_v13  ;;  %v1930_v13 = vld [vmem:[%s8232_s0 + $0x20] sm:$0xff]  ;;  %v1931_v20 = vld [vmem:[%s8232_s0 + $0x28] sm:$0xff] }
 0x149   : > { %1486 = vmatprep.mubr.f32.mxu0 %v5470_v28 }
 0x14a   : > { %4756 = vmatpush3.bf16.msra.mxu1 %v4755_v27 }
 0x14c   : > { %1487 = vmatmul.mubr.f32.gmra.mrb[12].mxu0 %v5950_v34  ;;  %v1787_v34 = vld [vmem:[%s8231_s24 + $0xe0] sm:$0xff] }
 0x14d   : > { %1492 = vmatprep.mubr.f32.mxu0 %v5470_v28 }
 0x150   : > { %1493 = vmatmul.mubr.f32.gmra.mrb[14].mxu0 %v5967_v42  ;;  %v1788_v42 = vld [vmem:[%s8231_s24 + $0xe8] sm:$0xff] }
 0x151   : > { %1498 = vmatprep.mubr.f32.mxu0 %v5470_v28 }
 0x154   : > { %1499 = vmatmul.mubr.f32.gmra.mrb[16].mxu0 %v5984_v51  ;;  %v4757_v51 = vpack.c.bf16 %v1788_v42, %v1787_v34  ;;  %v1948_v42 = vld [vmem:[%s8232_s0 + $0xb0] sm:$0xff] }
 0x155   : > { %1504 = vmatprep.mubr.f32.mxu0 %v5470_v28 }
 0x156   : > { %4758 = vmatprep.subr.bf16.mxu1 %v4757_v51  ;;  %v1949_v51 = vld [vmem:[%s8232_s0 + $0xb8] sm:$0xff] }
 0x158   : > { %1505 = vmatmul.mubr.f32.gmra.mrb[18].mxu0 %v6001_v59  ;;  %v1771_v59 = vld [vmem:[%s8231_s24 + $0x60] sm:$0xff] }
 0x159   : > { %1510 = vmatprep.mubr.f32.mxu0 %v5470_v28 }
 0x15c   : > { %1511 = vmatmul.mubr.f32.gmra.mrb[20].mxu0 %v6018_v2  ;;  %v1772_v2 = vld [vmem:[%s8231_s24 + $0x68] sm:$0xff] }
 0x15d   : > { %1516 = vmatprep.mubr.f32.mxu0 %v5470_v28 }
 0x160   : > { %1517 = vmatmul.mubr.f32.gmra.mrb[22].mxu0 %v6035_v10  ;;  %v4759_v10 = vpack.c.bf16 %v1772_v2, %v1771_v59 }
 0x161   : > { %1522 = vmatprep.mubr.f32.mxu0 %v5470_v28 }
 0x162   : > { %4760 = vmatpush3.bf16.msra.mxu1 %v4759_v10 }
 0x164   : > { %1523 = vmatmul.mubr.f32.gmra.mrb[24].mxu0 %v6052_v18  ;;  %v1789_v18 = vld [vmem:[%s8231_s24 + $0xf0] sm:$0xff] }
 0x165   : > { %1528 = vmatprep.mubr.f32.mxu0 %v5470_v28 }
 0x168   : > { %1529 = vmatmul.mubr.f32.gmra.mrb[26].mxu0 %v6069_v26  ;;  %v1790_v26 = vld [vmem:[%s8231_s24 + $0xf8] sm:$0xff] }
 0x169   : > { %1534 = vmatprep.mubr.f32.mxu0 %v5470_v28 }
 0x16c   : > { %1535 = vmatmul.mubr.f32.gmra.mrb[28].mxu0 %v6074_v29  ;;  %v4761_v29 = vpack.c.bf16 %v1790_v26, %v1789_v18 }
 0x16d   : > { %1540 = vmatprep.mubr.f32.mxu0 %v5470_v28 }
 0x16e   : > { %4762 = vmatprep.subr.bf16.mxu1 %v4761_v29  ;;  %v4775_v29 = vpack.c.bf16 %v1931_v20, %v1930_v13  ;;  %v1956_v13 = vld [vmem:[%s8232_s0 + $0xf0] sm:$0xff]  ;;  %v1957_v20 = vld [vmem:[%s8232_s0 + $0xf8] sm:$0xff] }
 0x170   : > { %1541 = vmatmul.mubr.f32.gmra.mrb[30].mxu0 %v6079_v30  ;;  %v1773_v30 = vld [vmem:[%s8231_s24 + $0x70] sm:$0xff] }
 0x171   : > { %1546 = vmatprep.mubr.f32.mxu0 %v5470_v28 }
 0x174   : > { %1547 = vmatmul.mubr.f32.gmra.mrb[32].mxu0 %v6084_v31  ;;  %v1774_v31 = vld [vmem:[%s8231_s24 + $0x78] sm:$0xff] }
 0x175   : > { %1552 = vmatprep.mubr.f32.mxu0 %v5470_v28 }
 0x178   : > { %1553 = vmatmul.mubr.f32.gmra.mrb[34].mxu0 %v6089_v32  ;;  %v4763_v32 = vpack.c.bf16 %v1774_v31, %v1773_v30  ;;  %v4777_v31 = vpack.c.bf16 %v1949_v51, %v1948_v42 }
 0x179   : > { %1558 = vmatprep.mubr.f32.mxu0 %v5470_v28 }
 0x17a   : > { %4764 = vmatpush3.bf16.msra.mxu1 %v4763_v32  ;;  %v1932_v32 = vld [vmem:[%s8232_s0 + $0x30] sm:$0xff] }
 0x17c   : > { %1559 = vmatmul.mubr.f32.gmra.mrb[36].mxu0 %v6094_v33  ;;  %v747_v33 = vld [vmem:[%s5675_s2 + $0xf8] sm:$0xff] }
 0x17d   : > { %1564 = vmatprep.mubr.f32.mxu0 %v5470_v28 }
 0x180   : > { %1565 = vmatmul.mubr.f32.gmra.mrb[38].mxu0 %v6099_v35  ;;  %v1942_v35 = vld [vmem:[%s8232_s0 + $0x80] sm:$0xff] }
 0x181   : > { %1570 = vmatprep.mubr.f32.mxu0 %v5470_v28 }
 0x184   : > { %1571 = vmatmul.mubr.f32.gmra.mrb[40].mxu0 %v6104_v36  ;;  %v1943_v36 = vld [vmem:[%s8232_s0 + $0x88] sm:$0xff] }
 0x185   : > { %1576 = vmatprep.mubr.f32.mxu0 %v5470_v28 }
 0x188   : > { %1577 = vmatmul.mubr.f32.gmra.mrb[42].mxu0 %v6109_v37  ;;  %v4765_v37 = vpack.c.bf16 %v1943_v36, %v1942_v35 }
 0x189   : > { %1582 = vmatprep.mubr.f32.mxu0 %v5470_v28 }
 0x18a   : > { %4766 = vmatprep.subr.bf16.mxu1 %v4765_v37  ;;  %v1950_v37 = vld [vmem:[%s8232_s0 + $0xc0] sm:$0xff] }
 0x18c   : > { %1583 = vmatmul.mubr.f32.gmra.mrb[44].mxu0 %v6114_v38  ;;  %v910_v38 = vlaneseq }
 0x18d   : > { %1588 = vmatprep.mubr.f32.mxu0 %v5470_v28 }
 0x190   : > { %1589 = vmatmul.mubr.f32.gmra.mrb[46].mxu0 %v6119_v39  ;;  %v6440_v39 = vshrl.u32 %v910_v38, 7  ;;  %v1951_v38 = vld [vmem:[%s8232_s0 + $0xc8] sm:$0xff] }
 0x191   : > { %1594 = vmatprep.mubr.f32.mxu0 %v5470_v28 }
 0x192   : > { %v916_v45 = vsub.s32 1, %v6440_v39 }
 0x194   : > { %1595 = vmatmul.mubr.f32.gmra.mrb[48].mxu0 %v6124_v40  ;;  %v912_v40 = vsub.s32 0, %v6440_v39  ;;  %v6453_v47 = vrot.slane %v908_v44, %v916_v45 }
 0x195   : > { %1600 = vmatprep.mubr.f32.mxu0 %v5470_v28 }
 0x196   : > { %v6449_v46 = vrot.slane %v908_v44, %v912_v40 }
 0x198   : > { %1601 = vmatmul.mubr.f32.gmra.mrb[50].mxu0 %v6307_v7 }
 0x199   : > { %1606 = vmatprep.mubr.f32.mxu0 %v5470_v28 }
 0x19c   : > { %1607 = vmatmul.mubr.f32.gmra.mrb[52].mxu0 %v6324_v16  ;;  %v1929_v16 = vld [vmem:[%s8232_s0 + $0x18] sm:$0xff] }
 0x19d   : > { %1612 = vmatprep.mubr.f32.mxu0 %v5470_v28  ;;  %v4771_v57 = vpack.c.bf16 %v1929_v16, %v1928_v15  ;;  %v1954_v15 = vld [vmem:[%s8232_s0 + $0xe0] sm:$0xff]  ;;  %v1955_v16 = vld [vmem:[%s8232_s0 + $0xe8] sm:$0xff] }
 0x1a0   : > { %1613 = vmatmul.mubr.f32.gmra.mrb[54].mxu0 %v747_v33  ;;  %v1933_v33 = vld [vmem:[%s8232_s0 + $0x38] sm:$0xff] }
 0x1a1   : > { %4500 = vmatprep.mubr.msk.f32.mxu0 %vm5472_vm0, %v5470_v28 }
 0x207   : > { %v1452_v48 = vpop.f32.mrb[0].mxu0 }
 0x208   : > { %v5213_v49 = vadd.f32 %v1452_v48, %v6449_v46  ;;  %v1454_v52 = vpop.f32.mrb[1].mxu0 }
 0x209   : > { %v5214_v53 = vadd.f32 %v1454_v52, %v6453_v47  ;;  %v4779_v52 = vpack.c.bf16 %v1933_v33, %v1932_v32 }
 0x20a   : > { %v1619_v54 = vmax.f32 %v5213_v49, 0.0 }
 0x20b   : > { %v1620_v55 = vmax.f32 %v5214_v53, 0.0  ;;  %v1458_v56 = vpop.f32.mrb[2].mxu0 }
 0x20c   : > { %1675 = vst [vmem:[%s6459_s28] sm:$0xff] %v1619_v54  ;;  %v5215_v58 = vadd.f32 %v1458_v56, %v6449_v46  ;;  %v1460_v60 = vpop.f32.mrb[3].mxu0  ;;  %v1935_v56 = vld [vmem:[%s8232_s0 + $0x48] sm:$0xff] }
 0x20d   : > { %1676 = vst [vmem:[%s6459_s28 + $0x8] sm:$0xff] %v1620_v55  ;;  %v5216_v41 = vadd.f32 %v1460_v60, %v6453_v47 }
 0x20e   : > { %v1621_v61 = vmax.f32 %v5215_v58, 0.0 }
 0x20f   : > { %v1622_v0 = vmax.f32 %v5216_v41, 0.0  ;;  %v1464_v1 = vpop.f32.mrb[4].mxu0  ;;  %v1952_v41 = vld [vmem:[%s8232_s0 + $0xd0] sm:$0xff] }
 0x210   : > { %1677 = vst [vmem:[%s6459_s28 + $0x10] sm:$0xff] %v1621_v61  ;;  %v6479_v50 = vmax.f32 %v1619_v54, %v1621_v61  ;;  %v5217_v5 = vadd.f32 %v1464_v1, %v6449_v46  ;;  %v1466_v7 = vpop.f32.mrb[5].mxu0  ;;  %v4781_v54 = vpack.c.bf16 %v1951_v38, %v1950_v37  ;;  %v1953_v61 = vld [vmem:[%s8232_s0 + $0xd8] sm:$0xff] }
 0x211   : > { %1678 = vst [vmem:[%s6459_s28 + $0x18] sm:$0xff] %v1622_v0  ;;  %v5218_v8 = vadd.f32 %v1466_v7, %v6453_v47  ;;  %v6484_v9 = vmax.f32 %v1620_v55, %v1622_v0  ;;  %v1934_v55 = vld [vmem:[%s8232_s0 + $0x40] sm:$0xff]  ;;  %v4785_v7 = vpack.c.bf16 %v1953_v61, %v1952_v41 }
 0x212   : > { %v1623_v12 = vmax.f32 %v5217_v5, 0.0  ;;  %v4783_v4 = vpack.c.bf16 %v1935_v56, %v1934_v55 }
 0x213   : > { %v1624_v17 = vmax.f32 %v5218_v8, 0.0  ;;  %v1470_v19 = vpop.f32.mrb[6].mxu0  ;;  %1855 = vmatprep.mubr.f32.mxu1 %v6484_v9  ;;  %v1936_v8 = vld [vmem:[%s8232_s0 + $0x50] sm:$0xff] }
 0x214   : > { %1679 = vst [vmem:[%s6459_s28 + $0x20] sm:$0xff] %v1623_v12  ;;  %v5219_v23 = vadd.f32 %v1470_v19, %v6449_v46  ;;  %v1472_v24 = vpop.f32.mrb[7].mxu0  ;;  %1856 = vmatmul.mubr.f32.vlgmr.msra.gmra.mrb[0].mxu1 %v6479_v50 }
 0x215   : > { %1680 = vst [vmem:[%s6459_s28 + $0x28] sm:$0xff] %v1624_v17  ;;  %v5220_v25 = vadd.f32 %v1472_v24, %v6453_v47  ;;  %4768 = vmatpush3.bf16.msra.mxu1 %v4767_v11  ;;  %v1937_v11 = vld [vmem:[%s8232_s0 + $0x58] sm:$0xff]  ;;  %v4789_v24 = vpack.c.bf16 %v1955_v16, %v1954_v15 }
 0x216   : > { %v1625_v63 = vmax.f32 %v5219_v23, 0.0  ;;  %4770 = vmatprep.subr.bf16.mxu1 %v4769_v14  ;;  %v4787_v22 = vpack.c.bf16 %v1937_v11, %v1936_v8 }
 0x217   : > { %v1626_v27 = vmax.f32 %v5220_v25, 0.0  ;;  %v1476_v34 = vpop.f32.mrb[8].mxu0  ;;  %v1938_v25 = vld [vmem:[%s8232_s0 + $0x60] sm:$0xff] }
 0x218   : > { %1681 = vst [vmem:[%s6459_s28 + $0x30] sm:$0xff] %v1625_v63  ;;  %v6517_v59 = vmax.f32 %v1623_v12, %v1625_v63  ;;  %v5221_v2 = vadd.f32 %v1476_v34, %v6449_v46  ;;  %v1478_v10 = vpop.f32.mrb[9].mxu0 }
 0x219   : > { %1682 = vst [vmem:[%s6459_s28 + $0x38] sm:$0xff] %v1626_v27  ;;  %v6521_v18 = vmax.f32 %v1624_v17, %v1626_v27  ;;  %v5222_v26 = vadd.f32 %v1478_v10, %v6453_v47  ;;  %4772 = vmatpush3.bf16.msra.mxu1 %v4771_v57  ;;  %v1939_v57 = vld [vmem:[%s8232_s0 + $0x68] sm:$0xff] }
 0x21a   : > { %v1627_v30 = vmax.f32 %v5221_v2, 0.0  ;;  %4774 = vmatprep.subr.bf16.mxu1 %v4773_v6  ;;  %v4791_v10 = vpack.c.bf16 %v1939_v57, %v1938_v25 }
 0x21b   : > { %v1628_v35 = vmax.f32 %v5222_v26, 0.0  ;;  %v1482_v36 = vpop.f32.mrb[10].mxu0  ;;  %1860 = vmatprep.mubr.f32.mxu1 %v6521_v18 }
 0x21c   : > { %1683 = vst [vmem:[%s6459_s28 + $0x40] sm:$0xff] %v1627_v30  ;;  %v5223_v44 = vadd.f32 %v1482_v36, %v6449_v46  ;;  %v1484_v48 = vpop.f32.mrb[11].mxu0  ;;  %1861 = vmatmul.mubr.f32.gmra.mrb[2].mxu1 %v6517_v59 }
 0x21d   : > { %1684 = vst [vmem:[%s6459_s28 + $0x48] sm:$0xff] %v1628_v35  ;;  %v5224_v49 = vadd.f32 %v1484_v48, %v6453_v47  ;;  %4776 = vmatpush3.bf16.msra.mxu1 %v4775_v29  ;;  %v4793_v29 = vpack.c.bf16 %v1957_v20, %v1956_v13 }
 0x21e   : > { %v1629_v53 = vmax.f32 %v5223_v44, 0.0  ;;  %4778 = vmatprep.subr.bf16.mxu1 %v4777_v31  ;;  %v1941_v31 = vld [vmem:[%s8232_s0 + $0x78] sm:$0xff] }
 0x21f   : > { %v1630_v58 = vmax.f32 %v5224_v49, 0.0  ;;  %v1488_v60 = vpop.f32.mrb[12].mxu0 }
 0x220   : > { %1685 = vst [vmem:[%s6459_s28 + $0x50] sm:$0xff] %v1629_v53  ;;  %v6555_v43 = vmax.f32 %v1627_v30, %v1629_v53  ;;  %v5225_v62 = vadd.f32 %v1488_v60, %v6449_v46  ;;  %v1490_v0 = vpop.f32.mrb[13].mxu0  ;;  %v1940_v30 = vld [vmem:[%s8232_s0 + $0x70] sm:$0xff] }
 0x221   : > { %1686 = vst [vmem:[%s6459_s28 + $0x58] sm:$0xff] %v1630_v58  ;;  %v6559_v1 = vmax.f32 %v1628_v35, %v1630_v58  ;;  %v5226_v3 = vadd.f32 %v1490_v0, %v6453_v47  ;;  %4780 = vmatpush3.bf16.msra.mxu1 %v4779_v52  ;;  %v4795_v38 = vpack.c.bf16 %v1941_v31, %v1940_v30 }
 0x222   : > { %v1631_v5 = vmax.f32 %v5225_v62, 0.0  ;;  %4782 = vmatprep.subr.bf16.mxu1 %v4781_v54 }
 0x223   : > { %v1632_v12 = vmax.f32 %v5226_v3, 0.0  ;;  %v1494_v14 = vpop.f32.mrb[14].mxu0  ;;  %1865 = vmatprep.mubr.f32.mxu1 %v6559_v1 }
 0x224   : > { %1687 = vst [vmem:[%s6459_s28 + $0x60] sm:$0xff] %v1631_v5  ;;  %v5227_v17 = vadd.f32 %v1494_v14, %v6449_v46  ;;  %v1496_v19 = vpop.f32.mrb[15].mxu0  ;;  %1866 = vmatmul.mubr.f32.gmra.mrb[4].mxu1 %v6555_v43 }
 0x225   : > { %1688 = vst [vmem:[%s6459_s28 + $0x68] sm:$0xff] %v1632_v12  ;;  %v5228_v21 = vadd.f32 %v1496_v19, %v6453_v47  ;;  %4784 = vmatpush3.bf16.msra.mxu1 %v4783_v4 }
 0x226   : > { %v1633_v23 = vmax.f32 %v5227_v17, 0.0  ;;  %4786 = vmatprep.subr.bf16.mxu1 %v4785_v7 }
 0x227   : > { %v1634_v63 = vmax.f32 %v5228_v21, 0.0  ;;  %v1500_v6 = vpop.f32.mrb[16].mxu0 }
 0x228   : > { %1689 = vst [vmem:[%s6459_s28 + $0x70] sm:$0xff] %v1633_v23  ;;  %v6593_v27 = vmax.f32 %v1631_v5, %v1633_v23  ;;  %v5229_v34 = vadd.f32 %v1500_v6, %v6449_v46  ;;  %v1502_v42 = vpop.f32.mrb[17].mxu0 }
 0x229   : > { %1690 = vst [vmem:[%s6459_s28 + $0x78] sm:$0xff] %v1634_v63  ;;  %v6597_v51 = vmax.f32 %v1632_v12, %v1634_v63  ;;  %v5230_v2 = vadd.f32 %v1502_v42, %v6453_v47  ;;  %4788 = vmatpush3.bf16.msra.mxu1 %v4787_v22 }
 0x22a   : > { %v1635_v26 = vmax.f32 %v5229_v34, 0.0  ;;  %4790 = vmatprep.subr.bf16.mxu1 %v4789_v24 }
 0x22b   : > { %v1636_v32 = vmax.f32 %v5230_v2, 0.0  ;;  %v1506_v33 = vpop.f32.mrb[18].mxu0  ;;  %1870 = vmatprep.mubr.f32.mxu1 %v6597_v51 }
 0x22c   : > { %1691 = vst [vmem:[%s6459_s28 + $0x80] sm:$0xff] %v1635_v26  ;;  %v5231_v35 = vadd.f32 %v1506_v33, %v6449_v46  ;;  %v1508_v36 = vpop.f32.mrb[19].mxu0  ;;  %1871 = vmatmul.mubr.f32.gmra.mrb[6].mxu1 %v6593_v27 }
 0x22d   : > { %1692 = vst [vmem:[%s6459_s28 + $0x88] sm:$0xff] %v1636_v32  ;;  %v5232_v37 = vadd.f32 %v1508_v36, %v6453_v47  ;;  %4792 = vmatpush3.bf16.msra.mxu1 %v4791_v10 }
 0x22e   : > { %v1637_v44 = vmax.f32 %v5231_v35, 0.0  ;;  %4794 = vmatprep.subr.bf16.mxu1 %v4793_v29 }
 0x22f   : > { %v1638_v48 = vmax.f32 %v5232_v37, 0.0  ;;  %v1512_v49 = vpop.f32.mrb[20].mxu0 }
 0x230   : > { %1693 = vst [vmem:[%s6459_s28 + $0x90] sm:$0xff] %v1637_v44  ;;  %v6613_v52 = vmax.f32 %v1635_v26, %v1637_v44  ;;  %v5233_v53 = vadd.f32 %v1512_v49, %v6449_v46  ;;  %v1514_v54 = vpop.f32.mrb[21].mxu0 }
 0x231   : > { %1694 = vst [vmem:[%s6459_s28 + $0x98] sm:$0xff] %v1638_v48  ;;  %v6617_v55 = vmax.f32 %v1636_v32, %v1638_v48  ;;  %v5234_v56 = vadd.f32 %v1514_v54, %v6453_v47  ;;  %4796 = vmatpush3.bf16.msra.mxu1 %v4795_v38 }
 0x232   : > { %v1639_v58 = vmax.f32 %v5233_v53, 0.0 }
 0x233   : > { %v1640_v60 = vmax.f32 %v5234_v56, 0.0  ;;  %v1518_v41 = vpop.f32.mrb[22].mxu0  ;;  %1875 = vmatprep.mubr.f32.mxu1 %v6617_v55 }
 0x234   : > { %1695 = vst [vmem:[%s6459_s28 + $0xa0] sm:$0xff] %v1639_v58  ;;  %v5235_v61 = vadd.f32 %v1518_v41, %v6449_v46  ;;  %v1520_v62 = vpop.f32.mrb[23].mxu0  ;;  %1876 = vmatmul.mubr.f32.gmra.mrb[8].mxu1 %v6613_v52 }
 0x235   : > { %1696 = vst [vmem:[%s6459_s28 + $0xa8] sm:$0xff] %v1640_v60  ;;  %v5236_v0 = vadd.f32 %v1520_v62, %v6453_v47 }
 0x236   : > { %v1641_v3 = vmax.f32 %v5235_v61, 0.0 }
 0x237   : > { %v1642_v4 = vmax.f32 %v5236_v0, 0.0  ;;  %v1524_v5 = vpop.f32.mrb[24].mxu0 }
 0x238   : > { %1697 = vst [vmem:[%s6459_s28 + $0xb0] sm:$0xff] %v1641_v3  ;;  %v6627_v7 = vmax.f32 %v1639_v58, %v1641_v3  ;;  %v5237_v8 = vadd.f32 %v1524_v5, %v6449_v46  ;;  %v1526_v11 = vpop.f32.mrb[25].mxu0 }
 0x239   : > { %1698 = vst [vmem:[%s6459_s28 + $0xb8] sm:$0xff] %v1642_v4  ;;  %v6631_v12 = vmax.f32 %v1640_v60, %v1642_v4  ;;  %v5238_v14 = vadd.f32 %v1526_v11, %v6453_v47 }
 0x23a   : > { %v1643_v15 = vmax.f32 %v5237_v8, 0.0 }
 0x23b   : > { %v1644_v16 = vmax.f32 %v5238_v14, 0.0  ;;  %v1530_v17 = vpop.f32.mrb[26].mxu0  ;;  %1880 = vmatprep.mubr.f32.mxu1 %v6631_v12 }
 0x23c   : > { %1699 = vst [vmem:[%s6459_s28 + $0xc0] sm:$0xff] %v1643_v15  ;;  %v5239_v19 = vadd.f32 %v1530_v17, %v6449_v46  ;;  %v1532_v21 = vpop.f32.mrb[27].mxu0  ;;  %1881 = vmatmul.mubr.f32.gmra.mrb[10].mxu1 %v6627_v7 }
 0x23d   : > { %1700 = vst [vmem:[%s6459_s28 + $0xc8] sm:$0xff] %v1644_v16  ;;  %v5240_v22 = vadd.f32 %v1532_v21, %v6453_v47 }
 0x23e   : > { %v1645_v23 = vmax.f32 %v5239_v19, 0.0 }
 0x23f   : > { %v1646_v24 = vmax.f32 %v5240_v22, 0.0  ;;  %v1536_v25 = vpop.f32.mrb[28].mxu0 }
 0x240   : > { %1701 = vst [vmem:[%s6459_s28 + $0xd0] sm:$0xff] %v1645_v23  ;;  %v6641_v57 = vmax.f32 %v1643_v15, %v1645_v23  ;;  %v5241_v63 = vadd.f32 %v1536_v25, %v6449_v46  ;;  %v1538_v6 = vpop.f32.mrb[29].mxu0 }
 0x241   : > { %1702 = vst [vmem:[%s6459_s28 + $0xd8] sm:$0xff] %v1646_v24  ;;  %v6645_v13 = vmax.f32 %v1644_v16, %v1646_v24  ;;  %v5242_v20 = vadd.f32 %v1538_v6, %v6453_v47 }
 0x242   : > { %v1647_v34 = vmax.f32 %v5241_v63, 0.0 }
 0x243   : > { %v1648_v42 = vmax.f32 %v5242_v20, 0.0  ;;  %v1542_v2 = vpop.f32.mrb[30].mxu0  ;;  %1885 = vmatprep.mubr.f32.mxu1 %v6645_v13 }
 0x244   : > { %1703 = vst [vmem:[%s6459_s28 + $0xe0] sm:$0xff] %v1647_v34  ;;  %v5243_v10 = vadd.f32 %v1542_v2, %v6449_v46  ;;  %v1544_v26 = vpop.f32.mrb[31].mxu0  ;;  %1886 = vmatmul.mubr.f32.gmra.mrb[12].mxu1 %v6641_v57 }
 0x245   : > { %1704 = vst [vmem:[%s6459_s28 + $0xe8] sm:$0xff] %v1648_v42  ;;  %v5244_v29 = vadd.f32 %v1544_v26, %v6453_v47 }
 0x246   : > { %v1649_v30 = vmax.f32 %v5243_v10, 0.0 }
 0x247   : > { %v1650_v31 = vmax.f32 %v5244_v29, 0.0  ;;  %v1548_v32 = vpop.f32.mrb[32].mxu0 }
 0x248   : > { %1705 = vst [vmem:[%s6459_s28 + $0xf0] sm:$0xff] %v1649_v30  ;;  %v6655_v33 = vmax.f32 %v1647_v34, %v1649_v30  ;;  %v5245_v35 = vadd.f32 %v1548_v32, %v6449_v46  ;;  %v1550_v36 = vpop.f32.mrb[33].mxu0 }
 0x249   : > { %1706 = vst [vmem:[%s6459_s28 + $0xf8] sm:$0xff] %v1650_v31  ;;  %v6659_v37 = vmax.f32 %v1648_v42, %v1650_v31  ;;  %v5246_v38 = vadd.f32 %v1550_v36, %v6453_v47 }
 0x24a   : > { %v1651_v44 = vmax.f32 %v5245_v35, 0.0 }
 0x24b   : > { %v1652_v48 = vmax.f32 %v5246_v38, 0.0  ;;  %v1554_v49 = vpop.f32.mrb[34].mxu0  ;;  %1890 = vmatprep.mubr.f32.mxu1 %v6659_v37 }
 0x24c   : > { %1707 = vst [vmem:[%s6459_s28 + $0x100] sm:$0xff] %v1651_v44  ;;  %v5247_v53 = vadd.f32 %v1554_v49, %v6449_v46  ;;  %v1556_v54 = vpop.f32.mrb[35].mxu0  ;;  %1891 = vmatmul.mubr.f32.gmra.mrb[14].mxu1 %v6655_v33 }
 0x24d   : > { %1708 = vst [vmem:[%s6459_s28 + $0x108] sm:$0xff] %v1652_v48  ;;  %v5248_v56 = vadd.f32 %v1556_v54, %v6453_v47 }
 0x24e   : > { %v1653_v58 = vmax.f32 %v5247_v53, 0.0 }
 0x24f   : > { %v1654_v60 = vmax.f32 %v5248_v56, 0.0  ;;  %v1560_v41 = vpop.f32.mrb[36].mxu0 }
 0x250   : > { %1709 = vst [vmem:[%s6459_s28 + $0x110] sm:$0xff] %v1653_v58  ;;  %v6669_v61 = vmax.f32 %v1651_v44, %v1653_v58  ;;  %v5249_v62 = vadd.f32 %v1560_v41, %v6449_v46  ;;  %v1562_v0 = vpop.f32.mrb[37].mxu0 }
 0x251   : > { %1710 = vst [vmem:[%s6459_s28 + $0x118] sm:$0xff] %v1654_v60  ;;  %v6673_v3 = vmax.f32 %v1652_v48, %v1654_v60  ;;  %v5250_v4 = vadd.f32 %v1562_v0, %v6453_v47 }
 0x252   : > { %v1655_v5 = vmax.f32 %v5249_v62, 0.0 }
 0x253   : > { %v1656_v8 = vmax.f32 %v5250_v4, 0.0  ;;  %v1566_v11 = vpop.f32.mrb[38].mxu0  ;;  %1895 = vmatprep.mubr.f32.mxu1 %v6673_v3 }
 0x254   : > { %1711 = vst [vmem:[%s6459_s28 + $0x120] sm:$0xff] %v1655_v5  ;;  %v5251_v14 = vadd.f32 %v1566_v11, %v6449_v46  ;;  %v1568_v15 = vpop.f32.mrb[39].mxu0  ;;  %1896 = vmatmul.mubr.f32.gmra.mrb[16].mxu1 %v6669_v61 }
 0x255   : > { %1712 = vst [vmem:[%s6459_s28 + $0x128] sm:$0xff] %v1656_v8  ;;  %v5252_v16 = vadd.f32 %v1568_v15, %v6453_v47 }
 0x256   : > { %v1657_v17 = vmax.f32 %v5251_v14, 0.0 }
 0x257   : > { %v1658_v19 = vmax.f32 %v5252_v16, 0.0  ;;  %v1572_v21 = vpop.f32.mrb[40].mxu0 }
 0x258   : > { %1713 = vst [vmem:[%s6459_s28 + $0x130] sm:$0xff] %v1657_v17  ;;  %v6683_v22 = vmax.f32 %v1655_v5, %v1657_v17  ;;  %v5253_v23 = vadd.f32 %v1572_v21, %v6449_v46  ;;  %v1574_v24 = vpop.f32.mrb[41].mxu0 }
 0x259   : > { %1714 = vst [vmem:[%s6459_s28 + $0x138] sm:$0xff] %v1658_v19  ;;  %v6687_v25 = vmax.f32 %v1656_v8, %v1658_v19  ;;  %v5254_v63 = vadd.f32 %v1574_v24, %v6453_v47 }
 0x25a   : > { %v1659_v6 = vmax.f32 %v5253_v23, 0.0 }
 0x25b   : > { %v1660_v20 = vmax.f32 %v5254_v63, 0.0  ;;  %v1578_v34 = vpop.f32.mrb[42].mxu0  ;;  %1900 = vmatprep.mubr.f32.mxu1 %v6687_v25 }
 0x25c   : > { %1715 = vst [vmem:[%s6459_s28 + $0x140] sm:$0xff] %v1659_v6  ;;  %v5255_v42 = vadd.f32 %v1578_v34, %v6449_v46  ;;  %v1580_v2 = vpop.f32.mrb[43].mxu0  ;;  %1901 = vmatmul.mubr.f32.gmra.mrb[18].mxu1 %v6683_v22 }
 0x25d   : > { %1716 = vst [vmem:[%s6459_s28 + $0x148] sm:$0xff] %v1660_v20  ;;  %v5256_v10 = vadd.f32 %v1580_v2, %v6453_v47 }
 0x25e   : > { %v1661_v26 = vmax.f32 %v5255_v42, 0.0 }
 0x25f   : > { %v1662_v29 = vmax.f32 %v5256_v10, 0.0  ;;  %v1584_v30 = vpop.f32.mrb[44].mxu0 }
 0x260   : > { %1717 = vst [vmem:[%s6459_s28 + $0x150] sm:$0xff] %v1661_v26  ;;  %v6697_v31 = vmax.f32 %v1659_v6, %v1661_v26  ;;  %v5257_v32 = vadd.f32 %v1584_v30, %v6449_v46  ;;  %v1586_v35 = vpop.f32.mrb[45].mxu0 }
 0x261   : > { %1718 = vst [vmem:[%s6459_s28 + $0x158] sm:$0xff] %v1662_v29  ;;  %v6701_v36 = vmax.f32 %v1660_v20, %v1662_v29  ;;  %v5258_v38 = vadd.f32 %v1586_v35, %v6453_v47 }
 0x262   : > { %v1663_v44 = vmax.f32 %v5257_v32, 0.0 }
 0x263   : > { %v1664_v48 = vmax.f32 %v5258_v38, 0.0  ;;  %v1590_v49 = vpop.f32.mrb[46].mxu0  ;;  %1905 = vmatprep.mubr.f32.mxu1 %v6701_v36 }
 0x264   : > { %1719 = vst [vmem:[%s6459_s28 + $0x160] sm:$0xff] %v1663_v44  ;;  %v5259_v53 = vadd.f32 %v1590_v49, %v6449_v46  ;;  %v1592_v54 = vpop.f32.mrb[47].mxu0  ;;  %1906 = vmatmul.mubr.f32.gmra.mrb[20].mxu1 %v6697_v31  ;;  %v2133_v49 = vld [vmem:[%s8234_s4 + $0x60] sm:$0xff] }
 0x265   : > { %1720 = vst [vmem:[%s6459_s28 + $0x168] sm:$0xff] %v1664_v48  ;;  %v5260_v56 = vadd.f32 %v1592_v54, %v6453_v47  ;;  %v2140_v54 = vld [vmem:[%s8234_s4 + $0x98] sm:$0xff] }
 0x266   : > { %v1665_v58 = vmax.f32 %v5259_v53, 0.0  ;;  %v2138_v53 = vld [vmem:[%s8234_s4 + $0x88] sm:$0xff] }
 0x267   : > { %v1666_v60 = vmax.f32 %v5260_v56, 0.0  ;;  %v1596_v41 = vpop.f32.mrb[48].mxu0  ;;  %v2137_v56 = vld [vmem:[%s8234_s4 + $0x80] sm:$0xff] }
 0x268   : > { %1721 = vst [vmem:[%s6459_s28 + $0x170] sm:$0xff] %v1665_v58  ;;  %v6711_v62 = vmax.f32 %v1663_v44, %v1665_v58  ;;  %v5261_v0 = vadd.f32 %v1596_v41, %v6449_v46  ;;  %v1598_v4 = vpop.f32.mrb[49].mxu0  ;;  %v4813_v58 = vpack.c.bf16 %v2140_v54, %v2138_v53  ;;  %v2142_v41 = vld [vmem:[%s8234_s4 + $0xa8] sm:$0xff]  ;;  %v2180_v54 = vld [vmem:[%s8234_s4 + $0x1d8] sm:$0xff] }
 0x269   : > { %1722 = vst [vmem:[%s6459_s28 + $0x178] sm:$0xff] %v1666_v60  ;;  %v6715_v5 = vmax.f32 %v1664_v48, %v1666_v60  ;;  %v5262_v8 = vadd.f32 %v1598_v4, %v6453_v47  ;;  %v2178_v53 = vld [vmem:[%s8234_s4 + $0x1c8] sm:$0xff] }
 0x26a   : > { %v1667_v11 = vmax.f32 %v5261_v0, 0.0  ;;  %v2144_v0 = vld [vmem:[%s8234_s4 + $0xb8] sm:$0xff] }
 0x26b   : > { %v1668_v14 = vmax.f32 %v5262_v8, 0.0  ;;  %v1602_v15 = vpop.f32.mrb[50].mxu0  ;;  %1910 = vmatprep.mubr.f32.mxu1 %v6715_v5  ;;  %v4817_v4 = vpack.c.bf16 %v2144_v0, %v2142_v41  ;;  %v2182_v41 = vld [vmem:[%s8234_s4 + $0x1e8] sm:$0xff]  ;;  %v2184_v0 = vld [vmem:[%s8234_s4 + $0x1f8] sm:$0xff] }
 0x26c   : > { %1723 = vst [vmem:[%s6459_s28 + $0x180] sm:$0xff] %v1667_v11  ;;  %v5263_v16 = vadd.f32 %v1602_v15, %v6449_v46  ;;  %v1604_v17 = vpop.f32.mrb[51].mxu0  ;;  %1911 = vmatmul.mubr.f32.gmra.mrb[22].mxu1 %v6711_v62  ;;  %v2145_v15 = vld [vmem:[%s8234_s4 + $0xc0] sm:$0xff] }
 0x26d   : > { %1724 = vst [vmem:[%s6459_s28 + $0x188] sm:$0xff] %v1668_v14  ;;  %v5264_v19 = vadd.f32 %v1604_v17, %v6453_v47  ;;  %v2147_v17 = vld [vmem:[%s8234_s4 + $0xd0] sm:$0xff] }
 0x26e   : > { %v1669_v21 = vmax.f32 %v5263_v16, 0.0 }
 0x26f   : > { %v1670_v23 = vmax.f32 %v5264_v19, 0.0  ;;  %v1608_v24 = vpop.f32.mrb[52].mxu0  ;;  %v4823_v19 = vpack.c.bf16 %v2147_v17, %v2145_v15 }
 0x270   : > { %1725 = vst [vmem:[%s6459_s28 + $0x190] sm:$0xff] %v1669_v21  ;;  %v6725_v63 = vmax.f32 %v1667_v11, %v1669_v21  ;;  %v5265_v6 = vadd.f32 %v1608_v24, %v6449_v46  ;;  %v1610_v20 = vpop.f32.mrb[53].mxu0  ;;  %v2146_v11 = vld [vmem:[%s8234_s4 + $0xc8] sm:$0xff] }
 0x271   : > { %1726 = vst [vmem:[%s6459_s28 + $0x198] sm:$0xff] %v1670_v23  ;;  %v6729_v34 = vmax.f32 %v1668_v14, %v1670_v23  ;;  %v5266_v42 = vadd.f32 %v1610_v20, %v6453_v47  ;;  %v2148_v14 = vld [vmem:[%s8234_s4 + $0xd8] sm:$0xff]  ;;  %v2150_v21 = vld [vmem:[%s8234_s4 + $0xe8] sm:$0xff] }
 0x272   : > { %v1671_v2 = vmax.f32 %v5265_v6, 0.0  ;;  %v4821_v16 = vpack.c.bf16 %v2148_v14, %v2146_v11  ;;  %v2152_v23 = vld [vmem:[%s8234_s4 + $0xf8] sm:$0xff]  ;;  %v2151_v6 = vld [vmem:[%s8234_s4 + $0xf0] sm:$0xff]  ;;  %v2186_v11 = vld [vmem:[%s8234_s4 + $0x208] sm:$0xff] }
 0x273   : > { %v1672_v10 = vmax.f32 %v5266_v42, 0.0  ;;  %v1614_v26 = vpop.f32.mrb[54].mxu0  ;;  %1915 = vmatprep.mubr.f32.mxu1 %v6729_v34  ;;  %v4825_v24 = vpack.c.bf16 %v2152_v23, %v2150_v21  ;;  %v2156_v42 = vld [vmem:[%s8234_s4 + $0x118] sm:$0xff] }
 0x274   : > { %1727 = vst [vmem:[%s6459_s28 + $0x1a0] sm:$0xff] %v1671_v2  ;;  %v5267_v29 = vadd.f32 %v1614_v26, %v6449_v46  ;;  %v1616_v30 = vpop.f32.mrb[55].mxu0  ;;  %1916 = vmatmul.mubr.f32.gmra.mrb[24].mxu1 %v6725_v63  ;;  %v2122_v46 = vld [vmem:[%s8234_s4 + $0x8] sm:$0xff]  ;;  %v2155_v26 = vld [vmem:[%s8234_s4 + $0x110] sm:$0xff]  ;;  %v2188_v14 = vld [vmem:[%s8234_s4 + $0x218] sm:$0xff] }
 0x275   : > { %1728 = vst [vmem:[%s6459_s28 + $0x1a8] sm:$0xff] %v1672_v10  ;;  %v5268_v32 = vadd.f32 %v1616_v30, %v6453_v47  ;;  %v2124_v47 = vld [vmem:[%s8234_s4 + $0x18] sm:$0xff]  ;;  %v2158_v30 = vld [vmem:[%s8234_s4 + $0x128] sm:$0xff]  ;;  %v4861_v15 = vpack.c.bf16 %v2188_v14, %v2186_v11  ;;  %v2189_v14 = vld [vmem:[%s8234_s4 + $0x220] sm:$0xff] }
 0x276   : > { %v1673_v35 = vmax.f32 %v5267_v29, 0.0 }
 0x277   : > { %v1674_v38 = vmax.f32 %v5268_v32, 0.0  ;;  %v2160_v32 = vld [vmem:[%s8234_s4 + $0x138] sm:$0xff] }
 0x278   : > { %1729 = vst [vmem:[%s6459_s28 + $0x1b0] sm:$0xff] %v1673_v35  ;;  %v6739_v44 = vmax.f32 %v1671_v2, %v1673_v35  ;;  %v2153_v2 = vld [vmem:[%s8234_s4 + $0x100] sm:$0xff]  ;;  %v4833_v35 = vpack.c.bf16 %v2160_v32, %v2158_v30 }
 0x279   : > { %1730 = vst [vmem:[%s6459_s28 + $0x1b8] sm:$0xff] %v1674_v38  ;;  %v6742_v48 = vmax.f32 %v1672_v10, %v1674_v38  ;;  %v4831_v29 = vpack.c.bf16 %v2155_v26, %v2153_v2  ;;  %v2157_v38 = vld [vmem:[%s8234_s4 + $0x120] sm:$0xff]  ;;  %s3905_s28 = sshll.u32 %s8245_s27, 3 }
 0x27b   : > { %1920 = vmatprep.mubr.f32.mxu1 %v6742_v48 }
 0x27c   : > { %1921 = vmatmul.mubr.f32.gmra.mrb[26].mxu1 %v6739_v44 }
 0x27d   : > { %2022 = vmatprep.mubr.f32.mxu1 %v6484_v9  ;;  %v4797_v9 = vpack.c.bf16 %v2124_v47, %v2122_v46  ;;  %v2162_v46 = vld [vmem:[%s8234_s4 + $0x148] sm:$0xff]  ;;  %v2164_v47 = vld [vmem:[%s8234_s4 + $0x158] sm:$0xff] }
 0x27f   : > { %4798 = vmatprep.subr.bf16.mxu1 %v4797_v9  ;;  %v4837_v9 = vpack.c.bf16 %v2164_v47, %v2162_v46 }
 0x280   : > { %2023 = vmatmul.mubr.f32.vlgmr.msra.gmra.mrb[28].mxu1 %v6479_v50  ;;  %v2121_v50 = vld [vmem:[%s8234_s4] sm:$0xff] }
 0x281   : > { %2027 = vmatprep.mubr.f32.mxu1 %v6521_v18 }
 0x284   : > { %2028 = vmatmul.mubr.f32.gmra.mrb[30].mxu1 %v6517_v59  ;;  %v2123_v59 = vld [vmem:[%s8234_s4 + $0x10] sm:$0xff] }
 0x285   : > { %2032 = vmatprep.mubr.f32.mxu1 %v6559_v1  ;;  %v4799_v18 = vpack.c.bf16 %v2123_v59, %v2121_v50  ;;  %v2128_v1 = vld [vmem:[%s8234_s4 + $0x38] sm:$0xff]  ;;  %v2161_v50 = vld [vmem:[%s8234_s4 + $0x140] sm:$0xff]  ;;  %v2163_v59 = vld [vmem:[%s8234_s4 + $0x150] sm:$0xff] }
 0x287   : > { %4800 = vmatpush1.bf16.msra.mxu1 %v4799_v18  ;;  %v4839_v18 = vpack.c.bf16 %v2163_v59, %v2161_v50 }
 0x288   : > { %2033 = vmatmul.mubr.f32.gmra.mrb[32].mxu1 %v6555_v43  ;;  %v2126_v43 = vld [vmem:[%s8234_s4 + $0x28] sm:$0xff] }
 0x289   : > { %2037 = vmatprep.mubr.f32.mxu1 %v6597_v51  ;;  %v2125_v51 = vld [vmem:[%s8234_s4 + $0x20] sm:$0xff] }
 0x28c   : > { %2038 = vmatmul.mubr.f32.gmra.mrb[34].mxu1 %v6593_v27  ;;  %v4801_v27 = vpack.c.bf16 %v2128_v1, %v2126_v43  ;;  %v2166_v43 = vld [vmem:[%s8234_s4 + $0x168] sm:$0xff]  ;;  %v2168_v1 = vld [vmem:[%s8234_s4 + $0x178] sm:$0xff] }
 0x28d   : > { %2042 = vmatprep.mubr.f32.mxu1 %v6617_v55 }
 0x28e   : > { %4802 = vmatprep.subr.bf16.mxu1 %v4801_v27  ;;  %v4841_v27 = vpack.c.bf16 %v2168_v1, %v2166_v43 }
 0x290   : > { %2043 = vmatmul.mubr.f32.gmra.mrb[36].mxu1 %v6613_v52  ;;  %v2127_v52 = vld [vmem:[%s8234_s4 + $0x30] sm:$0xff] }
 0x291   : > { %2047 = vmatprep.mubr.f32.mxu1 %v6631_v12  ;;  %v4803_v55 = vpack.c.bf16 %v2127_v52, %v2125_v51  ;;  %v2132_v12 = vld [vmem:[%s8234_s4 + $0x58] sm:$0xff]  ;;  %v2165_v51 = vld [vmem:[%s8234_s4 + $0x160] sm:$0xff]  ;;  %v2167_v52 = vld [vmem:[%s8234_s4 + $0x170] sm:$0xff] }
 0x293   : > { %4804 = vmatpush1.bf16.msra.mxu1 %v4803_v55  ;;  %v4843_v55 = vpack.c.bf16 %v2167_v52, %v2165_v51 }
 0x294   : > { %2048 = vmatmul.mubr.f32.gmra.mrb[38].mxu1 %v6627_v7  ;;  %v2130_v7 = vld [vmem:[%s8234_s4 + $0x48] sm:$0xff] }
 0x295   : > { %2052 = vmatprep.mubr.f32.mxu1 %v6645_v13  ;;  %v4805_v13 = vpack.c.bf16 %v2132_v12, %v2130_v7  ;;  %v2170_v7 = vld [vmem:[%s8234_s4 + $0x188] sm:$0xff]  ;;  %v2172_v12 = vld [vmem:[%s8234_s4 + $0x198] sm:$0xff] }
 0x297   : > { %4806 = vmatprep.subr.bf16.mxu1 %v4805_v13  ;;  %v4845_v13 = vpack.c.bf16 %v2172_v12, %v2170_v7 }
 0x298   : > { %2053 = vmatmul.mubr.f32.gmra.mrb[40].mxu1 %v6641_v57  ;;  %v2129_v57 = vld [vmem:[%s8234_s4 + $0x40] sm:$0xff] }
 0x299   : > { %2057 = vmatprep.mubr.f32.mxu1 %v6659_v37 }
 0x29c   : > { %2058 = vmatmul.mubr.f32.gmra.mrb[42].mxu1 %v6655_v33  ;;  %v2131_v33 = vld [vmem:[%s8234_s4 + $0x50] sm:$0xff] }
 0x29d   : > { %2062 = vmatprep.mubr.f32.mxu1 %v6673_v3  ;;  %v4807_v37 = vpack.c.bf16 %v2131_v33, %v2129_v57  ;;  %v2136_v3 = vld [vmem:[%s8234_s4 + $0x78] sm:$0xff]  ;;  %v2169_v57 = vld [vmem:[%s8234_s4 + $0x180] sm:$0xff]  ;;  %v2171_v33 = vld [vmem:[%s8234_s4 + $0x190] sm:$0xff] }
 0x29f   : > { %4808 = vmatpush1.bf16.msra.mxu1 %v4807_v37  ;;  %v4847_v37 = vpack.c.bf16 %v2171_v33, %v2169_v57 }
 0x2a0   : > { %2063 = vmatmul.mubr.f32.gmra.mrb[44].mxu1 %v6669_v61  ;;  %v2134_v61 = vld [vmem:[%s8234_s4 + $0x68] sm:$0xff] }
 0x2a1   : > { %2067 = vmatprep.mubr.f32.mxu1 %v6687_v25  ;;  %v4809_v25 = vpack.c.bf16 %v2136_v3, %v2134_v61  ;;  %v2174_v61 = vld [vmem:[%s8234_s4 + $0x1a8] sm:$0xff]  ;;  %v2176_v3 = vld [vmem:[%s8234_s4 + $0x1b8] sm:$0xff] }
 0x2a3   : > { %4810 = vmatprep.subr.bf16.mxu1 %v4809_v25  ;;  %v4849_v25 = vpack.c.bf16 %v2176_v3, %v2174_v61 }
 0x2a4   : > { %2068 = vmatmul.mubr.f32.gmra.mrb[46].mxu1 %v6683_v22  ;;  %v2135_v22 = vld [vmem:[%s8234_s4 + $0x70] sm:$0xff] }
 0x2a5   : > { %2072 = vmatprep.mubr.f32.mxu1 %v6701_v36  ;;  %v4811_v36 = vpack.c.bf16 %v2135_v22, %v2133_v49  ;;  %v2173_v49 = vld [vmem:[%s8234_s4 + $0x1a0] sm:$0xff]  ;;  %v2175_v22 = vld [vmem:[%s8234_s4 + $0x1b0] sm:$0xff] }
 0x2a7   : > { %4812 = vmatpush1.bf16.msra.mxu1 %v4811_v36  ;;  %v4851_v36 = vpack.c.bf16 %v2175_v22, %v2173_v49 }
 0x2a8   : > { %2073 = vmatmul.mubr.f32.gmra.mrb[48].mxu1 %v6697_v31  ;;  %v2139_v31 = vld [vmem:[%s8234_s4 + $0x90] sm:$0xff]  ;;  %4814 = vmatprep.subr.bf16.mxu1 %v4813_v58  ;;  %v2177_v58 = vld [vmem:[%s8234_s4 + $0x1c0] sm:$0xff] }
 0x2a9   : > { %2077 = vmatprep.mubr.f32.mxu1 %v6715_v5  ;;  %v4815_v60 = vpack.c.bf16 %v2139_v31, %v2137_v56  ;;  %v2141_v5 = vld [vmem:[%s8234_s4 + $0xa0] sm:$0xff]  ;;  %v4853_v56 = vpack.c.bf16 %v2180_v54, %v2178_v53  ;;  %v2179_v31 = vld [vmem:[%s8234_s4 + $0x1d0] sm:$0xff] }
 0x2ab   : > { %4816 = vmatpush1.bf16.msra.mxu1 %v4815_v60  ;;  %v4855_v60 = vpack.c.bf16 %v2179_v31, %v2177_v58  ;;  %v2185_v58 = vld [vmem:[%s8234_s4 + $0x200] sm:$0xff]  ;;  %v2187_v31 = vld [vmem:[%s8234_s4 + $0x210] sm:$0xff] }
 0x2ac   : > { %2078 = vmatmul.mubr.f32.gmra.mrb[50].mxu1 %v6711_v62  ;;  %v2143_v62 = vld [vmem:[%s8234_s4 + $0xb0] sm:$0xff]  ;;  %4818 = vmatprep.subr.bf16.mxu1 %v4817_v4  ;;  %v4857_v4 = vpack.c.bf16 %v2184_v0, %v2182_v41  ;;  %v2190_v41 = vld [vmem:[%s8234_s4 + $0x228] sm:$0xff]  ;;  %v2192_v0 = vld [vmem:[%s8234_s4 + $0x238] sm:$0xff] }
 0x2ad   : > { %2082 = vmatprep.mubr.f32.mxu1 %v6729_v34  ;;  %v4819_v8 = vpack.c.bf16 %v2143_v62, %v2141_v5  ;;  %v2154_v34 = vld [vmem:[%s8234_s4 + $0x108] sm:$0xff]  ;;  %v2181_v5 = vld [vmem:[%s8234_s4 + $0x1e0] sm:$0xff]  ;;  %v2183_v62 = vld [vmem:[%s8234_s4 + $0x1f0] sm:$0xff]  ;;  %v4865_v11 = vpack.c.bf16 %v2192_v0, %v2190_v41 }
 0x2ae   : > { %v4829_v10 = vpack.c.bf16 %v2156_v42, %v2154_v34 }
 0x2af   : > { %4820 = vmatpush1.bf16.msra.mxu1 %v4819_v8  ;;  %v4859_v8 = vpack.c.bf16 %v2183_v62, %v2181_v5  ;;  %v4863_v62 = vpack.c.bf16 %v2187_v31, %v2185_v58  ;;  %v2207_v58 = vld [vmem:[%s8234_s4 + $0x2b0] sm:$0xff] }
 0x2b0   : > { %2083 = vmatmul.mubr.f32.gmra.mrb[52].mxu1 %v6725_v63  ;;  %4822 = vmatprep.subr.bf16.mxu1 %v4821_v16  ;;  %v2149_v63 = vld [vmem:[%s8234_s4 + $0xe0] sm:$0xff] }
 0x2b1   : > { %2087 = vmatprep.mubr.f32.mxu1 %v6742_v48  ;;  %v4827_v20 = vpack.c.bf16 %v2151_v6, %v2149_v63 }
 0x2b3   : > { %4824 = vmatpush1.bf16.msra.mxu1 %v4823_v19 }
 0x2b4   : > { %2088 = vmatmul.mubr.f32.gmra.mrb[54].mxu1 %v6739_v44  ;;  %4826 = vmatprep.subr.bf16.mxu1 %v4825_v24  ;;  %v2159_v44 = vld [vmem:[%s8234_s4 + $0x130] sm:$0xff] }
 0x2b5   : > { %v4835_v48 = vpack.c.bf16 %v2159_v44, %v2157_v38 }
 0x2b7   : > { %4828 = vmatpush1.bf16.msra.mxu1 %v4827_v20 }
 0x2b8   : > { %4830 = vmatprep.subr.bf16.mxu1 %v4829_v10 }
 0x2bb   : > { %4832 = vmatpush1.bf16.msra.mxu1 %v4831_v29 }
 0x2bc   : > { %4834 = vmatprep.subr.bf16.mxu1 %v4833_v35 }
 0x2bf   : > { %4836 = vmatpush1.bf16.msra.mxu1 %v4835_v48 }
 0x2c0   : > { %4838 = vmatprep.subr.bf16.mxu1 %v4837_v9 }
 0x2c3   : > { %4840 = vmatpush1.bf16.msra.mxu1 %v4839_v18 }
 0x2c4   : > { %4842 = vmatprep.subr.bf16.mxu1 %v4841_v27 }
 0x2c7   : > { %4844 = vmatpush1.bf16.msra.mxu1 %v4843_v55 }
 0x2c8   : > { %4846 = vmatprep.subr.bf16.mxu1 %v4845_v13 }
 0x2cb   : > { %4848 = vmatpush1.bf16.msra.mxu1 %v4847_v37 }
 0x2cc   : > { %4850 = vmatprep.subr.bf16.mxu1 %v4849_v25 }
 0x2cf   : > { %4852 = vmatpush1.bf16.msra.mxu1 %v4851_v36 }
 0x2d0   : > { %4854 = vmatprep.subr.bf16.mxu1 %v4853_v56 }
 0x2d3   : > { %4856 = vmatpush1.bf16.msra.mxu1 %v4855_v60 }
 0x2d4   : > { %4858 = vmatprep.subr.bf16.mxu1 %v4857_v4 }
 0x2d7   : > { %4860 = vmatpush1.bf16.msra.mxu1 %v4859_v8 }
 0x2d8   : > { %4862 = vmatprep.subr.bf16.mxu1 %v4861_v15  ;;  %v2191_v15 = vld [vmem:[%s8234_s4 + $0x230] sm:$0xff] }
 0x2e7   : > { %v3947_v16 = vpop.f32.mrb[0].mxu1 }
 0x2e8   : > { %v3948_v17 = vpop.f32.mrb[1].mxu1 }
 0x2e9   : > { %v3949_v19 = vadd.f32 %v3948_v17, %v3947_v16  ;;  %v2194_v17 = vld [vmem:[%s8234_s4 + $0x248] sm:$0xff] }
 0x2ef   : > { %v3950_v21 = vpop.f32.mrb[2].mxu1 }
 0x2f0   : > { %v3951_v23 = vpop.f32.mrb[3].mxu1 }
 0x2f1   : > { %v3952_v24 = vadd.f32 %v3951_v23, %v3950_v21 }
 0x2f7   : > { %v3953_v63 = vpop.f32.mrb[4].mxu1 }
 0x2f8   : > { %v3954_v6 = vpop.f32.mrb[5].mxu1 }
 0x2f9   : > { %v6972_v20 = vadd.f32 %v3954_v6, %v3953_v63 }
 0x2ff   : > { %v3956_v34 = vpop.f32.mrb[6].mxu1 }
 0x300   : > { %v3957_v42 = vpop.f32.mrb[7].mxu1 }
 0x301   : > { %v6974_v2 = vadd.f32 %v3957_v42, %v3956_v34  ;;  %v2193_v34 = vld [vmem:[%s8234_s4 + $0x240] sm:$0xff]  ;;  %v2195_v42 = vld [vmem:[%s8234_s4 + $0x250] sm:$0xff] }
 0x307   : > { %v3959_v10 = vpop.f32.mrb[8].mxu1 }
 0x308   : > { %v3960_v26 = vpop.f32.mrb[9].mxu1 }
 0x309   : > { %v6976_v29 = vadd.f32 %v3960_v26, %v3959_v10  ;;  %v2200_v26 = vld [vmem:[%s8234_s4 + $0x278] sm:$0xff] }
 0x30f   : > { %v3962_v30 = vpop.f32.mrb[10].mxu1 }
 0x310   : > { %v3963_v32 = vpop.f32.mrb[11].mxu1 }
 0x311   : > { %v6978_v35 = vadd.f32 %v3963_v32, %v3962_v30 }
 0x317   : > { %v3965_v38 = vpop.f32.mrb[12].mxu1 }
 0x318   : > { %v3966_v44 = vpop.f32.mrb[13].mxu1 }
 0x319   : > { %v6980_v48 = vadd.f32 %v3966_v44, %v3965_v38  ;;  %v4871_v38 = vpack.c.bf16 %v2195_v42, %v2193_v34  ;;  %v2220_v42 = vld [vmem:[%s8234_s4 + $0x318] sm:$0xff] }
 0x31f   : > { %v3968_v46 = vpop.f32.mrb[14].mxu1 }
 0x320   : > { %v3969_v47 = vpop.f32.mrb[15].mxu1 }
 0x321   : > { %v6982_v50 = vadd.f32 %v3969_v47, %v3968_v46  ;;  %v2197_v47 = vld [vmem:[%s8234_s4 + $0x260] sm:$0xff] }
 0x327   : > { %v3971_v9 = vpop.f32.mrb[16].mxu1 }
 0x328   : > { %v3972_v59 = vpop.f32.mrb[17].mxu1 }
 0x329   : > { %v6984_v18 = vadd.f32 %v3972_v59, %v3971_v9  ;;  %v2199_v9 = vld [vmem:[%s8234_s4 + $0x270] sm:$0xff] }
 0x32f   : > { %v3974_v43 = vpop.f32.mrb[18].mxu1 }
 0x330   : > { %v3975_v1 = vpop.f32.mrb[19].mxu1 }
 0x331   : > { %v6986_v27 = vadd.f32 %v3975_v1, %v3974_v43  ;;  %v2204_v43 = vld [vmem:[%s8234_s4 + $0x298] sm:$0xff] }
 0x337   : > { %v3977_v51 = vpop.f32.mrb[20].mxu1 }
 0x338   : > { %v3978_v52 = vpop.f32.mrb[21].mxu1 }
 0x339   : > { %v6988_v55 = vadd.f32 %v3978_v52, %v3977_v51  ;;  %v4875_v52 = vpack.c.bf16 %v2199_v9, %v2197_v47  ;;  %v2224_v9 = vld [vmem:[%s8234_s4 + $0x338] sm:$0xff] }
 0x33f   : > { %v3980_v7 = vpop.f32.mrb[22].mxu1 }
 0x340   : > { %v3981_v12 = vpop.f32.mrb[23].mxu1 }
 0x341   : > { %v6990_v57 = vadd.f32 %v3981_v12, %v3980_v7 }
 0x347   : > { %v3983_v13 = vpop.f32.mrb[24].mxu1 }
 0x348   : > { %v3984_v33 = vpop.f32.mrb[25].mxu1 }
 0x349   : > { %v6993_v37 = vadd.f32 %v3984_v33, %v3983_v13  ;;  %v2201_v13 = vld [vmem:[%s8234_s4 + $0x280] sm:$0xff]  ;;  %v2203_v33 = vld [vmem:[%s8234_s4 + $0x290] sm:$0xff] }
 0x34f   : > { %v3986_v61 = vpop.f32.mrb[26].mxu1 }
 0x350   : > { %v3987_v3 = vpop.f32.mrb[27].mxu1 }
 0x351   : > { %v6995_v25 = vadd.f32 %v3987_v3, %v3986_v61  ;;  %v2208_v3 = vld [vmem:[%s8234_s4 + $0x2b8] sm:$0xff] }
 0x353   : > { %v4021_v49 = vpop.f32.mrb[28].mxu1 }
 0x354   : > { %v4022_v22 = vpop.f32.mrb[29].mxu1 }
 0x355   : > { %v4023_v36 = vadd.f32 %v4022_v22, %v4021_v49 }
 0x357   : > { %v2093_v53 = vmax.f32 %v3949_v19, %v4023_v36  ;;  %v4024_v54 = vpop.f32.mrb[30].mxu1  ;;  %v2196_v19 = vld [vmem:[%s8234_s4 + $0x258] sm:$0xff]  ;;  %v4879_v36 = vpack.c.bf16 %v2203_v33, %v2201_v13 }
 0x358   : > { %v4025_v56 = vpop.f32.mrb[31].mxu1  ;;  %v4869_v6 = vpack.c.bf16 %v2196_v19, %v2194_v17  ;;  %v2228_v33 = vld [vmem:[%s8234_s4 + $0x358] sm:$0xff] }
 0x359   : > { %2107 = vst [vmem:[%s7000_s23] sm:$0xff] %v2093_v53  ;;  %v4026_v60 = vadd.f32 %v4025_v56, %v4024_v54  ;;  %v2205_v56 = vld [vmem:[%s8234_s4 + $0x2a0] sm:$0xff] }
 0x35b   : > { %v2094_v4 = vmax.f32 %v3952_v24, %v4026_v60  ;;  %v4027_v5 = vpop.f32.mrb[32].mxu1  ;;  %v4867_v24 = vpack.c.bf16 %v2191_v15, %v2189_v14  ;;  %v2212_v60 = vld [vmem:[%s8234_s4 + $0x2d8] sm:$0xff] }
 0x35c   : > { %v4028_v8 = vpop.f32.mrb[33].mxu1  ;;  %v2216_v15 = vld [vmem:[%s8234_s4 + $0x2f8] sm:$0xff] }
 0x35d   : > { %2108 = vst [vmem:[%s7000_s23 + $0x8] sm:$0xff] %v2094_v4  ;;  %v4029_v16 = vadd.f32 %v4028_v8, %v4027_v5  ;;  %2357 = vmatprep.mubr.f32.mxu1 %v2094_v4  ;;  %v2209_v8 = vld [vmem:[%s8234_s4 + $0x2c0] sm:$0xff] }
 0x35e   : > { %2358 = vmatmul.mubr.f32.vlgmr.msra.gmra.mrb[56].mxu1 %v2093_v53 }
 0x35f   : > { %v7029_v21 = vmax.f32 %v6972_v20, %v4029_v16  ;;  %4864 = vmatpush1.bf16.msra.mxu1 %v4863_v62  ;;  %v4030_v23 = vpop.f32.mrb[34].mxu1  ;;  %v2198_v20 = vld [vmem:[%s8234_s4 + $0x268] sm:$0xff] }
 0x360   : > { %v4031_v63 = vpop.f32.mrb[35].mxu1  ;;  %4866 = vmatprep.subr.bf16.mxu1 %v4865_v11  ;;  %v4873_v46 = vpack.c.bf16 %v2200_v26, %v2198_v20  ;;  %v2211_v11 = vld [vmem:[%s8234_s4 + $0x2d0] sm:$0xff] }
 0x361   : > { %2109 = vst [vmem:[%s7000_s23 + $0x10] sm:$0xff] %v7029_v21  ;;  %v4032_v10 = vadd.f32 %v4031_v63, %v4030_v23  ;;  %2363 = vmatprep.mubr.f32.mxu1 %v7029_v21  ;;  %v4887_v19 = vpack.c.bf16 %v2211_v11, %v2209_v8  ;;  %v2213_v63 = vld [vmem:[%s8234_s4 + $0x2e0] sm:$0xff]  ;;  %v2234_v8 = vld [vmem:[%s8234_s4 + $0x388] sm:$0xff]  ;;  %v2236_v11 = vld [vmem:[%s8234_s4 + $0x398] sm:$0xff] }
 0x362   : > { %2364 = vmatmul.mubr.f32.gmra.mrb[58].mxu1 %v2094_v4  ;;  %v4883_v4 = vpack.c.bf16 %v2207_v58, %v2205_v56  ;;  %v2232_v58 = vld [vmem:[%s8234_s4 + $0x378] sm:$0xff] }
 0x363   : > { %v7047_v30 = vmax.f32 %v6974_v2, %v4032_v10  ;;  %4868 = vmatpush1.bf16.msra.mxu1 %v4867_v24  ;;  %v4033_v32 = vpop.f32.mrb[36].mxu1  ;;  %v2202_v2 = vld [vmem:[%s8234_s4 + $0x288] sm:$0xff] }
 0x364   : > { %v4034_v44 = vpop.f32.mrb[37].mxu1  ;;  %4870 = vmatprep.subr.bf16.mxu1 %v4869_v6  ;;  %v4877_v12 = vpack.c.bf16 %v2204_v43, %v2202_v2  ;;  %v2215_v6 = vld [vmem:[%s8234_s4 + $0x2f0] sm:$0xff] }
 0x365   : > { %2110 = vst [vmem:[%s7000_s23 + $0x18] sm:$0xff] %v7047_v30  ;;  %v4035_v59 = vadd.f32 %v4034_v44, %v4033_v32  ;;  %2369 = vmatprep.mubr.f32.mxu1 %v7047_v30  ;;  %v4891_v26 = vpack.c.bf16 %v2215_v6, %v2213_v63  ;;  %v2217_v44 = vld [vmem:[%s8234_s4 + $0x300] sm:$0xff]  ;;  %v2240_v6 = vld [vmem:[%s8234_s4 + $0x3b8] sm:$0xff] }
 0x366   : > { %2370 = vmatmul.mubr.f32.gmra.mrb[60].mxu1 %v7029_v21 }
 0x367   : > { %v7066_v1 = vmax.f32 %v6976_v29, %v4035_v59  ;;  %4872 = vmatpush1.bf16.msra.mxu1 %v4871_v38  ;;  %v4036_v51 = vpop.f32.mrb[38].mxu1  ;;  %v2206_v29 = vld [vmem:[%s8234_s4 + $0x2a8] sm:$0xff] }
 0x368   : > { %v4037_v7 = vpop.f32.mrb[39].mxu1  ;;  %4874 = vmatprep.subr.bf16.mxu1 %v4873_v46  ;;  %v4881_v54 = vpack.c.bf16 %v2208_v3, %v2206_v29  ;;  %v2219_v46 = vld [vmem:[%s8234_s4 + $0x310] sm:$0xff] }
 0x369   : > { %2111 = vst [vmem:[%s7000_s23 + $0x20] sm:$0xff] %v7066_v1  ;;  %v4038_v61 = vadd.f32 %v4037_v7, %v4036_v51  ;;  %2375 = vmatprep.mubr.f32.mxu1 %v7066_v1  ;;  %v4895_v43 = vpack.c.bf16 %v2219_v46, %v2217_v44  ;;  %v2221_v7 = vld [vmem:[%s8234_s4 + $0x320] sm:$0xff] }
 0x36a   : > { %2376 = vmatmul.mubr.f32.gmra.mrb[62].mxu1 %v7047_v30  ;;  %v2241_v46 = vld [vmem:[%s8234_s4 + $0x3c0] sm:$0xff] }
 0x36b   : > { %v7085_v49 = vmax.f32 %v6978_v35, %v4038_v61  ;;  %4876 = vmatpush1.bf16.msra.mxu1 %v4875_v52  ;;  %v4039_v22 = vpop.f32.mrb[40].mxu1  ;;  %v2210_v35 = vld [vmem:[%s8234_s4 + $0x2c8] sm:$0xff] }
 0x36c   : > { %v4040_v53 = vpop.f32.mrb[41].mxu1  ;;  %4878 = vmatprep.subr.bf16.mxu1 %v4877_v12  ;;  %v4885_v62 = vpack.c.bf16 %v2212_v60, %v2210_v35  ;;  %v2223_v12 = vld [vmem:[%s8234_s4 + $0x330] sm:$0xff] }
 0x36d   : > { %2112 = vst [vmem:[%s7000_s23 + $0x28] sm:$0xff] %v7085_v49  ;;  %v4041_v31 = vadd.f32 %v4040_v53, %v4039_v22  ;;  %2381 = vmatprep.mubr.f32.mxu1 %v7085_v49  ;;  %v4899_v3 = vpack.c.bf16 %v2223_v12, %v2221_v7  ;;  %v2225_v53 = vld [vmem:[%s8234_s4 + $0x340] sm:$0xff]  ;;  %v2250_v7 = vld [vmem:[%s8234_s4 + $0x408] sm:$0xff]  ;;  %v2252_v12 = vld [vmem:[%s8234_s4 + $0x418] sm:$0xff] }
 0x36e   : > { %2382 = vmatmul.mubr.f32.gmra.mrb[64].mxu1 %v7066_v1 }
 0x36f   : > { %v7104_v41 = vmax.f32 %v6980_v48, %v4041_v31  ;;  %4880 = vmatpush1.bf16.msra.mxu1 %v4879_v36  ;;  %v4042_v0 = vpop.f32.mrb[42].mxu1  ;;  %v2214_v48 = vld [vmem:[%s8234_s4 + $0x2e8] sm:$0xff] }
 0x370   : > { %v4043_v5 = vpop.f32.mrb[43].mxu1  ;;  %4882 = vmatprep.subr.bf16.mxu1 %v4881_v54  ;;  %v4889_v24 = vpack.c.bf16 %v2216_v15, %v2214_v48  ;;  %v2227_v54 = vld [vmem:[%s8234_s4 + $0x350] sm:$0xff] }
 0x371   : > { %2113 = vst [vmem:[%s7000_s23 + $0x30] sm:$0xff] %v7104_v41  ;;  %v4044_v14 = vadd.f32 %v4043_v5, %v4042_v0  ;;  %2387 = vmatprep.mubr.f32.mxu1 %v7104_v41  ;;  %v4903_v60 = vpack.c.bf16 %v2227_v54, %v2225_v53  ;;  %v2229_v5 = vld [vmem:[%s8234_s4 + $0x360] sm:$0xff] }
 0x372   : > { %2388 = vmatmul.mubr.f32.gmra.mrb[66].mxu1 %v7085_v49  ;;  %v2253_v54 = vld [vmem:[%s8234_s4 + $0x420] sm:$0xff] }
 0x373   : > { %v7123_v16 = vmax.f32 %v6982_v50, %v4044_v14  ;;  %4884 = vmatpush1.bf16.msra.mxu1 %v4883_v4  ;;  %v4045_v17 = vpop.f32.mrb[44].mxu1  ;;  %v2218_v50 = vld [vmem:[%s8234_s4 + $0x308] sm:$0xff] }
 0x374   : > { %v4046_v23 = vpop.f32.mrb[45].mxu1  ;;  %4886 = vmatprep.subr.bf16.mxu1 %v4885_v62  ;;  %v4893_v38 = vpack.c.bf16 %v2220_v42, %v2218_v50  ;;  %v2231_v62 = vld [vmem:[%s8234_s4 + $0x370] sm:$0xff] }
 0x375   : > { %2114 = vst [vmem:[%s7000_s23 + $0x38] sm:$0xff] %v7123_v16  ;;  %v4047_v34 = vadd.f32 %v4046_v23, %v4045_v17  ;;  %2393 = vmatprep.mubr.f32.mxu1 %v7123_v16  ;;  %v4907_v15 = vpack.c.bf16 %v2231_v62, %v2229_v5  ;;  %v2233_v23 = vld [vmem:[%s8234_s4 + $0x380] sm:$0xff]  ;;  %v2262_v5 = vld [vmem:[%s8234_s4 + $0x468] sm:$0xff] }
 0x376   : > { %2394 = vmatmul.mubr.f32.gmra.mrb[68].mxu1 %v7104_v41 }
 0x377   : > { %v7142_v10 = vmax.f32 %v6984_v18, %v4047_v34  ;;  %4888 = vmatpush1.bf16.msra.mxu1 %v4887_v19  ;;  %v4048_v20 = vpop.f32.mrb[46].mxu1  ;;  %v2222_v18 = vld [vmem:[%s8234_s4 + $0x328] sm:$0xff]  ;;  %v4909_v19 = vpack.c.bf16 %v2236_v11, %v2234_v8  ;;  %v2261_v8 = vld [vmem:[%s8234_s4 + $0x460] sm:$0xff]  ;;  %v2263_v11 = vld [vmem:[%s8234_s4 + $0x470] sm:$0xff] }
 0x378   : > { %v4049_v32 = vpop.f32.mrb[47].mxu1  ;;  %4890 = vmatprep.subr.bf16.mxu1 %v4889_v24  ;;  %v4897_v52 = vpack.c.bf16 %v2224_v9, %v2222_v18  ;;  %v2235_v24 = vld [vmem:[%s8234_s4 + $0x390] sm:$0xff]  ;;  %v2246_v18 = vld [vmem:[%s8234_s4 + $0x3e8] sm:$0xff]  ;;  %v2248_v9 = vld [vmem:[%s8234_s4 + $0x3f8] sm:$0xff] }
 0x379   : > { %2115 = vst [vmem:[%s7000_s23 + $0x40] sm:$0xff] %v7142_v10  ;;  %v4050_v47 = vadd.f32 %v4049_v32, %v4048_v20  ;;  %2399 = vmatprep.mubr.f32.mxu1 %v7142_v10  ;;  %v4911_v50 = vpack.c.bf16 %v2235_v24, %v2233_v23  ;;  %v2237_v20 = vld [vmem:[%s8234_s4 + $0x3a0] sm:$0xff]  ;;  %v2242_v32 = vld [vmem:[%s8234_s4 + $0x3c8] sm:$0xff]  ;;  %v2267_v23 = vld [vmem:[%s8234_s4 + $0x490] sm:$0xff] }
 0x37a   : > { %2400 = vmatmul.mubr.f32.gmra.mrb[70].mxu1 %v7123_v16  ;;  %v2270_v24 = vld [vmem:[%s8234_s4 + $0x4a8] sm:$0xff] }
 0x37b   : > { %v7161_v59 = vmax.f32 %v6986_v27, %v4050_v47  ;;  %4892 = vmatpush1.bf16.msra.mxu1 %v4891_v26  ;;  %v4051_v2 = vpop.f32.mrb[48].mxu1  ;;  %v2226_v27 = vld [vmem:[%s8234_s4 + $0x348] sm:$0xff]  ;;  %v2239_v26 = vld [vmem:[%s8234_s4 + $0x3b0] sm:$0xff] }
 0x37c   : > { %v4052_v51 = vpop.f32.mrb[49].mxu1  ;;  %4894 = vmatprep.subr.bf16.mxu1 %v4893_v38  ;;  %v4901_v36 = vpack.c.bf16 %v2228_v33, %v2226_v27  ;;  %v4915_v38 = vpack.c.bf16 %v2239_v26, %v2237_v20  ;;  %v2243_v47 = vld [vmem:[%s8234_s4 + $0x3d0] sm:$0xff]  ;;  %v4925_v27 = vpack.c.bf16 %v2252_v12, %v2250_v7  ;;  %v2249_v33 = vld [vmem:[%s8234_s4 + $0x400] sm:$0xff]  ;;  %v2274_v20 = vld [vmem:[%s8234_s4 + $0x4c8] sm:$0xff] }
 0x37d   : > { %2116 = vst [vmem:[%s7000_s23 + $0x48] sm:$0xff] %v7161_v59  ;;  %v4053_v13 = vadd.f32 %v4052_v51, %v4051_v2  ;;  %2405 = vmatprep.mubr.f32.mxu1 %v7161_v59  ;;  %v4919_v2 = vpack.c.bf16 %v2243_v47, %v2241_v46  ;;  %v2245_v51 = vld [vmem:[%s8234_s4 + $0x3e0] sm:$0xff]  ;;  %v2276_v26 = vld [vmem:[%s8234_s4 + $0x4d8] sm:$0xff]  ;;  %v2278_v46 = vld [vmem:[%s8234_s4 + $0x4e8] sm:$0xff] }
 0x37e   : > { %2406 = vmatmul.mubr.f32.gmra.mrb[72].mxu1 %v7142_v10  ;;  %v2280_v47 = vld [vmem:[%s8234_s4 + $0x4f8] sm:$0xff] }
 0x37f   : > { %v7180_v61 = vmax.f32 %v6988_v55, %v4053_v13  ;;  %4896 = vmatpush1.bf16.msra.mxu1 %v4895_v43  ;;  %v4054_v29 = vpop.f32.mrb[50].mxu1  ;;  %v2230_v55 = vld [vmem:[%s8234_s4 + $0x368] sm:$0xff]  ;;  %v4921_v43 = vpack.c.bf16 %v2248_v9, %v2246_v18  ;;  %v4953_v9 = vpack.c.bf16 %v2280_v47, %v2278_v46 }
 0x380   : > { %v4055_v22 = vpop.f32.mrb[51].mxu1  ;;  %4898 = vmatprep.subr.bf16.mxu1 %v4897_v52  ;;  %v4905_v4 = vpack.c.bf16 %v2232_v58, %v2230_v55  ;;  %v2247_v52 = vld [vmem:[%s8234_s4 + $0x3f0] sm:$0xff]  ;;  %v2258_v55 = vld [vmem:[%s8234_s4 + $0x448] sm:$0xff]  ;;  %v2260_v58 = vld [vmem:[%s8234_s4 + $0x458] sm:$0xff] }
 0x381   : > { %2117 = vst [vmem:[%s7000_s23 + $0x50] sm:$0xff] %v7180_v61  ;;  %v4056_v56 = vadd.f32 %v4055_v22, %v4054_v29  ;;  %2411 = vmatprep.mubr.f32.mxu1 %v7180_v61  ;;  %v4923_v13 = vpack.c.bf16 %v2247_v52, %v2245_v51  ;;  %v2251_v29 = vld [vmem:[%s8234_s4 + $0x410] sm:$0xff]  ;;  %v2256_v22 = vld [vmem:[%s8234_s4 + $0x438] sm:$0xff]  ;;  %v2734_v51 = vld [vmem:[%s8202_s7 + $0x80] sm:$0xff] }
 0x382   : > { %2412 = vmatmul.mubr.f32.gmra.mrb[74].mxu1 %v7161_v59  ;;  %v2735_v52 = vld [vmem:[%s8202_s7 + $0x88] sm:$0xff] }
 0x383   : > { %v7199_v31 = vmax.f32 %v6990_v57, %v4056_v56  ;;  %4900 = vmatpush1.bf16.msra.mxu1 %v4899_v3  ;;  %v4057_v35 = vpop.f32.mrb[52].mxu1  ;;  %2482 = vmatprep.mubr.f32.mxu1 %v7047_v30  ;;  %v2254_v3 = vld [vmem:[%s8234_s4 + $0x428] sm:$0xff]  ;;  %v2255_v56 = vld [vmem:[%s8234_s4 + $0x430] sm:$0xff]  ;;  %v4957_v12 = vpack.c.bf16 %v2735_v52, %v2734_v51 }
 0x384   : > { %v4058_v0 = vpop.f32.mrb[53].mxu1  ;;  %4902 = vmatprep.subr.bf16.mxu1 %v4901_v36  ;;  %v4927_v36 = vpack.c.bf16 %v2251_v29, %v2249_v33  ;;  %v4929_v53 = vpack.c.bf16 %v2256_v22, %v2254_v3  ;;  %v2736_v33 = vld [vmem:[%s8202_s7 + $0x90] sm:$0xff]  ;;  %v2737_v29 = vld [vmem:[%s8202_s7 + $0x98] sm:$0xff] }
 0x385   : > { %2118 = vst [vmem:[%s7000_s23 + $0x58] sm:$0xff] %v7199_v31  ;;  %v4059_v57 = vadd.f32 %v4058_v0, %v4057_v35  ;;  %v4931_v35 = vpack.c.bf16 %v2255_v56, %v2253_v54  ;;  %v2257_v0 = vld [vmem:[%s8234_s4 + $0x440] sm:$0xff]  ;;  %v4961_v22 = vpack.c.bf16 %v2737_v29, %v2736_v33  ;;  %v2739_v56 = vld [vmem:[%s8202_s7 + $0xa8] sm:$0xff]  ;;  %v2858_v29 = vld [vmem:[%s8203_s8 + $0x90] sm:$0xff] }
 0x386   : > { %v2738_v54 = vld [vmem:[%s8202_s7 + $0xa0] sm:$0xff] }
 0x387   : > { %v7217_v14 = vmax.f32 %v6993_v37, %v4059_v57  ;;  %4904 = vmatpush1.bf16.msra.mxu1 %v4903_v60  ;;  %v4060_v48 = vpop.f32.mrb[54].mxu1  ;;  %v2238_v37 = vld [vmem:[%s8234_s4 + $0x3a8] sm:$0xff]  ;;  %v4933_v60 = vpack.c.bf16 %v2260_v58, %v2258_v55  ;;  %v4965_v58 = vpack.c.bf16 %v2739_v56, %v2738_v54 }
 0x388   : > { %v4061_v17 = vpop.f32.mrb[55].mxu1  ;;  %4906 = vmatprep.subr.bf16.mxu1 %v4905_v4  ;;  %v4913_v42 = vpack.c.bf16 %v2240_v6, %v2238_v37  ;;  %v2259_v4 = vld [vmem:[%s8234_s4 + $0x450] sm:$0xff] }
 0x389   : > { %2119 = vst [vmem:[%s7000_s23 + $0x60] sm:$0xff] %v7217_v14  ;;  %v4062_v63 = vadd.f32 %v4061_v17, %v4060_v48  ;;  %v4935_v62 = vpack.c.bf16 %v2259_v4, %v2257_v0  ;;  %v2266_v48 = vld [vmem:[%s8234_s4 + $0x488] sm:$0xff]  ;;  %v2740_v0 = vld [vmem:[%s8202_s7 + $0xb0] sm:$0xff] }
 0x38b   : > { %v7234_v34 = vmax.f32 %v6995_v25, %v4062_v63  ;;  %4908 = vmatpush1.bf16.msra.mxu1 %v4907_v15  ;;  %v2244_v25 = vld [vmem:[%s8234_s4 + $0x3d8] sm:$0xff]  ;;  %v4939_v15 = vpack.c.bf16 %v2263_v11, %v2261_v8 }
 0x38c   : > { %4910 = vmatprep.subr.bf16.mxu1 %v4909_v19  ;;  %v4917_v44 = vpack.c.bf16 %v2244_v25, %v2242_v32  ;;  %v2265_v19 = vld [vmem:[%s8234_s4 + $0x480] sm:$0xff]  ;;  %v2272_v63 = vld [vmem:[%s8234_s4 + $0x4b8] sm:$0xff]  ;;  %v4949_v25 = vpack.c.bf16 %v2276_v26, %v2274_v20 }
 0x38d   : > { %2120 = vst [vmem:[%s7000_s23 + $0x68] sm:$0xff] %v7234_v34  ;;  %v4943_v37 = vpack.c.bf16 %v2267_v23, %v2265_v19  ;;  %v4945_v6 = vpack.c.bf16 %v2272_v63, %v2270_v24  ;;  %v2730_v19 = vld [vmem:[%s8202_s7 + $0x60] sm:$0xff]  ;;  %v2731_v23 = vld [vmem:[%s8202_s7 + $0x68] sm:$0xff]  ;;  %v2748_v63 = vld [vmem:[%s8202_s7 + $0xf0] sm:$0xff]  ;;  %s698_s23 = smul.u32 10, %s5589_s25  ;;  %s8247_s25 = smov (!%p711_p8, %s5589_s25), 1 }
 0x38e   : > { %v4983_v24 = vpack.c.bf16 %v2731_v23, %v2730_v19  ;;  %v2856_v26 = vld [vmem:[%s8203_s8 + $0x80] sm:$0xff]  ;;  %s5450_s27 = smul.u32 24, %s8247_s25 }
 0x38f   : > { %4912 = vmatpush1.bf16.msra.mxu1 %v4911_v50  ;;  %v2269_v50 = vld [vmem:[%s8234_s4 + $0x4a0] sm:$0xff]  ;;  %p699_p6 = scmp.lt.s32.totalorder %s698_s23, 19 }
 0x390   : > { %4914 = vmatprep.subr.bf16.mxu1 %v4913_v42  ;;  %v2271_v42 = vld [vmem:[%s8234_s4 + $0x4b0] sm:$0xff] }
 0x391   : > { %v4947_v32 = vpack.c.bf16 %v2271_v42, %v2269_v50  ;;  %v2732_v50 = vld [vmem:[%s8202_s7 + $0x70] sm:$0xff]  ;;  %v2733_v42 = vld [vmem:[%s8202_s7 + $0x78] sm:$0xff]  ;;  %s8243_s23 = smov (!%p699_p6, %s698_s23), 19 }
 0x392   : > { %v4987_v20 = vpack.c.bf16 %v2733_v42, %v2732_v50  ;;  %s3914_s26 = sshll.u32 %s8243_s23, 4  ;;  %v2864_v42 = vld [vmem:[%s8203_s8 + $0xc0] sm:$0xff] }
 0x393   : > { %4916 = vmatpush1.bf16.msra.mxu1 %v4915_v38  ;;  %v2273_v38 = vld [vmem:[%s8234_s4 + $0x4c0] sm:$0xff]  ;;  %s7521_s29 = scalar_lea.vmem %s8214_s19, %s3914_s26  ;;  %s8069_s26 = scalar_lea.vmem %s8216_s21, %s5450_s27 }
 0x394   : > { %4918 = vmatprep.subr.bf16.mxu1 %v4917_v44  ;;  %v2275_v44 = vld [vmem:[%s8234_s4 + $0x4d0] sm:$0xff] }
 0x395   : > { %v4951_v18 = vpack.c.bf16 %v2275_v44, %v2273_v38  ;;  %v2281_v38 = vld [vmem:[%s8201_s6] sm:$0x3] }
 0x396   : > { %v7511_v44 = vrot.slane %v2281_v38, %v912_v40  ;;  %v7515_v46 = vrot.slane %v2281_v38, %v916_v45 }
 0x397   : > { %4920 = vmatpush1.bf16.msra.mxu1 %v4919_v2  ;;  %v2277_v2 = vld [vmem:[%s8234_s4 + $0x4e0] sm:$0xff] }
 0x398   : > { %4922 = vmatprep.subr.bf16.mxu1 %v4921_v43  ;;  %v2279_v43 = vld [vmem:[%s8234_s4 + $0x4f0] sm:$0xff] }
 0x399   : > { %v4955_v7 = vpack.c.bf16 %v2279_v43, %v2277_v2 }
 0x39b   : > { %4924 = vmatpush1.bf16.msra.mxu1 %v4923_v13  ;;  %v2718_v13 = vld [vmem:[%s8202_s7] sm:$0xff] }
 0x39c   : > { %4926 = vmatprep.subr.bf16.mxu1 %v4925_v27  ;;  %v2719_v27 = vld [vmem:[%s8202_s7 + $0x8] sm:$0xff] }
 0x39d   : > { %v4959_v3 = vpack.c.bf16 %v2719_v27, %v2718_v13  ;;  %v2841_v13 = vld [vmem:[%s8203_s8 + $0x8] sm:$0xff] }
 0x39e   : > { %2483 = vmatmul.mubr.f32.vlgmr.msra.gmra.mrb[56].mxu1 %v7029_v21  ;;  %v2264_v21 = vld [vmem:[%s8234_s4 + $0x478] sm:$0xff] }
 0x39f   : > { %2488 = vmatprep.mubr.f32.mxu1 %v7066_v1  ;;  %4928 = vmatpush1.bf16.msra.mxu1 %v4927_v36  ;;  %v4937_v57 = vpack.c.bf16 %v2264_v21, %v2262_v5  ;;  %v2720_v36 = vld [vmem:[%s8202_s7 + $0x10] sm:$0xff] }
 0x3a0   : > { %4930 = vmatprep.subr.bf16.mxu1 %v4929_v53  ;;  %v2721_v53 = vld [vmem:[%s8202_s7 + $0x18] sm:$0xff]  ;;  %v2724_v21 = vld [vmem:[%s8202_s7 + $0x30] sm:$0xff] }
 0x3a1   : > { %v4963_v55 = vpack.c.bf16 %v2721_v53, %v2720_v36 }
 0x3a2   : > { %2489 = vmatmul.mubr.f32.gmra.mrb[58].mxu1 %v7047_v30  ;;  %v2268_v30 = vld [vmem:[%s8234_s4 + $0x498] sm:$0xff] }
 0x3a3   : > { %2494 = vmatprep.mubr.f32.mxu1 %v7085_v49  ;;  %4932 = vmatpush1.bf16.msra.mxu1 %v4931_v35  ;;  %v4941_v17 = vpack.c.bf16 %v2268_v30, %v2266_v48  ;;  %v2722_v35 = vld [vmem:[%s8202_s7 + $0x20] sm:$0xff]  ;;  %v2727_v30 = vld [vmem:[%s8202_s7 + $0x48] sm:$0xff] }
 0x3a4   : > { %4934 = vmatprep.subr.bf16.mxu1 %v4933_v60  ;;  %v2723_v60 = vld [vmem:[%s8202_s7 + $0x28] sm:$0xff]  ;;  %v2726_v48 = vld [vmem:[%s8202_s7 + $0x40] sm:$0xff] }
 0x3a5   : > { %v4967_v4 = vpack.c.bf16 %v2723_v60, %v2722_v35  ;;  %v2842_v60 = vld [vmem:[%s8203_s8 + $0x10] sm:$0xff] }
 0x3a6   : > { %2495 = vmatmul.mubr.f32.gmra.mrb[60].mxu1 %v7066_v1 }
 0x3a7   : > { %2500 = vmatprep.mubr.f32.mxu1 %v7104_v41  ;;  %4936 = vmatpush1.bf16.msra.mxu1 %v4935_v62  ;;  %v2725_v62 = vld [vmem:[%s8202_s7 + $0x38] sm:$0xff] }
 0x3a8   : > { %4938 = vmatprep.subr.bf16.mxu1 %v4937_v57  ;;  %v2742_v57 = vld [vmem:[%s8202_s7 + $0xc0] sm:$0xff]  ;;  %v4971_v8 = vpack.c.bf16 %v2725_v62, %v2724_v21  ;;  %v2861_v21 = vld [vmem:[%s8203_s8 + $0xa8] sm:$0xff] }
 0x3aa   : > { %2501 = vmatmul.mubr.f32.gmra.mrb[62].mxu1 %v7085_v49 }
 0x3ab   : > { %2506 = vmatprep.mubr.f32.mxu1 %v7123_v16  ;;  %4940 = vmatpush1.bf16.msra.mxu1 %v4939_v15  ;;  %v2747_v15 = vld [vmem:[%s8202_s7 + $0xe8] sm:$0xff] }
 0x3ac   : > { %4942 = vmatprep.subr.bf16.mxu1 %v4941_v17 }
 0x3ae   : > { %2507 = vmatmul.mubr.f32.gmra.mrb[64].mxu1 %v7104_v41 }
 0x3af   : > { %2512 = vmatprep.mubr.f32.mxu1 %v7142_v10  ;;  %4944 = vmatpush1.bf16.msra.mxu1 %v4943_v37  ;;  %v2749_v37 = vld [vmem:[%s8202_s7 + $0xf8] sm:$0xff] }
 0x3b0   : > { %4946 = vmatprep.subr.bf16.mxu1 %v4945_v6  ;;  %v4985_v6 = vpack.c.bf16 %v2749_v37, %v2748_v63  ;;  %v2846_v63 = vld [vmem:[%s8203_s8 + $0x30] sm:$0xff]  ;;  %v2847_v37 = vld [vmem:[%s8203_s8 + $0x38] sm:$0xff] }
 0x3b1   : > { %v5003_v38 = vpack.c.bf16 %v2847_v37, %v2846_v63 }
 0x3b2   : > { %2513 = vmatmul.mubr.f32.gmra.mrb[66].mxu1 %v7123_v16 }
 0x3b3   : > { %2518 = vmatprep.mubr.f32.mxu1 %v7161_v59  ;;  %4948 = vmatpush1.bf16.msra.mxu1 %v4947_v32  ;;  %v2857_v32 = vld [vmem:[%s8203_s8 + $0x88] sm:$0xff] }
 0x3b4   : > { %4950 = vmatprep.subr.bf16.mxu1 %v4949_v25  ;;  %v4989_v25 = vpack.c.bf16 %v2857_v32, %v2856_v26 }
 0x3b6   : > { %2519 = vmatmul.mubr.f32.gmra.mrb[68].mxu1 %v7142_v10 }
 0x3b7   : > { %2524 = vmatprep.mubr.f32.mxu1 %v7180_v61  ;;  %4952 = vmatpush1.bf16.msra.mxu1 %v4951_v18 }
 0x3b8   : > { %4954 = vmatprep.subr.bf16.mxu1 %v4953_v9 }
 0x3ba   : > { %2525 = vmatmul.mubr.f32.gmra.mrb[70].mxu1 %v7161_v59 }
 0x3bb   : > { %2530 = vmatprep.mubr.f32.mxu1 %v7199_v31  ;;  %4956 = vmatpush1.bf16.msra.mxu1 %v4955_v7 }
 0x3bc   : > { %4958 = vmatprep.subr.bf16.mxu1 %v4957_v12  ;;  %v2840_v12 = vld [vmem:[%s8203_s8] sm:$0xff] }
 0x3be   : > { %2531 = vmatmul.mubr.f32.gmra.mrb[72].mxu1 %v7180_v61 }
 0x3bf   : > { %2536 = vmatprep.mubr.f32.mxu1 %v7217_v14 }
 0x3c2   : > { %2537 = vmatmul.mubr.f32.gmra.mrb[74].mxu1 %v7199_v31 }
 0x3c3   : > { %2607 = vmatprep.mubr.f32.mxu1 %v5470_v28 }
 0x3c6   : > { %2608 = vmatmul.mubr.f32.vlgmr.msra.gmra.mrb[56].mxu1 %v7066_v1  ;;  %v2741_v1 = vld [vmem:[%s8202_s7 + $0xb8] sm:$0xff] }
 0x3c7   : > { %2613 = vmatprep.mubr.f32.mxu1 %v5470_v28  ;;  %4960 = vmatpush3.bf16.msra.mxu1 %v4959_v3  ;;  %v4969_v5 = vpack.c.bf16 %v2741_v1, %v2740_v0  ;;  %v2859_v3 = vld [vmem:[%s8203_s8 + $0x98] sm:$0xff] }
 0x3c8   : > { %4962 = vmatprep.subr.bf16.mxu1 %v4961_v22  ;;  %v4993_v35 = vpack.c.bf16 %v2859_v3, %v2858_v29  ;;  %v2843_v0 = vld [vmem:[%s8203_s8 + $0x18] sm:$0xff]  ;;  %v2850_v3 = vld [vmem:[%s8203_s8 + $0x50] sm:$0xff] }
 0x3ca   : > { %2614 = vmatmul.mubr.f32.gmra.mrb[58].mxu1 %v7085_v49  ;;  %v2743_v49 = vld [vmem:[%s8202_s7 + $0xc8] sm:$0xff] }
 0x3cb   : > { %2619 = vmatprep.mubr.f32.mxu1 %v5470_v28  ;;  %4964 = vmatpush3.bf16.msra.mxu1 %v4963_v55  ;;  %v4973_v11 = vpack.c.bf16 %v2743_v49, %v2742_v57  ;;  %v4991_v55 = vpack.c.bf16 %v2841_v13, %v2840_v12 }
 0x3cc   : > { %4966 = vmatprep.subr.bf16.mxu1 %v4965_v58 }
 0x3ce   : > { %2620 = vmatmul.mubr.f32.gmra.mrb[60].mxu1 %v7104_v41  ;;  %v4975_v41 = vpack.c.bf16 %v2727_v30, %v2726_v48  ;;  %v2844_v30 = vld [vmem:[%s8203_s8 + $0x20] sm:$0xff] }
 0x3cf   : > { %2625 = vmatprep.mubr.f32.mxu1 %v5470_v28  ;;  %4968 = vmatpush3.bf16.msra.mxu1 %v4967_v4 }
 0x3d0   : > { %4970 = vmatprep.subr.bf16.mxu1 %v4969_v5  ;;  %v2860_v5 = vld [vmem:[%s8203_s8 + $0xa0] sm:$0xff] }
 0x3d1   : > { %v4997_v48 = vpack.c.bf16 %v2861_v21, %v2860_v5  ;;  %v2852_v21 = vld [vmem:[%s8203_s8 + $0x60] sm:$0xff] }
 0x3d2   : > { %2626 = vmatmul.mubr.f32.gmra.mrb[62].mxu1 %v7123_v16  ;;  %v2744_v16 = vld [vmem:[%s8202_s7 + $0xd0] sm:$0xff] }
 0x3d3   : > { %2631 = vmatprep.mubr.f32.mxu1 %v5470_v28  ;;  %4972 = vmatpush3.bf16.msra.mxu1 %v4971_v8  ;;  %v4995_v8 = vpack.c.bf16 %v2843_v0, %v2842_v60 }
 0x3d4   : > { %4974 = vmatprep.subr.bf16.mxu1 %v4973_v11 }
 0x3d6   : > { %2632 = vmatmul.mubr.f32.gmra.mrb[64].mxu1 %v7142_v10  ;;  %v2745_v10 = vld [vmem:[%s8202_s7 + $0xd8] sm:$0xff] }
 0x3d7   : > { %2637 = vmatprep.mubr.f32.mxu1 %v5470_v28  ;;  %4976 = vmatpush3.bf16.msra.mxu1 %v4975_v41  ;;  %v2845_v41 = vld [vmem:[%s8203_s8 + $0x28] sm:$0xff] }
 0x3d8   : > { %v4999_v19 = vpack.c.bf16 %v2845_v41, %v2844_v30 }
 0x3da   : > { %2638 = vmatmul.mubr.f32.gmra.mrb[66].mxu1 %v7161_v59  ;;  %v4977_v59 = vpack.c.bf16 %v2745_v10, %v2744_v16 }
 0x3db   : > { %2643 = vmatprep.mubr.f32.mxu1 %v5470_v28 }
 0x3dc   : > { %4978 = vmatprep.subr.bf16.mxu1 %v4977_v59  ;;  %v2862_v59 = vld [vmem:[%s8203_s8 + $0xb0] sm:$0xff] }
 0x3de   : > { %2644 = vmatmul.mubr.f32.gmra.mrb[68].mxu1 %v7180_v61  ;;  %v2728_v61 = vld [vmem:[%s8202_s7 + $0x50] sm:$0xff] }
 0x3df   : > { %2649 = vmatprep.mubr.f32.mxu1 %v5470_v28 }
 0x3e2   : > { %2650 = vmatmul.mubr.f32.gmra.mrb[70].mxu1 %v7199_v31  ;;  %v2729_v31 = vld [vmem:[%s8202_s7 + $0x58] sm:$0xff] }
 0x3e3   : > { %2655 = vmatprep.mubr.f32.mxu1 %v5470_v28 }
 0x3e6   : > { %2656 = vmatmul.mubr.f32.gmra.mrb[72].mxu1 %v7217_v14  ;;  %v4979_v14 = vpack.c.bf16 %v2729_v31, %v2728_v61  ;;  %v2863_v61 = vld [vmem:[%s8203_s8 + $0xb8] sm:$0xff] }
 0x3e7   : > { %2661 = vmatprep.mubr.f32.mxu1 %v5470_v28 }
 0x3e8   : > { %4980 = vmatpush3.bf16.msra.mxu1 %v4979_v14 }
 0x3ea   : > { %2662 = vmatmul.mubr.f32.gmra.mrb[74].mxu1 %v7234_v34  ;;  %v2746_v34 = vld [vmem:[%s8202_s7 + $0xe0] sm:$0xff] }
 0x3eb   : > { %v4981_v17 = vpack.c.bf16 %v2747_v15, %v2746_v34 }
 0x3ed   : > { %4982 = vmatprep.subr.bf16.mxu1 %v4981_v17 }
 0x3ee   : > { %4984 = vmatpush3.bf16.msra.mxu1 %v4983_v24  ;;  %v5001_v24 = vpack.c.bf16 %v2863_v61, %v2862_v59 }
 0x3ef   : > { %4986 = vmatprep.subr.bf16.mxu1 %v4985_v6 }
 0x3f2   : > { %4988 = vmatpush3.bf16.msra.mxu1 %v4987_v20  ;;  %v2865_v20 = vld [vmem:[%s8203_s8 + $0xc8] sm:$0xff] }
 0x3f3   : > { %4990 = vmatprep.subr.bf16.mxu1 %v4989_v25 }
 0x499   : > { %v2609_v47 = vpop.f32.mrb[56].mxu1 }
 0x49a   : > { %v5269_v18 = vadd.f32 %v2609_v47, %v7511_v44  ;;  %v2611_v9 = vpop.f32.mrb[57].mxu1 }
 0x49b   : > { %v5270_v2 = vadd.f32 %v2611_v9, %v7515_v46  ;;  %v2848_v9 = vld [vmem:[%s8203_s8 + $0x40] sm:$0xff] }
 0x49c   : > { %v2668_v40 = vmax.f32 %v5269_v18, 0.0  ;;  %v5005_v18 = vpack.c.bf16 %v2865_v20, %v2864_v42 }
 0x49d   : > { %v2669_v43 = vmax.f32 %v5270_v2, 0.0  ;;  %v2615_v39 = vpop.f32.mrb[58].mxu1  ;;  %v2849_v2 = vld [vmem:[%s8203_s8 + $0x48] sm:$0xff] }
 0x49e   : > { %2688 = vst [vmem:[%s7521_s29] sm:$0xff] %v2668_v40  ;;  %v5271_v45 = vadd.f32 %v2615_v39, %v7511_v44  ;;  %v2617_v51 = vpop.f32.mrb[59].mxu1  ;;  %v2866_v39 = vld [vmem:[%s8203_s8 + $0xd0] sm:$0xff] }
 0x49f   : > { %2689 = vst [vmem:[%s7521_s29 + $0x8] sm:$0xff] %v2669_v43  ;;  %v5272_v52 = vadd.f32 %v2617_v51, %v7515_v46 }
 0x4a0   : > { %v2670_v7 = vmax.f32 %v5271_v45, 0.0  ;;  %v2867_v45 = vld [vmem:[%s8203_s8 + $0xd8] sm:$0xff] }
 0x4a1   : > { %v2671_v27 = vmax.f32 %v5272_v52, 0.0  ;;  %v2621_v33 = vpop.f32.mrb[60].mxu1  ;;  %v5009_v29 = vpack.c.bf16 %v2867_v45, %v2866_v39  ;;  %v2983_v45 = vld [vmem:[%s8204_s9 + $0x50] sm:$0xff] }
 0x4a2   : > { %2690 = vst [vmem:[%s7521_s29 + $0x10] sm:$0xff] %v2670_v7  ;;  %v7541_v22 = vmax.f32 %v2668_v40, %v2670_v7  ;;  %v5273_v36 = vadd.f32 %v2621_v33, %v7511_v44  ;;  %v2623_v53 = vpop.f32.mrb[61].mxu1 }
 0x4a3   : > { %2691 = vst [vmem:[%s7521_s29 + $0x18] sm:$0xff] %v2671_v27  ;;  %v7545_v54 = vmax.f32 %v2669_v43, %v2671_v27  ;;  %v5274_v56 = vadd.f32 %v2623_v53, %v7515_v46  ;;  %v5007_v27 = vpack.c.bf16 %v2849_v2, %v2848_v9  ;;  %v2980_v9 = vld [vmem:[%s8204_s9 + $0x38] sm:$0xff] }
 0x4a4   : > { %v2672_v58 = vmax.f32 %v5273_v36, 0.0  ;;  %v2851_v36 = vld [vmem:[%s8203_s8 + $0x58] sm:$0xff] }
 0x4a5   : > { %v2673_v1 = vmax.f32 %v5274_v56, 0.0  ;;  %v2627_v4 = vpop.f32.mrb[62].mxu1  ;;  %2814 = vmatprep.mubr.f32.mxu1 %v7545_v54 }
 0x4a6   : > { %2692 = vst [vmem:[%s7521_s29 + $0x20] sm:$0xff] %v2672_v58  ;;  %v5275_v62 = vadd.f32 %v2627_v4, %v7511_v44  ;;  %v2629_v57 = vpop.f32.mrb[63].mxu1  ;;  %2815 = vmatmul.mubr.f32.vlgmr.msra.gmra.mrb[76].mxu1 %v7541_v22 }
 0x4a7   : > { %2693 = vst [vmem:[%s7521_s29 + $0x28] sm:$0xff] %v2673_v1  ;;  %v5276_v49 = vadd.f32 %v2629_v57, %v7515_v46  ;;  %4992 = vmatpush3.bf16.msra.mxu1 %v4991_v55  ;;  %v2868_v55 = vld [vmem:[%s8203_s8 + $0xe0] sm:$0xff] }
 0x4a8   : > { %v2674_v11 = vmax.f32 %v5275_v62, 0.0  ;;  %4994 = vmatprep.subr.bf16.mxu1 %v4993_v35  ;;  %v2853_v62 = vld [vmem:[%s8203_s8 + $0x68] sm:$0xff] }
 0x4a9   : > { %v2675_v16 = vmax.f32 %v5276_v49, 0.0  ;;  %v2633_v10 = vpop.f32.mrb[64].mxu1  ;;  %v5015_v59 = vpack.c.bf16 %v2853_v62, %v2852_v21 }
 0x4aa   : > { %2694 = vst [vmem:[%s7521_s29 + $0x30] sm:$0xff] %v2674_v11  ;;  %v7579_v31 = vmax.f32 %v2672_v58, %v2674_v11  ;;  %v5277_v14 = vadd.f32 %v2633_v10, %v7511_v44  ;;  %v2635_v34 = vpop.f32.mrb[65].mxu1  ;;  %v2869_v58 = vld [vmem:[%s8203_s8 + $0xe8] sm:$0xff]  ;;  %v2871_v11 = vld [vmem:[%s8203_s8 + $0xf8] sm:$0xff] }
 0x4ab   : > { %2695 = vst [vmem:[%s7521_s29 + $0x38] sm:$0xff] %v2675_v16  ;;  %v7583_v15 = vmax.f32 %v2673_v1, %v2675_v16  ;;  %v5278_v17 = vadd.f32 %v2635_v34, %v7515_v46  ;;  %4996 = vmatpush3.bf16.msra.mxu1 %v4995_v8  ;;  %v5011_v1 = vpack.c.bf16 %v2851_v36, %v2850_v3  ;;  %v2870_v8 = vld [vmem:[%s8203_s8 + $0xf0] sm:$0xff] }
 0x4ac   : > { %v2676_v23 = vmax.f32 %v5277_v14, 0.0  ;;  %4998 = vmatprep.subr.bf16.mxu1 %v4997_v48  ;;  %v5013_v5 = vpack.c.bf16 %v2869_v58, %v2868_v55  ;;  %v5017_v14 = vpack.c.bf16 %v2871_v11, %v2870_v8  ;;  %v2854_v34 = vld [vmem:[%s8203_s8 + $0x70] sm:$0xff]  ;;  %v3066_v8 = vld [vmem:[%s8204_s9 + $0x80] sm:$0xff]  ;;  %v3067_v11 = vld [vmem:[%s8204_s9 + $0x88] sm:$0xff] }
 0x4ad   : > { %v2677_v6 = vmax.f32 %v5278_v17, 0.0  ;;  %v2639_v50 = vpop.f32.mrb[66].mxu1  ;;  %2819 = vmatprep.mubr.f32.mxu1 %v7583_v15  ;;  %v2855_v17 = vld [vmem:[%s8203_s8 + $0x78] sm:$0xff] }
 0x4ae   : > { %2696 = vst [vmem:[%s7521_s29 + $0x40] sm:$0xff] %v2676_v23  ;;  %v5279_v26 = vadd.f32 %v2639_v50, %v7511_v44  ;;  %v2641_v32 = vpop.f32.mrb[67].mxu1  ;;  %2820 = vmatmul.mubr.f32.gmra.mrb[78].mxu1 %v7579_v31 }
 0x4af   : > { %2697 = vst [vmem:[%s7521_s29 + $0x48] sm:$0xff] %v2677_v6  ;;  %v5280_v25 = vadd.f32 %v2641_v32, %v7515_v46  ;;  %5000 = vmatpush3.bf16.msra.mxu1 %v4999_v19 }
 0x4b0   : > { %v2678_v47 = vmax.f32 %v5279_v26, 0.0  ;;  %5002 = vmatprep.subr.bf16.mxu1 %v5001_v24 }
 0x4b1   : > { %v2679_v40 = vmax.f32 %v5280_v25, 0.0  ;;  %v2645_v43 = vpop.f32.mrb[68].mxu1  ;;  %v2977_v25 = vld [vmem:[%s8204_s9 + $0x20] sm:$0xff] }
 0x4b2   : > { %2698 = vst [vmem:[%s7521_s29 + $0x50] sm:$0xff] %v2678_v47  ;;  %v7617_v51 = vmax.f32 %v2676_v23, %v2678_v47  ;;  %v5281_v52 = vadd.f32 %v2645_v43, %v7511_v44  ;;  %v2647_v7 = vpop.f32.mrb[69].mxu1  ;;  %v2982_v43 = vld [vmem:[%s8204_s9 + $0x48] sm:$0xff] }
 0x4b3   : > { %2699 = vst [vmem:[%s7521_s29 + $0x58] sm:$0xff] %v2679_v40  ;;  %v7621_v12 = vmax.f32 %v2677_v6, %v2679_v40  ;;  %v5282_v13 = vadd.f32 %v2647_v7, %v7515_v46  ;;  %5004 = vmatpush3.bf16.msra.mxu1 %v5003_v38  ;;  %v5019_v6 = vpack.c.bf16 %v2855_v17, %v2854_v34  ;;  %v2978_v38 = vld [vmem:[%s8204_s9 + $0x28] sm:$0xff]  ;;  %v2981_v40 = vld [vmem:[%s8204_s9 + $0x40] sm:$0xff] }
 0x4b4   : > { %v2680_v33 = vmax.f32 %v5281_v52, 0.0  ;;  %5006 = vmatprep.subr.bf16.mxu1 %v5005_v18  ;;  %v5028_v47 = vpack.c.bf16 %v2978_v38, %v2977_v25  ;;  %v2979_v18 = vld [vmem:[%s8204_s9 + $0x30] sm:$0xff]  ;;  %v5034_v39 = vpack.c.bf16 %v2982_v43, %v2981_v40  ;;  %v2985_v7 = vld [vmem:[%s8204_s9 + $0x60] sm:$0xff]  ;;  %v3422_v43 = vld [vmem:[%s8206_s11 + $0x38] sm:$0xff] }
 0x4b5   : > { %v2681_v53 = vmax.f32 %v5282_v13, 0.0  ;;  %v2651_v56 = vpop.f32.mrb[70].mxu1  ;;  %2824 = vmatprep.mubr.f32.mxu1 %v7621_v12  ;;  %v5031_v2 = vpack.c.bf16 %v2980_v9, %v2979_v18  ;;  %v3415_v17 = vld [vmem:[%s8206_s11] sm:$0xff]  ;;  %v3072_v38 = vld [vmem:[%s8204_s9 + $0xb0] sm:$0xff] }
 0x4b6   : > { %2700 = vst [vmem:[%s7521_s29 + $0x60] sm:$0xff] %v2680_v33  ;;  %v5283_v35 = vadd.f32 %v2651_v56, %v7511_v44  ;;  %v2653_v60 = vpop.f32.mrb[71].mxu1  ;;  %2825 = vmatmul.mubr.f32.gmra.mrb[80].mxu1 %v7617_v51  ;;  %v3421_v40 = vld [vmem:[%s8206_s11 + $0x30] sm:$0xff] }
 0x4b7   : > { %2701 = vst [vmem:[%s7521_s29 + $0x68] sm:$0xff] %v2681_v53  ;;  %v5284_v0 = vadd.f32 %v2653_v60, %v7515_v46  ;;  %5008 = vmatpush3.bf16.msra.mxu1 %v5007_v27  ;;  %v2987_v27 = vld [vmem:[%s8204_s9 + $0x70] sm:$0xff] }
 0x4b8   : > { %v2682_v4 = vmax.f32 %v5283_v35, 0.0  ;;  %5010 = vmatprep.subr.bf16.mxu1 %v5009_v29 }
 0x4b9   : > { %v2683_v57 = vmax.f32 %v5284_v0, 0.0  ;;  %v2657_v49 = vpop.f32.mrb[72].mxu1 }
 0x4ba   : > { %2702 = vst [vmem:[%s7521_s29 + $0x70] sm:$0xff] %v2682_v4  ;;  %v2714_v48 = vmax.f32 %v2680_v33, %v2682_v4  ;;  %v5285_v30 = vadd.f32 %v2657_v49, %v7511_v44  ;;  %v2659_v41 = vpop.f32.mrb[73].mxu1  ;;  %v2988_v33 = vld [vmem:[%s8204_s9 + $0x78] sm:$0xff] }
 0x4bb   : > { %2703 = vst [vmem:[%s7521_s29 + $0x78] sm:$0xff] %v2683_v57  ;;  %v2715_v16 = vmax.f32 %v2681_v53, %v2683_v57  ;;  %v5286_v10 = vadd.f32 %v2659_v41, %v7515_v46  ;;  %5012 = vmatpush3.bf16.msra.mxu1 %v5011_v1  ;;  %v5043_v29 = vpack.c.bf16 %v2988_v33, %v2987_v27  ;;  %v3423_v33 = vld [vmem:[%s8206_s11 + $0x40] sm:$0xff] }
 0x4bc   : > { %v2684_v61 = vmax.f32 %v5285_v30, 0.0  ;;  %5014 = vmatprep.subr.bf16.mxu1 %v5013_v5  ;;  %v5046_v41 = vpack.c.bf16 %v3067_v11, %v3066_v8  ;;  %v3429_v11 = vld [vmem:[%s8206_s11 + $0x70] sm:$0xff] }
 0x4bd   : > { %v2685_v19 = vmax.f32 %v5286_v10, 0.0  ;;  %v2663_v23 = vpop.f32.mrb[74].mxu1  ;;  %2829 = vmatprep.mubr.f32.mxu1 %v2715_v16 }
 0x4be   : > { %2704 = vst [vmem:[%s7521_s29 + $0x80] sm:$0xff] %v2684_v61  ;;  %v5287_v24 = vadd.f32 %v2663_v23, %v7511_v44  ;;  %v2665_v63 = vpop.f32.mrb[75].mxu1  ;;  %2830 = vmatmul.mubr.f32.gmra.mrb[82].mxu1 %v2714_v48  ;;  %v2973_v44 = vld [vmem:[%s8204_s9] sm:$0xff]  ;;  %v3417_v23 = vld [vmem:[%s8206_s11 + $0x10] sm:$0xff] }
 0x4bf   : > { %2705 = vst [vmem:[%s7521_s29 + $0x88] sm:$0xff] %v2685_v19  ;;  %v5288_v37 = vadd.f32 %v2665_v63, %v7515_v46  ;;  %5016 = vmatpush3.bf16.msra.mxu1 %v5015_v59  ;;  %v2974_v46 = vld [vmem:[%s8204_s9 + $0x8] sm:$0xff]  ;;  %v3068_v59 = vld [vmem:[%s8204_s9 + $0x90] sm:$0xff] }
 0x4c0   : > { %v2686_v50 = vmax.f32 %v5287_v24, 0.0  ;;  %5018 = vmatprep.subr.bf16.mxu1 %v5017_v14 }
 0x4c1   : > { %v2687_v42 = vmax.f32 %v5288_v37, 0.0  ;;  %v3418_v37 = vld [vmem:[%s8206_s11 + $0x18] sm:$0xff] }
 0x4c2   : > { %2706 = vst [vmem:[%s7521_s29 + $0x90] sm:$0xff] %v2686_v50  ;;  %v2716_v20 = vmax.f32 %v2684_v61, %v2686_v50  ;;  %v3069_v61 = vld [vmem:[%s8204_s9 + $0x98] sm:$0xff] }
 0x4c3   : > { %2707 = vst [vmem:[%s7521_s29 + $0x98] sm:$0xff] %v2687_v42  ;;  %v2717_v26 = vmax.f32 %v2685_v19, %v2687_v42  ;;  %5020 = vmatpush3.bf16.msra.mxu1 %v5019_v6  ;;  %s7750_s29 = scalar_lea.vmem %s8215_s20, %s3905_s28  ;;  %v3416_v19 = vld [vmem:[%s8206_s11 + $0x8] sm:$0xff]  ;;  %v5049_v24 = vpack.c.bf16 %v3069_v61, %v3068_v59  ;;  %v3070_v42 = vld [vmem:[%s8204_s9 + $0xa0] sm:$0xff]  ;;  %v3155_v61 = vld [vmem:[%s8204_s9 + $0x110] sm:$0xff] }
 0x4c4   : > { %v5142_v63 = vpack.c.bf16 %v3416_v19, %v3415_v17  ;;  %v3157_v17 = vld [vmem:[%s8204_s9 + $0x120] sm:$0xff]  ;;  %v3158_v19 = vld [vmem:[%s8204_s9 + $0x128] sm:$0xff] }
 0x4c5   : > { %2834 = vmatprep.mubr.f32.mxu1 %v2717_v26 }
 0x4c6   : > { %2835 = vmatmul.mubr.f32.gmra.mrb[84].mxu1 %v2716_v20 }
 0x4c7   : > { %2936 = vmatprep.mubr.f32.mxu1 %v7545_v54  ;;  %v5471_v54 = vmov 0.0|0.0  }
 0x4c8   : > { %5021 = vmatprep.subr.bf16.mxu1 %v5471_v54  ;;  %5141 = vmatprep.subr.bf16.mxu0 %v5471_v54 }
 0x4c9   : > { %5143 = vmatpush3.bf16.msra.mxu0 %v5142_v63  ;;  %v3160_v63 = vld [vmem:[%s8204_s9 + $0x138] sm:$0xff] }
 0x4ca   : > { %2937 = vmatmul.mubr.f32.vlgmr.msra.gmra.mrb[86].mxu1 %v7541_v22  ;;  %v5022_v22 = vpack.c.bf16 %v2974_v46, %v2973_v44  ;;  %v5145_v44 = vpack.c.bf16 %v3418_v37, %v3417_v23  ;;  %5144 = vmatprep.subr.bf16.mxu0 %v5471_v54  ;;  %v5076_v23 = vpack.c.bf16 %v3158_v19, %v3157_v17  ;;  %v3340_v17 = vld [vmem:[%s8204_s9 + $0x268] sm:$0xff] }
 0x4cb   : > { %2941 = vmatprep.mubr.f32.mxu1 %v7583_v15  ;;  %v2976_v15 = vld [vmem:[%s8204_s9 + $0x18] sm:$0xff] }
 0x4cc   : > { %5023 = vmatpush3.bf16.msra.mxu1 %v5022_v22  ;;  %v3419_v22 = vld [vmem:[%s8206_s11 + $0x20] sm:$0xff] }
 0x4cd   : > { %5024 = vmatprep.subr.bf16.mxu1 %v5471_v54  ;;  %5146 = vmatpush3.bf16.msra.mxu0 %v5145_v44 }
 0x4ce   : > { %2942 = vmatmul.mubr.f32.gmra.mrb[88].mxu1 %v7579_v31  ;;  %v2975_v31 = vld [vmem:[%s8204_s9 + $0x10] sm:$0xff]  ;;  %5147 = vmatprep.subr.bf16.mxu0 %v5471_v54 }
 0x4cf   : > { %2946 = vmatprep.mubr.f32.mxu1 %v7621_v12  ;;  %v5025_v32 = vpack.c.bf16 %v2976_v15, %v2975_v31  ;;  %v2986_v12 = vld [vmem:[%s8204_s9 + $0x68] sm:$0xff] }
 0x4d0   : > { %v5040_v13 = vpack.c.bf16 %v2986_v12, %v2985_v7  ;;  %v3420_v31 = vld [vmem:[%s8206_s11 + $0x28] sm:$0xff] }
 0x4d1   : > { %5026 = vmatpush3.bf16.msra.mxu1 %v5025_v32  ;;  %v5148_v9 = vpack.c.bf16 %v3420_v31, %v3419_v22  ;;  %v3075_v7 = vld [vmem:[%s8204_s9 + $0xc8] sm:$0xff] }
 0x4d2   : > { %2947 = vmatmul.mubr.f32.gmra.mrb[90].mxu1 %v7617_v51  ;;  %5027 = vmatprep.subr.bf16.mxu1 %v5471_v54  ;;  %v2984_v51 = vld [vmem:[%s8204_s9 + $0x58] sm:$0xff]  ;;  %v3166_v22 = vld [vmem:[%s8204_s9 + $0x168] sm:$0xff] }
 0x4d3   : > { %2951 = vmatprep.mubr.f32.mxu1 %v2715_v16  ;;  %v5037_v52 = vpack.c.bf16 %v2984_v51, %v2983_v45  ;;  %5149 = vmatpush3.bf16.msra.mxu0 %v5148_v9 }
 0x4d4   : > { %5150 = vmatprep.subr.bf16.mxu0 %v5471_v54 }
 0x4d5   : > { %5029 = vmatpush3.bf16.msra.mxu1 %v5028_v47  ;;  %v3073_v47 = vld [vmem:[%s8204_s9 + $0xb8] sm:$0xff] }
 0x4d6   : > { %2952 = vmatmul.mubr.f32.gmra.mrb[92].mxu1 %v2714_v48  ;;  %5030 = vmatprep.subr.bf16.mxu1 %v5471_v54 }
 0x4d7   : > { %2956 = vmatprep.mubr.f32.mxu1 %v2717_v26 }
 0x4d9   : > { %5032 = vmatpush3.bf16.msra.mxu1 %v5031_v2 }
 0x4da   : > { %2957 = vmatmul.mubr.f32.gmra.mrb[94].mxu1 %v2716_v20  ;;  %5033 = vmatprep.subr.bf16.mxu1 %v5471_v54  ;;  %v3071_v20 = vld [vmem:[%s8204_s9 + $0xa8] sm:$0xff] }
 0x4db   : > { %4325 = vmatprep.mubr.msk.f32.mxu1 %vm5472_vm0, %v5470_v28  ;;  %v5052_v15 = vpack.c.bf16 %v3071_v20, %v3070_v42  ;;  %v3163_v20 = vld [vmem:[%s8204_s9 + $0x150] sm:$0xff] }
 0x4dd   : > { %5035 = vmatpush3.bf16.msra.mxu1 %v5034_v39  ;;  %v5055_v39 = vpack.c.bf16 %v3073_v47, %v3072_v38  ;;  %v3240_v47 = vld [vmem:[%s8204_s9 + $0x180] sm:$0xff] }
 0x4de   : > { %5036 = vmatprep.subr.bf16.mxu1 %v5471_v54 }
 0x4e1   : > { %5038 = vmatpush3.bf16.msra.mxu1 %v5037_v52  ;;  %v3074_v52 = vld [vmem:[%s8204_s9 + $0xc0] sm:$0xff] }
 0x4e2   : > { %5039 = vmatprep.subr.bf16.mxu1 %v5471_v54 }
 0x4e5   : > { %5041 = vmatpush3.bf16.msra.mxu1 %v5040_v13  ;;  %v5151_v13 = vpack.c.bf16 %v3422_v43, %v3421_v40  ;;  %v3243_v40 = vld [vmem:[%s8204_s9 + $0x198] sm:$0xff] }
 0x4e6   : > { %5042 = vmatprep.subr.bf16.mxu1 %v5471_v54 }
 0x4e7   : > { %5152 = vmatpush3.bf16.msra.mxu0 %v5151_v13  ;;  %v3248_v13 = vld [vmem:[%s8204_s9 + $0x1c0] sm:$0xff] }
 0x4e8   : > { %5153 = vmatprep.subr.bf16.mxu0 %v5471_v54 }
 0x4e9   : > { %5044 = vmatpush3.bf16.msra.mxu1 %v5043_v29  ;;  %v3424_v29 = vld [vmem:[%s8206_s11 + $0x48] sm:$0xff] }
 0x4ea   : > { %5045 = vmatprep.subr.bf16.mxu1 %v5471_v54 }
 0x579   : > { %v4095_v3 = vpop.f32.mrb[76].mxu1 }
 0x57a   : > { %v4096_v36 = vpop.f32.mrb[77].mxu1 }
 0x57b   : > { %v4097_v53 = vadd.f32 %v4096_v36, %v4095_v3  ;;  %v5058_v3 = vpack.c.bf16 %v3075_v7, %v3074_v52  ;;  %v3247_v7 = vld [vmem:[%s8204_s9 + $0x1b8] sm:$0xff] }
 0x581   : > { %v4098_v56 = vpop.f32.mrb[78].mxu1 }
 0x582   : > { %v4099_v55 = vpop.f32.mrb[79].mxu1 }
 0x583   : > { %v4100_v58 = vadd.f32 %v4099_v55, %v4098_v56  ;;  %v3077_v56 = vld [vmem:[%s8204_s9 + $0xd8] sm:$0xff]  ;;  %v5154_v55 = vpack.c.bf16 %v3424_v29, %v3423_v33  ;;  %v3250_v29 = vld [vmem:[%s8204_s9 + $0x1d0] sm:$0xff] }
 0x585   : > { %5155 = vmatpush3.bf16.msra.mxu0 %v5154_v55  ;;  %v3253_v55 = vld [vmem:[%s8204_s9 + $0x1e8] sm:$0xff] }
 0x586   : > { %5156 = vmatprep.subr.bf16.mxu0 %v5471_v54 }
 0x589   : > { %v4101_v35 = vpop.f32.mrb[80].mxu1 }
 0x58a   : > { %v4102_v60 = vpop.f32.mrb[81].mxu1 }
 0x58b   : > { %v4103_v0 = vadd.f32 %v4102_v60, %v4101_v35  ;;  %v3426_v35 = vld [vmem:[%s8206_s11 + $0x58] sm:$0xff] }
 0x591   : > { %v4104_v1 = vpop.f32.mrb[82].mxu1 }
 0x592   : > { %v4105_v4 = vpop.f32.mrb[83].mxu1 }
 0x593   : > { %v4106_v5 = vadd.f32 %v4105_v4, %v4104_v1  ;;  %v3079_v1 = vld [vmem:[%s8204_s9 + $0xe8] sm:$0xff] }
 0x599   : > { %v4107_v21 = vpop.f32.mrb[84].mxu1 }
 0x59a   : > { %v4108_v62 = vpop.f32.mrb[85].mxu1 }
 0x59b   : > { %v7739_v57 = vadd.f32 %v4108_v62, %v4107_v21  ;;  %v3428_v21 = vld [vmem:[%s8206_s11 + $0x68] sm:$0xff] }
 0x59d   : > { %v4142_v49 = vpop.f32.mrb[86].mxu1 }
 0x59e   : > { %v4143_v48 = vpop.f32.mrb[87].mxu1 }
 0x59f   : > { %v4144_v30 = vadd.f32 %v4143_v48, %v4142_v49  ;;  %v3081_v49 = vld [vmem:[%s8204_s9 + $0xf8] sm:$0xff] }
 0x5a0   : > { %v3430_v48 = vld [vmem:[%s8206_s11 + $0x78] sm:$0xff] }
 0x5a1   : > { %v2962_v16 = vmax.f32 %v4097_v53, %v4144_v30  ;;  %v4145_v10 = vpop.f32.mrb[88].mxu1  ;;  %v3076_v53 = vld [vmem:[%s8204_s9 + $0xd0] sm:$0xff] }
 0x5a2   : > { %v4146_v14 = vpop.f32.mrb[89].mxu1  ;;  %v5061_v60 = vpack.c.bf16 %v3077_v56, %v3076_v53  ;;  %v3252_v56 = vld [vmem:[%s8204_s9 + $0x1e0] sm:$0xff] }
 0x5a3   : > { %2967 = vst [vmem:[%s7750_s29] sm:$0xff] %v2962_v16  ;;  %v4147_v34 = vadd.f32 %v4146_v14, %v4145_v10  ;;  %4326 = vmatmul.mubr.f32.vlgmr.msra.gmra.mrb[96].mxu1 %v2962_v16  ;;  %v3154_v16 = vld [vmem:[%s8204_s9 + $0x108] sm:$0xff]  ;;  %v5163_v10 = vpack.c.bf16 %v3430_v48, %v3429_v11  ;;  %v3156_v14 = vld [vmem:[%s8204_s9 + $0x118] sm:$0xff] }
 0x5a4   : > { %5047 = vmatpush3.bf16.msra.mxu1 %v5046_v41  ;;  %4360 = vmatprep.mubr.msk.f32.mxu1 %vm5472_vm0, %v5470_v28  ;;  %v3153_v41 = vld [vmem:[%s8204_s9 + $0x100] sm:$0xff]  ;;  %v3334_v48 = vld [vmem:[%s8204_s9 + $0x238] sm:$0xff] }
 0x5a5   : > { %v7773_v6 = vmax.f32 %v4100_v58, %v4147_v34  ;;  %v4148_v50 = vpop.f32.mrb[90].mxu1  ;;  %5048 = vmatprep.subr.bf16.mxu1 %v5471_v54  ;;  %v3425_v58 = vld [vmem:[%s8206_s11 + $0x50] sm:$0xff]  ;;  %v5070_v59 = vpack.c.bf16 %v3154_v16, %v3153_v41  ;;  %v5073_v34 = vpack.c.bf16 %v3156_v14, %v3155_v61  ;;  %v3335_v41 = vld [vmem:[%s8204_s9 + $0x240] sm:$0xff]  ;;  %v3336_v16 = vld [vmem:[%s8204_s9 + $0x248] sm:$0xff] }
 0x5a6   : > { %v4149_v26 = vpop.f32.mrb[91].mxu1  ;;  %v5157_v4 = vpack.c.bf16 %v3426_v35, %v3425_v58  ;;  %v5112_v58 = vpack.c.bf16 %v3253_v55, %v3252_v56  ;;  %v3254_v35 = vld [vmem:[%s8204_s9 + $0x1f0] sm:$0xff]  ;;  %v3338_v61 = vld [vmem:[%s8204_s9 + $0x258] sm:$0xff] }
 0x5a7   : > { %2968 = vst [vmem:[%s7750_s29 + $0x8] sm:$0xff] %v7773_v6  ;;  %v4150_v46 = vadd.f32 %v4149_v26, %v4148_v50  ;;  %v3162_v50 = vld [vmem:[%s8204_s9 + $0x148] sm:$0xff]  ;;  %v3164_v26 = vld [vmem:[%s8204_s9 + $0x158] sm:$0xff] }
 0x5a8   : > { %5050 = vmatpush3.bf16.msra.mxu1 %v5049_v24  ;;  %5158 = vmatpush3.bf16.msra.mxu0 %v5157_v4  ;;  %v3159_v24 = vld [vmem:[%s8204_s9 + $0x130] sm:$0xff]  ;;  %v5085_v44 = vpack.c.bf16 %v3164_v26, %v3163_v20  ;;  %v3328_v4 = vld [vmem:[%s8204_s9 + $0x208] sm:$0xff] }
 0x5a9   : > { %v7791_v32 = vmax.f32 %v4103_v0, %v4150_v46  ;;  %v4151_v25 = vpop.f32.mrb[92].mxu1  ;;  %5051 = vmatprep.subr.bf16.mxu1 %v5471_v54  ;;  %v3078_v0 = vld [vmem:[%s8204_s9 + $0xe0] sm:$0xff]  ;;  %5159 = vmatprep.subr.bf16.mxu0 %v5471_v54  ;;  %v5079_v37 = vpack.c.bf16 %v3160_v63, %v3159_v24  ;;  %v3342_v24 = vld [vmem:[%s8204_s9 + $0x278] sm:$0xff] }
 0x5aa   : > { %v4152_v18 = vpop.f32.mrb[93].mxu1  ;;  %v5064_v62 = vpack.c.bf16 %v3079_v1, %v3078_v0  ;;  %v3165_v46 = vld [vmem:[%s8204_s9 + $0x160] sm:$0xff] }
 0x5ab   : > { %2969 = vst [vmem:[%s7750_s29 + $0x10] sm:$0xff] %v7791_v32  ;;  %v4153_v2 = vadd.f32 %v4152_v18, %v4151_v25  ;;  %v5088_v31 = vpack.c.bf16 %v3166_v22, %v3165_v46  ;;  %v3168_v25 = vld [vmem:[%s8204_s9 + $0x178] sm:$0xff]  ;;  %v3241_v18 = vld [vmem:[%s8204_s9 + $0x188] sm:$0xff]  ;;  %v3327_v1 = vld [vmem:[%s8204_s9 + $0x200] sm:$0xff] }
 0x5ac   : > { %5053 = vmatpush3.bf16.msra.mxu1 %v5052_v15  ;;  %v3167_v15 = vld [vmem:[%s8204_s9 + $0x170] sm:$0xff]  ;;  %v5094_v9 = vpack.c.bf16 %v3241_v18, %v3240_v47  ;;  %v3511_v22 = vld [vmem:[%s8208_s13 + $0x18] sm:$0xff] }
 0x5ad   : > { %v7809_v45 = vmax.f32 %v4106_v5, %v4153_v2  ;;  %v4154_v51 = vpop.f32.mrb[94].mxu1  ;;  %5054 = vmatprep.subr.bf16.mxu1 %v5471_v54  ;;  %v3427_v5 = vld [vmem:[%s8206_s11 + $0x60] sm:$0xff]  ;;  %v5091_v38 = vpack.c.bf16 %v3168_v25, %v3167_v15  ;;  %v3242_v2 = vld [vmem:[%s8204_s9 + $0x190] sm:$0xff]  ;;  %v3513_v25 = vld [vmem:[%s8208_s13 + $0x28] sm:$0xff] }
 0x5ae   : > { %v4155_v12 = vpop.f32.mrb[95].mxu1  ;;  %v5160_v8 = vpack.c.bf16 %v3428_v21, %v3427_v5  ;;  %v5097_v43 = vpack.c.bf16 %v3243_v40, %v3242_v2  ;;  %v5118_v5 = vpack.c.bf16 %v3328_v4, %v3327_v1  ;;  %v3329_v21 = vld [vmem:[%s8204_s9 + $0x210] sm:$0xff]  ;;  %v3512_v15 = vld [vmem:[%s8208_s13 + $0x20] sm:$0xff]  ;;  %v3515_v18 = vld [vmem:[%s8208_s13 + $0x38] sm:$0xff] }
 0x5af   : > { %2970 = vst [vmem:[%s7750_s29 + $0x18] sm:$0xff] %v7809_v45  ;;  %v4156_v27 = vadd.f32 %v4155_v12, %v4154_v51  ;;  %v3245_v51 = vld [vmem:[%s8204_s9 + $0x1a8] sm:$0xff]  ;;  %v3510_v46 = vld [vmem:[%s8208_s13 + $0x10] sm:$0xff]  ;;  %v3516_v2 = vld [vmem:[%s8208_s13 + $0x40] sm:$0xff] }
 0x5b0   : > { %5056 = vmatpush3.bf16.msra.mxu1 %v5055_v39  ;;  %5161 = vmatpush3.bf16.msra.mxu0 %v5160_v8  ;;  %v3244_v39 = vld [vmem:[%s8204_s9 + $0x1a0] sm:$0xff]  ;;  %v3332_v8 = vld [vmem:[%s8204_s9 + $0x228] sm:$0xff]  ;;  %v3514_v47 = vld [vmem:[%s8208_s13 + $0x30] sm:$0xff] }
 0x5b1   : > { %v7828_v36 = vmax.f32 %v7739_v57, %v4156_v27  ;;  %5057 = vmatprep.subr.bf16.mxu1 %v5471_v54  ;;  %v3080_v57 = vld [vmem:[%s8204_s9 + $0xf0] sm:$0xff]  ;;  %5162 = vmatprep.subr.bf16.mxu0 %v5471_v54  ;;  %v5100_v52 = vpack.c.bf16 %v3245_v51, %v3244_v39  ;;  %v3249_v27 = vld [vmem:[%s8204_s9 + $0x1c8] sm:$0xff]  ;;  %v3519_v51 = vld [vmem:[%s8208_s13 + $0x58] sm:$0xff] }
 0x5b2   : > { %v5067_v30 = vpack.c.bf16 %v3081_v49, %v3080_v57  ;;  %v5106_v33 = vpack.c.bf16 %v3249_v27, %v3248_v13  ;;  %v3331_v49 = vld [vmem:[%s8204_s9 + $0x220] sm:$0xff]  ;;  %v3517_v40 = vld [vmem:[%s8208_s13 + $0x48] sm:$0xff]  ;;  %v3518_v39 = vld [vmem:[%s8208_s13 + $0x50] sm:$0xff] }
 0x5b3   : > { %2971 = vst [vmem:[%s7750_s29 + $0x20] sm:$0xff] %v7828_v36  ;;  %v5124_v11 = vpack.c.bf16 %v3332_v8, %v3331_v49  ;;  %v3522_v13 = vld [vmem:[%s8208_s13 + $0x70] sm:$0xff]  ;;  %v3523_v27 = vld [vmem:[%s8208_s13 + $0x78] sm:$0xff]  ;;  %v3606_v4 = vld [vmem:[%s8210_s15 + $0x20] sm:$0xff] }
 0x5b4   : > { %5059 = vmatpush3.bf16.msra.mxu1 %v5058_v3  ;;  %5164 = vmatpush3.bf16.msra.mxu0 %v5163_v10  ;;  %v3251_v3 = vld [vmem:[%s8204_s9 + $0x1d8] sm:$0xff]  ;;  %v5130_v10 = vpack.c.bf16 %v3336_v16, %v3335_v41  ;;  %v3610_v49 = vld [vmem:[%s8210_s15 + $0x40] sm:$0xff]  ;;  %v3611_v8 = vld [vmem:[%s8210_s15 + $0x48] sm:$0xff] }
 0x5b5   : > { %5060 = vmatprep.subr.bf16.mxu1 %v5471_v54  ;;  %5165 = vmatprep.subr.bf16.mxu0 %v5471_v54  ;;  %v5109_v53 = vpack.c.bf16 %v3251_v3, %v3250_v29  ;;  %v3602_v29 = vld [vmem:[%s8210_s15] sm:$0xff]  ;;  %v3603_v3 = vld [vmem:[%s8210_s15 + $0x8] sm:$0xff] }
 0x5b6   : > { %v5190_v55 = vpack.c.bf16 %v3603_v3, %v3602_v29  ;;  %v3614_v41 = vld [vmem:[%s8210_s15 + $0x60] sm:$0xff]  ;;  %v3615_v16 = vld [vmem:[%s8210_s15 + $0x68] sm:$0xff] }
 0x5b8   : > { %5062 = vmatpush3.bf16.msra.mxu1 %v5061_v60  ;;  %v3255_v60 = vld [vmem:[%s8204_s9 + $0x1f8] sm:$0xff] }
 0x5b9   : > { %5063 = vmatprep.subr.bf16.mxu1 %v5471_v54  ;;  %v5115_v0 = vpack.c.bf16 %v3255_v60, %v3254_v35  ;;  %v3604_v60 = vld [vmem:[%s8210_s15 + $0x10] sm:$0xff] }
 0x5bc   : > { %5065 = vmatpush3.bf16.msra.mxu1 %v5064_v62  ;;  %v3330_v62 = vld [vmem:[%s8204_s9 + $0x218] sm:$0xff] }
 0x5bd   : > { %5066 = vmatprep.subr.bf16.mxu1 %v5471_v54  ;;  %v5121_v57 = vpack.c.bf16 %v3330_v62, %v3329_v21  ;;  %v3608_v62 = vld [vmem:[%s8210_s15 + $0x30] sm:$0xff] }
 0x5c0   : > { %5068 = vmatpush3.bf16.msra.mxu1 %v5067_v30 }
 0x5c1   : > { %5069 = vmatprep.subr.bf16.mxu1 %v5471_v54 }
 0x5c3   : > { %4361 = vmatmul.mubr.f32.vlgmr.msra.gmra.mrb[96].mxu1 %v7773_v6  ;;  %v3161_v6 = vld [vmem:[%s8204_s9 + $0x140] sm:$0xff] }
 0x5c4   : > { %5071 = vmatpush3.bf16.msra.mxu1 %v5070_v59  ;;  %4395 = vmatprep.mubr.msk.f32.mxu1 %vm5472_vm0, %v5470_v28  ;;  %v5082_v42 = vpack.c.bf16 %v3162_v50, %v3161_v6  ;;  %v3337_v59 = vld [vmem:[%s8204_s9 + $0x250] sm:$0xff]  ;;  %v3508_v6 = vld [vmem:[%s8208_s13] sm:$0xff]  ;;  %v3509_v50 = vld [vmem:[%s8208_s13 + $0x8] sm:$0xff] }
 0x5c5   : > { %5072 = vmatprep.subr.bf16.mxu1 %v5471_v54  ;;  %v5133_v14 = vpack.c.bf16 %v3338_v61, %v3337_v59  ;;  %v3616_v59 = vld [vmem:[%s8210_s15 + $0x70] sm:$0xff]  ;;  %v3617_v61 = vld [vmem:[%s8210_s15 + $0x78] sm:$0xff] }
 0x5c8   : > { %5074 = vmatpush3.bf16.msra.mxu1 %v5073_v34  ;;  %v3339_v34 = vld [vmem:[%s8204_s9 + $0x260] sm:$0xff] }
 0x5c9   : > { %5075 = vmatprep.subr.bf16.mxu1 %v5471_v54  ;;  %v5136_v19 = vpack.c.bf16 %v3340_v17, %v3339_v34  ;;  %v3909_v34 = vld [vmem:[%s8209_s14] ss:$0 sm:$0xff] }
 0x5cc   : > { %5077 = vmatpush3.bf16.msra.mxu1 %v5076_v23  ;;  %v3341_v23 = vld [vmem:[%s8204_s9 + $0x270] sm:$0xff] }
 0x5cd   : > { %5078 = vmatprep.subr.bf16.mxu1 %v5471_v54  ;;  %v5139_v63 = vpack.c.bf16 %v3342_v24, %v3341_v23 }
 0x5d0   : > { %5080 = vmatpush3.bf16.msra.mxu1 %v5079_v37  ;;  %v3907_v37 = vld [vmem:[%s8205_s10] ss:$0 sm:$0xff] }
 0x5d1   : > { %5081 = vmatprep.subr.bf16.mxu1 %v5471_v54 }
 0x5d4   : > { %5083 = vmatpush3.bf16.msra.mxu1 %v5082_v42 }
 0x5d5   : > { %5084 = vmatprep.subr.bf16.mxu1 %v5471_v54 }
 0x5d8   : > { %5086 = vmatpush3.bf16.msra.mxu1 %v5085_v44 }
 0x5d9   : > { %5087 = vmatprep.subr.bf16.mxu1 %v5471_v54 }
 0x5dc   : > { %5089 = vmatpush3.bf16.msra.mxu1 %v5088_v31  ;;  %v5169_v31 = vpack.c.bf16 %v3511_v22, %v3510_v46 }
 0x5dd   : > { %5090 = vmatprep.subr.bf16.mxu1 %v5471_v54 }
 0x5e0   : > { %5092 = vmatpush3.bf16.msra.mxu1 %v5091_v38  ;;  %v5172_v38 = vpack.c.bf16 %v3513_v25, %v3512_v15 }
 0x5e1   : > { %5093 = vmatprep.subr.bf16.mxu1 %v5471_v54 }
 0x5e3   : > { %4396 = vmatmul.mubr.f32.vlgmr.msra.gmra.mrb[96].mxu1 %v7791_v32  ;;  %v3246_v32 = vld [vmem:[%s8204_s9 + $0x1b0] sm:$0xff] }
 0x5e4   : > { %5095 = vmatpush3.bf16.msra.mxu1 %v5094_v9  ;;  %4430 = vmatprep.mubr.msk.f32.mxu1 %vm5472_vm0, %v5470_v28  ;;  %v5103_v12 = vpack.c.bf16 %v3247_v7, %v3246_v32  ;;  %v5175_v9 = vpack.c.bf16 %v3515_v18, %v3514_v47  ;;  %v3520_v32 = vld [vmem:[%s8208_s13 + $0x60] sm:$0xff]  ;;  %v3521_v7 = vld [vmem:[%s8208_s13 + $0x68] sm:$0xff] }
 0x5e5   : > { %5096 = vmatprep.subr.bf16.mxu1 %v5471_v54 }
 0x5e8   : > { %5098 = vmatpush3.bf16.msra.mxu1 %v5097_v43  ;;  %v5178_v43 = vpack.c.bf16 %v3517_v40, %v3516_v2 }
 0x5e9   : > { %5099 = vmatprep.subr.bf16.mxu1 %v5471_v54 }
 0x5ec   : > { %5101 = vmatpush3.bf16.msra.mxu1 %v5100_v52  ;;  %v5181_v52 = vpack.c.bf16 %v3519_v51, %v3518_v39 }
 0x5ed   : > { %5102 = vmatprep.subr.bf16.mxu1 %v5471_v54 }
 0x5f0   : > { %5104 = vmatpush3.bf16.msra.mxu1 %v5103_v12  ;;  %v5184_v12 = vpack.c.bf16 %v3521_v7, %v3520_v32 }
 0x5f1   : > { %5105 = vmatprep.subr.bf16.mxu1 %v5471_v54 }
 0x5f4   : > { %5107 = vmatpush3.bf16.msra.mxu1 %v5106_v33  ;;  %v5187_v33 = vpack.c.bf16 %v3523_v27, %v3522_v13 }
 0x5f5   : > { %5108 = vmatprep.subr.bf16.mxu1 %v5471_v54 }
 0x5f8   : > { %5110 = vmatpush3.bf16.msra.mxu1 %v5109_v53  ;;  %v3908_v53 = vld [vmem:[%s8207_s12] ss:$0 sm:$0xff] }
 0x5f9   : > { %5111 = vmatprep.subr.bf16.mxu1 %v5471_v54 }
 0x5fc   : > { %5113 = vmatpush3.bf16.msra.mxu1 %v5112_v58 }
 0x5fd   : > { %5114 = vmatprep.subr.bf16.mxu1 %v5471_v54 }
 0x600   : > { %5116 = vmatpush3.bf16.msra.mxu1 %v5115_v0  ;;  %v3605_v0 = vld [vmem:[%s8210_s15 + $0x18] sm:$0xff] }
 0x601   : > { %5117 = vmatprep.subr.bf16.mxu1 %v5471_v54  ;;  %v5193_v1 = vpack.c.bf16 %v3605_v0, %v3604_v60 }
 0x603   : > { %4431 = vmatmul.mubr.f32.vlgmr.msra.gmra.mrb[96].mxu1 %v7809_v45  ;;  %v3333_v45 = vld [vmem:[%s8204_s9 + $0x230] sm:$0xff] }
 0x604   : > { %5119 = vmatpush3.bf16.msra.mxu1 %v5118_v5  ;;  %4465 = vmatprep.mubr.msk.f32.mxu1 %vm5472_vm0, %v5470_v28  ;;  %v5127_v30 = vpack.c.bf16 %v3334_v48, %v3333_v45  ;;  %v3607_v5 = vld [vmem:[%s8210_s15 + $0x28] sm:$0xff]  ;;  %v3612_v45 = vld [vmem:[%s8210_s15 + $0x50] sm:$0xff]  ;;  %v3613_v48 = vld [vmem:[%s8210_s15 + $0x58] sm:$0xff] }
 0x605   : > { %5120 = vmatprep.subr.bf16.mxu1 %v5471_v54  ;;  %v5196_v21 = vpack.c.bf16 %v3607_v5, %v3606_v4 }
 0x608   : > { %5122 = vmatpush3.bf16.msra.mxu1 %v5121_v57 }
 0x609   : > { %5123 = vmatprep.subr.bf16.mxu1 %v5471_v54 }
 0x60c   : > { %5125 = vmatpush3.bf16.msra.mxu1 %v5124_v11  ;;  %v5202_v11 = vpack.c.bf16 %v3611_v8, %v3610_v49 }
 0x60d   : > { %5126 = vmatprep.subr.bf16.mxu1 %v5471_v54 }
 0x610   : > { %5128 = vmatpush3.bf16.msra.mxu1 %v5127_v30  ;;  %v5205_v30 = vpack.c.bf16 %v3613_v48, %v3612_v45 }
 0x611   : > { %5129 = vmatprep.subr.bf16.mxu1 %v5471_v54 }
 0x614   : > { %5131 = vmatpush3.bf16.msra.mxu1 %v5130_v10  ;;  %v5208_v10 = vpack.c.bf16 %v3615_v16, %v3614_v41 }
 0x615   : > { %5132 = vmatprep.subr.bf16.mxu1 %v5471_v54 }
 0x618   : > { %5134 = vmatpush3.bf16.msra.mxu1 %v5133_v14  ;;  %v5211_v14 = vpack.c.bf16 %v3617_v61, %v3616_v59 }
 0x619   : > { %5135 = vmatprep.subr.bf16.mxu1 %v5471_v54 }
 0x61c   : > { %5137 = vmatpush3.bf16.msra.mxu1 %v5136_v19 }
 0x61d   : > { %5138 = vmatprep.subr.bf16.mxu1 %v5471_v54 }
 0x620   : > { %5140 = vmatpush3.bf16.msra.mxu1 %v5139_v63 }
 0x623   : > { %4466 = vmatmul.mubr.f32.vlgmr.msra.gmra.mrb[96].mxu1 %v7828_v36  ;;  %v5166_v36 = vpack.c.bf16 %v3509_v50, %v3508_v6 }
 0x6f6   : > { %v3409_v42 = vpop.f32.mrb[96].mxu1 }
 0x6f7   : > { %v5289_v20 = vadd.f32 %v3907_v37, %v3409_v42  ;;  %v4467_v26 = vpop.f32.mrb[97].mxu1 }
 0x6f9   : > { %v3414_v44 = vmax.f32 %v5289_v20, 0.0 }
 0x6fb   : > { %3695 = vst [vmem:[%s8069_s26] sm:$0xff] %v3414_v44  ;;  %4501 = vmatmul.mubr.f32.vlgmr.msra.gmra.mrb[56].mxu0 %v3414_v44 }
 0x6fc   : > { %5167 = vmatpush3.bf16.msra.mxu0 %v5166_v36  ;;  %4535 = vmatprep.mubr.msk.f32.mxu0 %vm5472_vm0, %v5470_v28 }
 0x6fd   : > { %5168 = vmatprep.subr.bf16.mxu0 %v5471_v54 }
 0x700   : > { %5170 = vmatpush3.bf16.msra.mxu0 %v5169_v31 }
 0x701   : > { %5171 = vmatprep.subr.bf16.mxu0 %v5471_v54 }
 0x704   : > { %5173 = vmatpush3.bf16.msra.mxu0 %v5172_v38 }
 0x705   : > { %5174 = vmatprep.subr.bf16.mxu0 %v5471_v54 }
 0x708   : > { %5176 = vmatpush3.bf16.msra.mxu0 %v5175_v9 }
 0x709   : > { %5177 = vmatprep.subr.bf16.mxu0 %v5471_v54 }
 0x70c   : > { %5179 = vmatpush3.bf16.msra.mxu0 %v5178_v43 }
 0x70d   : > { %5180 = vmatprep.subr.bf16.mxu0 %v5471_v54 }
 0x710   : > { %5182 = vmatpush3.bf16.msra.mxu0 %v5181_v52 }
 0x711   : > { %5183 = vmatprep.subr.bf16.mxu0 %v5471_v54 }
 0x714   : > { %5185 = vmatpush3.bf16.msra.mxu0 %v5184_v12 }
 0x715   : > { %5186 = vmatprep.subr.bf16.mxu0 %v5471_v54 }
 0x718   : > { %5188 = vmatpush3.bf16.msra.mxu0 %v5187_v33 }
 0x719   : > { %5189 = vmatprep.subr.bf16.mxu0 %v5471_v54 }
 0x7ce   : > { %v3504_v56 = vpop.f32.mrb[56].mxu0 }
 0x7cf   : > { %v3505_v58 = vadd.f32 %v3908_v53, %v3504_v56  ;;  %v4502_v35 = vpop.f32.mrb[57].mxu0 }
 0x7d1   : > { %4536 = vmatmul.mubr.f32.vlgmr.msra.gmra.mrb[58].mxu0 %v3505_v58 }
 0x7d2   : > { %5191 = vmatpush3.bf16.msra.mxu0 %v5190_v55  ;;  %4570 = vmatprep.mubr.msk.f32.mxu0 %vm5472_vm0, %v5470_v28  ;;  %v3609_v28 = vld [vmem:[%s8210_s15 + $0x38] sm:$0xff] }
 0x7d3   : > { %5192 = vmatprep.subr.bf16.mxu0 %v5471_v54  ;;  %v5199_v57 = vpack.c.bf16 %v3609_v28, %v3608_v62 }
 0x7d6   : > { %5194 = vmatpush3.bf16.msra.mxu0 %v5193_v1 }
 0x7d7   : > { %5195 = vmatprep.subr.bf16.mxu0 %v5471_v54 }
 0x7da   : > { %5197 = vmatpush3.bf16.msra.mxu0 %v5196_v21 }
 0x7db   : > { %5198 = vmatprep.subr.bf16.mxu0 %v5471_v54 }
 0x7de   : > { %5200 = vmatpush3.bf16.msra.mxu0 %v5199_v57 }
 0x7df   : > { %5201 = vmatprep.subr.bf16.mxu0 %v5471_v54 }
 0x7e2   : > { %5203 = vmatpush3.bf16.msra.mxu0 %v5202_v11 }
 0x7e3   : > { %5204 = vmatprep.subr.bf16.mxu0 %v5471_v54 }
 0x7e6   : > { %5206 = vmatpush3.bf16.msra.mxu0 %v5205_v30 }
 0x7e7   : > { %5207 = vmatprep.subr.bf16.mxu0 %v5471_v54 }
 0x7ea   : > { %5209 = vmatpush3.bf16.msra.mxu0 %v5208_v10 }
 0x7eb   : > { %5210 = vmatprep.subr.bf16.mxu0 %v5471_v54  ;;  %v3910_v54 = vld [vmem:[%s8211_s16] ss:$0 sm:$0xff] }
 0x7ee   : > { %5212 = vmatpush3.bf16.msra.mxu0 %v5211_v14 }
 0x8a4   : > { %v3597_v17 = vpop.f32.mrb[58].mxu0 }
 0x8a5   : > { %v3598_v19 = vadd.f32 %v3909_v34, %v3597_v17  ;;  %v4537_v23 = vpop.f32.mrb[59].mxu0 }
 0x8a7   : > { %v3601_v24 = vmax.f32 %v3598_v19, 0.0 }
 0x8a9   : > { %3696 = vst [vmem:[%s8069_s26 + $0x8] sm:$0xff] %v3601_v24  ;;  %4571 = vmatmul.mubr.f32.vlgmr.msra.gmra.mrb[60].mxu0 %v3601_v24 }
 0x97c   : > { %v3691_v63 = vpop.f32.mrb[60].mxu0 }
 0x97d   : > { %v3692_v37 = vadd.f32 %v3910_v54, %v3691_v63  ;;  %v4572_v6 = vpop.f32.mrb[61].mxu0 }
 0x97f   : > { %3697 = vst [vmem:[%s8069_s26 + $0x10] sm:$0xff] %v3692_v37 }
 0x980 PF: > { %s8235_s23 = sld [smem:[#allocation2_spill]] }
 0x986   : > { %s32_s2 = sadd.s32 1, %s8235_s23  }
 0x987   : > { %p29_p9 = scmp.ge.s32.totalorder %s32_s2, 4  }
 0x989   :  { %31 = sbr.rel (!%p29_p9) target bundleno = 7 (0x7), region = 166 }

</bundles_post_ra>
